<compile_context>
chip_gen: v6e
topology: v6e:2x2x1
jax: 0.10.0
libtpu: 0.0.40
codegen_flags: <defaults>
</compile_context>

<pallas_src>
import functools

import jax
import jax.numpy as jnp
from jax import lax
from jax.experimental import pallas as pl
from jax.experimental.pallas import tpu as pltpu

BN_EPS = 1e-5       # nn.BatchNorm1d default eps
NORM_EPS = 1e-12    # F.normalize default eps
MOMENTUM_M = 0.999
TEMPERATURE = 1.0
GROUP_SIZE = 1      # single-device run -> concat_all_gather is identity
LANE = 128
# TODO(synk): multi-device concat_all_gather (RDMA all-gather) not implemented;
#             with group_size=1 it is an identity, matching a 1-device group.
# TODO(synk): at reference shapes (mlp_dim=4096) the head matmuls need gridded
#             K/N tiling + vmem_limit_bytes; whole-array residency is used here
#             only because the toy weights are tiny.

_MATMUL_KEYS = ("wpe", "w1", "w2", "w3", "p1", "p2")


# ---------------------------------------------------------------------------
# in-kernel helpers
# ---------------------------------------------------------------------------
def _bn_train(x, gamma=None, beta=None):
    """nn.BatchNorm1d (training mode): one-pass batch stats, biased variance."""
    mean = jnp.mean(x, axis=0, keepdims=True)
    mean_sq = jnp.mean(x * x, axis=0, keepdims=True)
    var = mean_sq - mean * mean
    xhat = (x - mean) * lax.rsqrt(var + BN_EPS)
    if gamma is not None:
        xhat = xhat * gamma + beta
    return xhat


def _l2_normalize(x):
    """F.normalize(x, dim=1) == x / max(||x||, eps), via rsqrt on the EUP."""
    sq = jnp.sum(x * x, axis=1, keepdims=True)
    return x * lax.rsqrt(jnp.maximum(sq, NORM_EPS * NORM_EPS))


def _bf16(x):
    return x.astype(jnp.bfloat16)


def _encoder_head(xp, wpe, w1, g1, b1, w2, g2, b2, w3, n_patches):
    """Backbone stub (patch embed + mean pool over patches) + 3-layer MoCo head."""
    # patch embedding: (B*P, patch_dim) @ (patch_dim, hidden), bf16 MXU, f32 acc
    h = jnp.dot(xp, wpe, preferred_element_type=jnp.float32)
    bp, hid = h.shape
    b = bp // n_patches
    # mean pool over patches: reshape + sublane reduce (no dense pooling matmul)
    feat = jnp.mean(h.reshape(b, n_patches, hid), axis=1)
    # head layer 1: Linear -> BN -> ReLU
    z = jnp.dot(_bf16(feat), w1, preferred_element_type=jnp.float32)
    z = jnp.maximum(_bn_train(z, g1, b1), 0.0)
    # head layer 2: Linear -> BN -> ReLU
    z = jnp.dot(_bf16(z), w2, preferred_element_type=jnp.float32)
    z = jnp.maximum(_bn_train(z, g2, b2), 0.0)
    # head layer 3: Linear -> BN(affine=False)
    z = jnp.dot(_bf16(z), w3, preferred_element_type=jnp.float32)
    return _bn_train(z)


# ---------------------------------------------------------------------------
# Pallas kernels (grid=(2,) over the two augmented views, "parallel")
# ---------------------------------------------------------------------------
def q_path_kernel(xp_ref, wpe_ref, w1_ref, g1_ref, b1_ref, w2_ref, g2_ref,
                  b2_ref, w3_ref, p1_ref, pg1_ref, pb1_ref, p2_ref, out_ref,
                  *, n_patches):
    """Fused base encoder + projector head + MoCo predictor for one view."""
    z = _encoder_head(xp_ref[...], wpe_ref[...],
                      w1_ref[...], g1_ref[...], b1_ref[...],
                      w2_ref[...], g2_ref[...], b2_ref[...],
                      w3_ref[...], n_patches)
    # predictor layer 1: Linear -> BN -> ReLU
    z = jnp.dot(_bf16(z), p1_ref[...], preferred_element_type=jnp.float32)
    z = jnp.maximum(_bn_train(z, pg1_ref[...], pb1_ref[...]), 0.0)
    # predictor layer 2: Linear -> BN(affine=False)
    z = jnp.dot(_bf16(z), p2_ref[...], preferred_element_type=jnp.float32)
    out_ref[...] = _bn_train(z)


def k_path_kernel(xp_ref, wpe_ref, w1_ref, g1_ref, b1_ref, w2_ref, g2_ref,
                  b2_ref, w3_ref, out_ref, *, n_patches):
    """Momentum encoder + projector head for one view."""
    out_ref[...] = _encoder_head(xp_ref[...], wpe_ref[...],
                                 w1_ref[...], g1_ref[...], b1_ref[...],
                                 w2_ref[...], g2_ref[...], b2_ref[...],
                                 w3_ref[...], n_patches)


def logits_kernel(q_ref, k_ref, out_ref, *, inv_t):
    """normalize(q) . normalize(k)^T / T, contracting the shared last dim."""
    q = _l2_normalize(q_ref[...])
    k = _l2_normalize(k_ref[...])
    out_ref[...] = lax.dot_general(
        _bf16(q), _bf16(k), (((1,), (1,)), ((), ())),
        preferred_element_type=jnp.float32) * inv_t


def ema_kernel(*refs, n, m):
    """param_m = m*param_m + (1-m)*param_b for every momentum-encoder leaf."""
    mom_refs, base_refs, out_refs = refs[:n], refs[n:2 * n], refs[2 * n:]
    for i in range(n):
        out_refs[i][...] = mom_refs[i][...] * m + base_refs[i][...] * (1.0 - m)


# ---------------------------------------------------------------------------
# pallas_call wrappers
# ---------------------------------------------------------------------------
_PARALLEL = pltpu.CompilerParams(dimension_semantics=("parallel",))


def _vmem_spec():
    return pl.BlockSpec(memory_space=pltpu.MemorySpace.VMEM)


def _full_block_spec(a):
    idx = (0,) * a.ndim
    return pl.BlockSpec(a.shape, lambda v, _idx=idx: _idx)


def _view_spec(tail):
    n = len(tail)
    return pl.BlockSpec((None,) + tuple(tail), lambda v, _n=n: (v,) + (0,) * _n)


def q_path_forward(xp, base, pred, n_patches):
    _, bp, pdim = xp.shape
    b = bp // n_patches
    dim = pred["p2"].shape[1]
    weights = (base["wpe"], base["w1"], base["g1"], base["b1"],
               base["w2"], base["g2"], base["b2"], base["w3"],
               pred["p1"], pred["pg1"], pred["pb1"], pred["p2"])
    return pl.pallas_call(
        functools.partial(q_path_kernel, n_patches=n_patches),
        out_shape=jax.ShapeDtypeStruct((2, b, dim), jnp.float32),
        grid=(2,),
        in_specs=[_view_spec((bp, pdim))] + [_full_block_spec(w) for w in weights],
        out_specs=_view_spec((b, dim)),
        compiler_params=_PARALLEL,
    )(xp, *weights)


def k_path_forward(xp, enc, n_patches):
    _, bp, pdim = xp.shape
    b = bp // n_patches
    dim = enc["w3"].shape[1]
    weights = (enc["wpe"], enc["w1"], enc["g1"], enc["b1"],
               enc["w2"], enc["g2"], enc["b2"], enc["w3"])
    return pl.pallas_call(
        functools.partial(k_path_kernel, n_patches=n_patches),
        out_shape=jax.ShapeDtypeStruct((2, b, dim), jnp.float32),
        grid=(2,),
        in_specs=[_view_spec((bp, pdim))] + [_full_block_spec(w) for w in weights],
        out_specs=_view_spec((b, dim)),
        compiler_params=_PARALLEL,
    )(xp, *weights)


def logits_forward(q, k_padded, temperature):
    _, b, dim = q.shape
    m_pad = k_padded.shape[1]
    return pl.pallas_call(
        functools.partial(logits_kernel, inv_t=float(1.0 / temperature)),
        out_shape=jax.ShapeDtypeStruct((2, b, m_pad), jnp.float32),
        grid=(2,),
        in_specs=[_view_spec((b, dim)),
                  # logits[0] = q1 . k2, logits[1] = q2 . k1  ->  other view's k
                  pl.BlockSpec((None, m_pad, dim), lambda v: (1 - v, 0, 0))],
        out_specs=_view_spec((b, m_pad)),
        compiler_params=_PARALLEL,
    )(q, k_padded)


def ema_update(momentum, base, m):
    mom_leaves, treedef = jax.tree_util.tree_flatten(momentum)
    base_leaves = jax.tree_util.tree_leaves(base)
    n = len(mom_leaves)
    new_leaves = pl.pallas_call(
        functools.partial(ema_kernel, n=n, m=float(m)),
        out_shape=tuple(jax.ShapeDtypeStruct(l.shape, l.dtype) for l in mom_leaves),
        in_specs=[_vmem_spec() for _ in range(2 * n)],
        out_specs=tuple(_vmem_spec() for _ in range(n)),
        input_output_aliases={i: i for i in range(n)},   # update in place
    )(*mom_leaves, *base_leaves)
    return jax.tree_util.tree_unflatten(treedef, new_leaves)


# ---------------------------------------------------------------------------
# parameter init (deterministic, synthetic) + forward glue
# ---------------------------------------------------------------------------
def init_params(key, patch_dim, hidden_dim, mlp_dim, dim):
    ks = jax.random.split(key, 6)

    def lin(k, i, o):
        return jax.random.normal(k, (i, o), jnp.float32) * 0.02

    base = dict(
        wpe=lin(ks[0], patch_dim, hidden_dim),
        w1=lin(ks[1], hidden_dim, mlp_dim),
        g1=jnp.ones((1, mlp_dim), jnp.float32),
        b1=jnp.zeros((1, mlp_dim), jnp.float32),
        w2=lin(ks[2], mlp_dim, mlp_dim),
        g2=jnp.ones((1, mlp_dim), jnp.float32),
        b2=jnp.zeros((1, mlp_dim), jnp.float32),
        w3=lin(ks[3], mlp_dim, dim),
    )
    # momentum encoder is initialized as an exact copy of the base encoder
    momentum = jax.tree_util.tree_map(lambda a: a + 0.0, base)
    predictor = dict(
        p1=lin(ks[4], dim, mlp_dim),
        pg1=jnp.ones((1, mlp_dim), jnp.float32),
        pb1=jnp.zeros((1, mlp_dim), jnp.float32),
        p2=lin(ks[5], mlp_dim, dim),
    )
    return dict(base=base, momentum=momentum, predictor=predictor)


def to_patches(x, ph, pw):
    """(B, C, H, W) NCHW -> (B*P, C*ph*pw) patch-major rows."""
    b, c, h, w = x.shape
    x = x.reshape(b, c, h // ph, ph, w // pw, pw)
    x = jnp.transpose(x, (0, 2, 4, 1, 3, 5))       # B, nh, nw, C, ph, pw
    p = (h // ph) * (w // pw)
    return x.reshape(b * p, c * ph * pw), p


def _cast_for_matmul(tree):
    """bf16 for MXU weight operands; BN affine params stay f32."""
    return {k: (v.astype(jnp.bfloat16) if k in _MATMUL_KEYS else v)
            for k, v in tree.items()}


@functools.partial(jax.jit, static_argnames=("ph", "pw", "m", "temperature"))
def moco_vit_forward(x, params, ph=8, pw=8, m=MOMENTUM_M, temperature=TEMPERATURE):
    """x: (B, 2, C, H, W) float32.  Returns ({'logits': (2,N,M)}, new_momentum)."""
    x1, x2 = x[:, 0], x[:, 1]
    b = x1.shape[0]

    x1p, n_patches = to_patches(x1, ph, pw)
    x2p, _ = to_patches(x2, ph, pw)
    xp = jnp.stack([x1p, x2p]).astype(jnp.bfloat16)     # (2, B*P, patch_dim)

    # q path: base encoder + projector + predictor fused into one kernel,
    # grid over the two views (per-view BN stats, both TCs usable on v7x).
    q = q_path_forward(xp, _cast_for_matmul(params["base"]),
                       _cast_for_matmul(params["predictor"]), n_patches)

    # momentum update (in-place via io aliasing), performed before the k
    # forward exactly as in the reference, and returned so it persists.
    new_momentum = ema_update(params["momentum"], params["base"], m)

    # k path: momentum encoder + projector head for both views.
    k = k_path_forward(xp, _cast_for_matmul(new_momentum), n_patches)

    # concat_all_gather with group_size=1 is an identity (single device).
    m_total = b * GROUP_SIZE
    m_pad = max(LANE, ((m_total + LANE - 1) // LANE) * LANE)
    # pad the gather dim with zero rows so the logits store is lane-dense;
    # zero rows normalize to zero and are sliced away below.
    k_padded = jnp.pad(k, ((0, 0), (0, m_pad - m_total), (0, 0)))

    logits = logits_forward(q, k_padded, temperature)[:, :, :m_total]
    return {"logits": logits}, new_momentum


if __name__ == "__main__":
    key = jax.random.PRNGKey(0)
    kx, kp = jax.random.split(key)

    B, C, H, W = 2, 3, 16, 16
    PATCH = 8
    PATCH_DIM = C * PATCH * PATCH     # 192
    HIDDEN = 128                      # ViT embed dim (lane-aligned toy size)
    MLP_DIM = 128                     # mlp_dim (4096 in reference, small here)
    DIM = 128                         # feature dim (256 in reference, small here)

    x = jax.random.normal(kx, (B, 2, C, H, W), jnp.float32)
    params = init_params(kp, PATCH_DIM, HIDDEN, MLP_DIM, DIM)

    out, new_momentum = moco_vit_forward(x, params, ph=PATCH, pw=PATCH)
    jax.block_until_ready(out["logits"])
    jax.block_until_ready(new_momentum)
    assert out["logits"].shape == (2, B, B * GROUP_SIZE)
    print("KERNEL_OK")
</pallas_src>

<mosaic_0001>
module attributes {stable_mosaic.version = 11 : i64} {
  func.func @ema_kernel(%arg0: memref<1x128xf32, #tpu.memory_space<vmem>>, %arg1: memref<1x128xf32, #tpu.memory_space<vmem>>, %arg2: memref<1x128xf32, #tpu.memory_space<vmem>>, %arg3: memref<1x128xf32, #tpu.memory_space<vmem>>, %arg4: memref<128x128xf32, #tpu.memory_space<vmem>>, %arg5: memref<128x128xf32, #tpu.memory_space<vmem>>, %arg6: memref<128x128xf32, #tpu.memory_space<vmem>>, %arg7: memref<192x128xf32, #tpu.memory_space<vmem>>, %arg8: memref<1x128xf32, #tpu.memory_space<vmem>>, %arg9: memref<1x128xf32, #tpu.memory_space<vmem>>, %arg10: memref<1x128xf32, #tpu.memory_space<vmem>>, %arg11: memref<1x128xf32, #tpu.memory_space<vmem>>, %arg12: memref<128x128xf32, #tpu.memory_space<vmem>>, %arg13: memref<128x128xf32, #tpu.memory_space<vmem>>, %arg14: memref<128x128xf32, #tpu.memory_space<vmem>>, %arg15: memref<192x128xf32, #tpu.memory_space<vmem>>, %arg16: memref<1x128xf32, #tpu.memory_space<vmem>>, %arg17: memref<1x128xf32, #tpu.memory_space<vmem>>, %arg18: memref<1x128xf32, #tpu.memory_space<vmem>>, %arg19: memref<1x128xf32, #tpu.memory_space<vmem>>, %arg20: memref<128x128xf32, #tpu.memory_space<vmem>>, %arg21: memref<128x128xf32, #tpu.memory_space<vmem>>, %arg22: memref<128x128xf32, #tpu.memory_space<vmem>>, %arg23: memref<192x128xf32, #tpu.memory_space<vmem>>) attributes {dimension_semantics = [], scalar_prefetch = 0 : i64, scratch_operands = 0 : i64, tpu.core_type = #tpu.core_type<tc>} {
    %c0 = arith.constant 0 : index
    %c0_0 = arith.constant 0 : index
    %0 = vector.load %arg0[%c0, %c0_0] : memref<1x128xf32, #tpu.memory_space<vmem>>, vector<1x128xf32>
    %cst = arith.constant 9.990000e-01 : f32
    %1 = vector.broadcast %cst : f32 to vector<1x128xf32>
    %2 = arith.mulf %0, %1 : vector<1x128xf32>
    %c0_1 = arith.constant 0 : index
    %c0_2 = arith.constant 0 : index
    %3 = vector.load %arg8[%c0_1, %c0_2] : memref<1x128xf32, #tpu.memory_space<vmem>>, vector<1x128xf32>
    %cst_3 = arith.constant 1.000000e-03 : f32
    %4 = vector.broadcast %cst_3 : f32 to vector<1x128xf32>
    %5 = arith.mulf %3, %4 : vector<1x128xf32>
    %6 = arith.addf %2, %5 : vector<1x128xf32>
    %c0_4 = arith.constant 0 : index
    %c0_5 = arith.constant 0 : index
    %7 = vector.load %arg16[%c0_4, %c0_5] : memref<1x128xf32, #tpu.memory_space<vmem>>, vector<1x128xf32>
    tpu.vector_store %arg16[%c0_4, %c0_5], %6 {strides = array<i32>} : memref<1x128xf32, #tpu.memory_space<vmem>>, vector<1x128xf32>,
    %c0_6 = arith.constant 0 : index
    %c0_7 = arith.constant 0 : index
    %8 = vector.load %arg1[%c0_6, %c0_7] : memref<1x128xf32, #tpu.memory_space<vmem>>, vector<1x128xf32>
    %cst_8 = arith.constant 9.990000e-01 : f32
    %9 = vector.broadcast %cst_8 : f32 to vector<1x128xf32>
    %10 = arith.mulf %8, %9 : vector<1x128xf32>
    %c0_9 = arith.constant 0 : index
    %c0_10 = arith.constant 0 : index
    %11 = vector.load %arg9[%c0_9, %c0_10] : memref<1x128xf32, #tpu.memory_space<vmem>>, vector<1x128xf32>
    %cst_11 = arith.constant 1.000000e-03 : f32
    %12 = vector.broadcast %cst_11 : f32 to vector<1x128xf32>
    %13 = arith.mulf %11, %12 : vector<1x128xf32>
    %14 = arith.addf %10, %13 : vector<1x128xf32>
    %c0_12 = arith.constant 0 : index
    %c0_13 = arith.constant 0 : index
    %15 = vector.load %arg17[%c0_12, %c0_13] : memref<1x128xf32, #tpu.memory_space<vmem>>, vector<1x128xf32>
    tpu.vector_store %arg17[%c0_12, %c0_13], %14 {strides = array<i32>} : memref<1x128xf32, #tpu.memory_space<vmem>>, vector<1x128xf32>,
    %c0_14 = arith.constant 0 : index
    %c0_15 = arith.constant 0 : index
    %16 = vector.load %arg2[%c0_14, %c0_15] : memref<1x128xf32, #tpu.memory_space<vmem>>, vector<1x128xf32>
    %cst_16 = arith.constant 9.990000e-01 : f32
    %17 = vector.broadcast %cst_16 : f32 to vector<1x128xf32>
    %18 = arith.mulf %16, %17 : vector<1x128xf32>
    %c0_17 = arith.constant 0 : index
    %c0_18 = arith.constant 0 : index
    %19 = vector.load %arg10[%c0_17, %c0_18] : memref<1x128xf32, #tpu.memory_space<vmem>>, vector<1x128xf32>
    %cst_19 = arith.constant 1.000000e-03 : f32
    %20 = vector.broadcast %cst_19 : f32 to vector<1x128xf32>
    %21 = arith.mulf %19, %20 : vector<1x128xf32>
    %22 = arith.addf %18, %21 : vector<1x128xf32>
    %c0_20 = arith.constant 0 : index
    %c0_21 = arith.constant 0 : index
    %23 = vector.load %arg18[%c0_20, %c0_21] : memref<1x128xf32, #tpu.memory_space<vmem>>, vector<1x128xf32>
    tpu.vector_store %arg18[%c0_20, %c0_21], %22 {strides = array<i32>} : memref<1x128xf32, #tpu.memory_space<vmem>>, vector<1x128xf32>,
    %c0_22 = arith.constant 0 : index
    %c0_23 = arith.constant 0 : index
    %24 = vector.load %arg3[%c0_22, %c0_23] : memref<1x128xf32, #tpu.memory_space<vmem>>, vector<1x128xf32>
    %cst_24 = arith.constant 9.990000e-01 : f32
    %25 = vector.broadcast %cst_24 : f32 to vector<1x128xf32>
    %26 = arith.mulf %24, %25 : vector<1x128xf32>
    %c0_25 = arith.constant 0 : index
    %c0_26 = arith.constant 0 : index
    %27 = vector.load %arg11[%c0_25, %c0_26] : memref<1x128xf32, #tpu.memory_space<vmem>>, vector<1x128xf32>
    %cst_27 = arith.constant 1.000000e-03 : f32
    %28 = vector.broadcast %cst_27 : f32 to vector<1x128xf32>
    %29 = arith.mulf %27, %28 : vector<1x128xf32>
    %30 = arith.addf %26, %29 : vector<1x128xf32>
    %c0_28 = arith.constant 0 : index
    %c0_29 = arith.constant 0 : index
    %31 = vector.load %arg19[%c0_28, %c0_29] : memref<1x128xf32, #tpu.memory_space<vmem>>, vector<1x128xf32>
    tpu.vector_store %arg19[%c0_28, %c0_29], %30 {strides = array<i32>} : memref<1x128xf32, #tpu.memory_space<vmem>>, vector<1x128xf32>,
    %c0_30 = arith.constant 0 : index
    %c0_31 = arith.constant 0 : index
    %32 = vector.load %arg4[%c0_30, %c0_31] : memref<128x128xf32, #tpu.memory_space<vmem>>, vector<128x128xf32>
    %cst_32 = arith.constant 9.990000e-01 : f32
    %33 = vector.broadcast %cst_32 : f32 to vector<128x128xf32>
    %34 = arith.mulf %32, %33 : vector<128x128xf32>
    %c0_33 = arith.constant 0 : index
    %c0_34 = arith.constant 0 : index
    %35 = vector.load %arg12[%c0_33, %c0_34] : memref<128x128xf32, #tpu.memory_space<vmem>>, vector<128x128xf32>
    %cst_35 = arith.constant 1.000000e-03 : f32
    %36 = vector.broadcast %cst_35 : f32 to vector<128x128xf32>
    %37 = arith.mulf %35, %36 : vector<128x128xf32>
    %38 = arith.addf %34, %37 : vector<128x128xf32>
    %c0_36 = arith.constant 0 : index
    %c0_37 = arith.constant 0 : index
    %39 = vector.load %arg20[%c0_36, %c0_37] : memref<128x128xf32, #tpu.memory_space<vmem>>, vector<128x128xf32>
    tpu.vector_store %arg20[%c0_36, %c0_37], %38 {strides = array<i32>} : memref<128x128xf32, #tpu.memory_space<vmem>>, vector<128x128xf32>,
    %c0_38 = arith.constant 0 : index
    %c0_39 = arith.constant 0 : index
    %40 = vector.load %arg5[%c0_38, %c0_39] : memref<128x128xf32, #tpu.memory_space<vmem>>, vector<128x128xf32>
    %cst_40 = arith.constant 9.990000e-01 : f32
    %41 = vector.broadcast %cst_40 : f32 to vector<128x128xf32>
    %42 = arith.mulf %40, %41 : vector<128x128xf32>
    %c0_41 = arith.constant 0 : index
    %c0_42 = arith.constant 0 : index
    %43 = vector.load %arg13[%c0_41, %c0_42] : memref<128x128xf32, #tpu.memory_space<vmem>>, vector<128x128xf32>
    %cst_43 = arith.constant 1.000000e-03 : f32
    %44 = vector.broadcast %cst_43 : f32 to vector<128x128xf32>
    %45 = arith.mulf %43, %44 : vector<128x128xf32>
    %46 = arith.addf %42, %45 : vector<128x128xf32>
    %c0_44 = arith.constant 0 : index
    %c0_45 = arith.constant 0 : index
    %47 = vector.load %arg21[%c0_44, %c0_45] : memref<128x128xf32, #tpu.memory_space<vmem>>, vector<128x128xf32>
    tpu.vector_store %arg21[%c0_44, %c0_45], %46 {strides = array<i32>} : memref<128x128xf32, #tpu.memory_space<vmem>>, vector<128x128xf32>,
    %c0_46 = arith.constant 0 : index
    %c0_47 = arith.constant 0 : index
    %48 = vector.load %arg6[%c0_46, %c0_47] : memref<128x128xf32, #tpu.memory_space<vmem>>, vector<128x128xf32>
    %cst_48 = arith.constant 9.990000e-01 : f32
    %49 = vector.broadcast %cst_48 : f32 to vector<128x128xf32>
    %50 = arith.mulf %48, %49 : vector<128x128xf32>
    %c0_49 = arith.constant 0 : index
    %c0_50 = arith.constant 0 : index
    %51 = vector.load %arg14[%c0_49, %c0_50] : memref<128x128xf32, #tpu.memory_space<vmem>>, vector<128x128xf32>
    %cst_51 = arith.constant 1.000000e-03 : f32
    %52 = vector.broadcast %cst_51 : f32 to vector<128x128xf32>
    %53 = arith.mulf %51, %52 : vector<128x128xf32>
    %54 = arith.addf %50, %53 : vector<128x128xf32>
    %c0_52 = arith.constant 0 : index
    %c0_53 = arith.constant 0 : index
    %55 = vector.load %arg22[%c0_52, %c0_53] : memref<128x128xf32, #tpu.memory_space<vmem>>, vector<128x128xf32>
    tpu.vector_store %arg22[%c0_52, %c0_53], %54 {strides = array<i32>} : memref<128x128xf32, #tpu.memory_space<vmem>>, vector<128x128xf32>,
    %c0_54 = arith.constant 0 : index
    %c0_55 = arith.constant 0 : index
    %56 = vector.load %arg7[%c0_54, %c0_55] : memref<192x128xf32, #tpu.memory_space<vmem>>, vector<192x128xf32>
    %cst_56 = arith.constant 9.990000e-01 : f32
    %57 = vector.broadcast %cst_56 : f32 to vector<192x128xf32>
    %58 = arith.mulf %56, %57 : vector<192x128xf32>
    %c0_57 = arith.constant 0 : index
    %c0_58 = arith.constant 0 : index
    %59 = vector.load %arg15[%c0_57, %c0_58] : memref<192x128xf32, #tpu.memory_space<vmem>>, vector<192x128xf32>
    %cst_59 = arith.constant 1.000000e-03 : f32
    %60 = vector.broadcast %cst_59 : f32 to vector<192x128xf32>
    %61 = arith.mulf %59, %60 : vector<192x128xf32>
    %62 = arith.addf %58, %61 : vector<192x128xf32>
    %c0_60 = arith.constant 0 : index
    %c0_61 = arith.constant 0 : index
    %63 = vector.load %arg23[%c0_60, %c0_61] : memref<192x128xf32, #tpu.memory_space<vmem>>, vector<192x128xf32>
    tpu.vector_store %arg23[%c0_60, %c0_61], %62 {strides = array<i32>} : memref<192x128xf32, #tpu.memory_space<vmem>>, vector<192x128xf32>,
    return
  }
}

module attributes {stable_mosaic.version = 11 : i64} {
  func.func @k_path_kernel(%arg0: i32, %arg1: memref<1x8x192xbf16, #tpu.memory_space<vmem>>, %arg2: memref<192x128xbf16, #tpu.memory_space<vmem>>, %arg3: memref<128x128xbf16, #tpu.memory_space<vmem>>, %arg4: memref<1x128xf32, #tpu.memory_space<vmem>>, %arg5: memref<1x128xf32, #tpu.memory_space<vmem>>, %arg6: memref<128x128xbf16, #tpu.memory_space<vmem>>, %arg7: memref<1x128xf32, #tpu.memory_space<vmem>>, %arg8: memref<1x128xf32, #tpu.memory_space<vmem>>, %arg9: memref<128x128xbf16, #tpu.memory_space<vmem>>, %arg10: memref<1x2x128xf32, #tpu.memory_space<vmem>>) attributes {dimension_semantics = [#tpu.dimension_semantics<parallel>], iteration_bounds = array<i64: 2>, scalar_prefetch = 0 : i64, scratch_operands = 0 : i64, tpu.core_type = #tpu.core_type<tc>, window_params = [{transform_indices = @transform_0, window_bounds = array<i64: 1, 8, 192>}, {pipeline_mode = #tpu.pipeline_mode<synchronous>, transform_indices = @transform_1, window_bounds = array<i64: 192, 128>}, {pipeline_mode = #tpu.pipeline_mode<synchronous>, transform_indices = @transform_2, window_bounds = array<i64: 128, 128>}, {pipeline_mode = #tpu.pipeline_mode<synchronous>, transform_indices = @transform_3, window_bounds = array<i64: 1, 128>}, {pipeline_mode = #tpu.pipeline_mode<synchronous>, transform_indices = @transform_4, window_bounds = array<i64: 1, 128>}, {pipeline_mode = #tpu.pipeline_mode<synchronous>, transform_indices = @transform_5, window_bounds = array<i64: 128, 128>}, {pipeline_mode = #tpu.pipeline_mode<synchronous>, transform_indices = @transform_6, window_bounds = array<i64: 1, 128>}, {pipeline_mode = #tpu.pipeline_mode<synchronous>, transform_indices = @transform_7, window_bounds = array<i64: 1, 128>}, {pipeline_mode = #tpu.pipeline_mode<synchronous>, transform_indices = @transform_8, window_bounds = array<i64: 128, 128>}, {transform_indices = @transform_9, window_bounds = array<i64: 1, 2, 128>}]} {
    %c0 = arith.constant 0 : index
    %c0_0 = arith.constant 0 : index
    %c0_1 = arith.constant 0 : index
    %0 = vector.load %arg1[%c0, %c0_0, %c0_1] : memref<1x8x192xbf16, #tpu.memory_space<vmem>>, vector<1x8x192xbf16>
    %1 = vector.shape_cast %0 : vector<1x8x192xbf16> to vector<8x192xbf16>
    %c0_2 = arith.constant 0 : index
    %c0_3 = arith.constant 0 : index
    %2 = vector.load %arg2[%c0_2, %c0_3] : memref<192x128xbf16, #tpu.memory_space<vmem>>, vector<192x128xbf16>
    %c0_4 = arith.constant 0 : index
    %c0_5 = arith.constant 0 : index
    %3 = vector.load %arg3[%c0_4, %c0_5] : memref<128x128xbf16, #tpu.memory_space<vmem>>, vector<128x128xbf16>
    %c0_6 = arith.constant 0 : index
    %c0_7 = arith.constant 0 : index
    %4 = vector.load %arg4[%c0_6, %c0_7] : memref<1x128xf32, #tpu.memory_space<vmem>>, vector<1x128xf32>
    %c0_8 = arith.constant 0 : index
    %c0_9 = arith.constant 0 : index
    %5 = vector.load %arg5[%c0_8, %c0_9] : memref<1x128xf32, #tpu.memory_space<vmem>>, vector<1x128xf32>
    %c0_10 = arith.constant 0 : index
    %c0_11 = arith.constant 0 : index
    %6 = vector.load %arg6[%c0_10, %c0_11] : memref<128x128xbf16, #tpu.memory_space<vmem>>, vector<128x128xbf16>
    %c0_12 = arith.constant 0 : index
    %c0_13 = arith.constant 0 : index
    %7 = vector.load %arg7[%c0_12, %c0_13] : memref<1x128xf32, #tpu.memory_space<vmem>>, vector<1x128xf32>
    %c0_14 = arith.constant 0 : index
    %c0_15 = arith.constant 0 : index
    %8 = vector.load %arg8[%c0_14, %c0_15] : memref<1x128xf32, #tpu.memory_space<vmem>>, vector<1x128xf32>
    %c0_16 = arith.constant 0 : index
    %c0_17 = arith.constant 0 : index
    %9 = vector.load %arg9[%c0_16, %c0_17] : memref<128x128xbf16, #tpu.memory_space<vmem>>, vector<128x128xbf16>
    %cst = arith.constant dense<0.000000e+00> : vector<8x128xf32>
    %10 = tpu.matmul %1, %2, %cst {dimension_numbers = #tpu.dot_dimension_numbers<[1], [0], [0], [1], [0, 0, 1, 1], [], []>} : vector<8x192xbf16>, vector<192x128xbf16>, vector<8x128xf32> -> vector<8x128xf32>
    %11 = vector.shape_cast %10 : vector<8x128xf32> to vector<2x4x128xf32>
    %cst_18 = arith.constant dense<0.000000e+00> : vector<2x128xf32>
    %12 = vector.multi_reduction <add>, %11, %cst_18 [1] : vector<2x4x128xf32> to vector<2x128xf32>
    %cst_19 = arith.constant 4.000000e+00 : f32
    %13 = vector.broadcast %cst_19 : f32 to vector<2x128xf32>
    %14 = arith.divf %12, %13 : vector<2x128xf32>
    %15 = arith.truncf %14 : vector<2x128xf32> to vector<2x128xbf16>
    %cst_20 = arith.constant dense<0.000000e+00> : vector<2x128xf32>
    %16 = tpu.matmul %15, %3, %cst_20 {dimension_numbers = #tpu.dot_dimension_numbers<[1], [0], [0], [1], [0, 0, 1, 1], [], []>} : vector<2x128xbf16>, vector<128x128xbf16>, vector<2x128xf32> -> vector<2x128xf32>
    %cst_21 = arith.constant dense<0.000000e+00> : vector<128xf32>
    %17 = vector.multi_reduction <add>, %16, %cst_21 [0] : vector<2x128xf32> to vector<128xf32>
    %18 = vector.shape_cast %17 : vector<128xf32> to vector<1x128xf32>
    %cst_22 = arith.constant 2.000000e+00 : f32
    %19 = vector.broadcast %cst_22 : f32 to vector<1x128xf32>
    %20 = arith.divf %18, %19 : vector<1x128xf32>
    %21 = arith.mulf %16, %16 : vector<2x128xf32>
    %cst_23 = arith.constant dense<0.000000e+00> : vector<128xf32>
    %22 = vector.multi_reduction <add>, %21, %cst_23 [0] : vector<2x128xf32> to vector<128xf32>
    %23 = vector.shape_cast %22 : vector<128xf32> to vector<1x128xf32>
    %cst_24 = arith.constant 2.000000e+00 : f32
    %24 = vector.broadcast %cst_24 : f32 to vector<1x128xf32>
    %25 = arith.divf %23, %24 : vector<1x128xf32>
    %26 = arith.mulf %20, %20 : vector<1x128xf32>
    %27 = arith.subf %25, %26 : vector<1x128xf32>
    %28 = vector.broadcast %20 : vector<1x128xf32> to vector<2x128xf32>
    %29 = arith.subf %16, %28 : vector<2x128xf32>
    %cst_25 = arith.constant 9.99999974E-6 : f32
    %30 = vector.broadcast %cst_25 : f32 to vector<1x128xf32>
    %31 = arith.addf %27, %30 : vector<1x128xf32>
    %32 = math.rsqrt %31 : vector<1x128xf32>
    %33 = vector.broadcast %32 : vector<1x128xf32> to vector<2x128xf32>
    %34 = arith.mulf %29, %33 : vector<2x128xf32>
    %35 = vector.broadcast %4 : vector<1x128xf32> to vector<2x128xf32>
    %36 = arith.mulf %34, %35 : vector<2x128xf32>
    %37 = vector.broadcast %5 : vector<1x128xf32> to vector<2x128xf32>
    %38 = arith.addf %36, %37 : vector<2x128xf32>
    %cst_26 = arith.constant 0.000000e+00 : f32
    %39 = vector.broadcast %cst_26 : f32 to vector<2x128xf32>
    %40 = arith.maximumf %38, %39 : vector<2x128xf32>
    %41 = arith.truncf %40 : vector<2x128xf32> to vector<2x128xbf16>
    %cst_27 = arith.constant dense<0.000000e+00> : vector<2x128xf32>
    %42 = tpu.matmul %41, %6, %cst_27 {dimension_numbers = #tpu.dot_dimension_numbers<[1], [0], [0], [1], [0, 0, 1, 1], [], []>} : vector<2x128xbf16>, vector<128x128xbf16>, vector<2x128xf32> -> vector<2x128xf32>
    %cst_28 = arith.constant dense<0.000000e+00> : vector<128xf32>
    %43 = vector.multi_reduction <add>, %42, %cst_28 [0] : vector<2x128xf32> to vector<128xf32>
    %44 = vector.shape_cast %43 : vector<128xf32> to vector<1x128xf32>
    %cst_29 = arith.constant 2.000000e+00 : f32
    %45 = vector.broadcast %cst_29 : f32 to vector<1x128xf32>
    %46 = arith.divf %44, %45 : vector<1x128xf32>
    %47 = arith.mulf %42, %42 : vector<2x128xf32>
    %cst_30 = arith.constant dense<0.000000e+00> : vector<128xf32>
    %48 = vector.multi_reduction <add>, %47, %cst_30 [0] : vector<2x128xf32> to vector<128xf32>
    %49 = vector.shape_cast %48 : vector<128xf32> to vector<1x128xf32>
    %cst_31 = arith.constant 2.000000e+00 : f32
    %50 = vector.broadcast %cst_31 : f32 to vector<1x128xf32>
    %51 = arith.divf %49, %50 : vector<1x128xf32>
    %52 = arith.mulf %46, %46 : vector<1x128xf32>
    %53 = arith.subf %51, %52 : vector<1x128xf32>
    %54 = vector.broadcast %46 : vector<1x128xf32> to vector<2x128xf32>
    %55 = arith.subf %42, %54 : vector<2x128xf32>
    %cst_32 = arith.constant 9.99999974E-6 : f32
    %56 = vector.broadcast %cst_32 : f32 to vector<1x128xf32>
    %57 = arith.addf %53, %56 : vector<1x128xf32>
    %58 = math.rsqrt %57 : vector<1x128xf32>
    %59 = vector.broadcast %58 : vector<1x128xf32> to vector<2x128xf32>
    %60 = arith.mulf %55, %59 : vector<2x128xf32>
    %61 = vector.broadcast %7 : vector<1x128xf32> to vector<2x128xf32>
    %62 = arith.mulf %60, %61 : vector<2x128xf32>
    %63 = vector.broadcast %8 : vector<1x128xf32> to vector<2x128xf32>
    %64 = arith.addf %62, %63 : vector<2x128xf32>
    %cst_33 = arith.constant 0.000000e+00 : f32
    %65 = vector.broadcast %cst_33 : f32 to vector<2x128xf32>
    %66 = arith.maximumf %64, %65 : vector<2x128xf32>
    %67 = arith.truncf %66 : vector<2x128xf32> to vector<2x128xbf16>
    %cst_34 = arith.constant dense<0.000000e+00> : vector<2x128xf32>
    %68 = tpu.matmul %67, %9, %cst_34 {dimension_numbers = #tpu.dot_dimension_numbers<[1], [0], [0], [1], [0, 0, 1, 1], [], []>} : vector<2x128xbf16>, vector<128x128xbf16>, vector<2x128xf32> -> vector<2x128xf32>
    %cst_35 = arith.constant dense<0.000000e+00> : vector<128xf32>
    %69 = vector.multi_reduction <add>, %68, %cst_35 [0] : vector<2x128xf32> to vector<128xf32>
    %70 = vector.shape_cast %69 : vector<128xf32> to vector<1x128xf32>
    %cst_36 = arith.constant 2.000000e+00 : f32
    %71 = vector.broadcast %cst_36 : f32 to vector<1x128xf32>
    %72 = arith.divf %70, %71 : vector<1x128xf32>
    %73 = arith.mulf %68, %68 : vector<2x128xf32>
    %cst_37 = arith.constant dense<0.000000e+00> : vector<128xf32>
    %74 = vector.multi_reduction <add>, %73, %cst_37 [0] : vector<2x128xf32> to vector<128xf32>
    %75 = vector.shape_cast %74 : vector<128xf32> to vector<1x128xf32>
    %cst_38 = arith.constant 2.000000e+00 : f32
    %76 = vector.broadcast %cst_38 : f32 to vector<1x128xf32>
    %77 = arith.divf %75, %76 : vector<1x128xf32>
    %78 = arith.mulf %72, %72 : vector<1x128xf32>
    %79 = arith.subf %77, %78 : vector<1x128xf32>
    %80 = vector.broadcast %72 : vector<1x128xf32> to vector<2x128xf32>
    %81 = arith.subf %68, %80 : vector<2x128xf32>
    %cst_39 = arith.constant 9.99999974E-6 : f32
    %82 = vector.broadcast %cst_39 : f32 to vector<1x128xf32>
    %83 = arith.addf %79, %82 : vector<1x128xf32>
    %84 = math.rsqrt %83 : vector<1x128xf32>
    %85 = vector.broadcast %84 : vector<1x128xf32> to vector<2x128xf32>
    %86 = arith.mulf %81, %85 : vector<2x128xf32>
    %c0_40 = arith.constant 0 : index
    %c0_41 = arith.constant 0 : index
    %c0_42 = arith.constant 0 : index
    %87 = vector.load %arg10[%c0_40, %c0_41, %c0_42] : memref<1x2x128xf32, #tpu.memory_space<vmem>>, vector<1x2x128xf32>
    %88 = vector.shape_cast %87 : vector<1x2x128xf32> to vector<2x128xf32>
    %89 = vector.shape_cast %86 : vector<2x128xf32> to vector<1x2x128xf32>
    tpu.vector_store %arg10[%c0_40, %c0_41, %c0_42], %89 {strides = array<i32>} : memref<1x2x128xf32, #tpu.memory_space<vmem>>, vector<1x2x128xf32>,
    return
  }
  func.func @transform_0(%arg0: i32) -> (i32, i32, i32) {
    %c0_i32 = arith.constant 0 : i32
    %c0_i32_0 = arith.constant 0 : i32
    %c0_i32_1 = arith.constant 0 : i32
    return %arg0, %c0_i32, %c0_i32_0 : i32, i32, i32
  }
  func.func @transform_1(%arg0: i32) -> (i32, i32) {
    %c0_i32 = arith.constant 0 : i32
    %c0_i32_0 = arith.constant 0 : i32
    %c0_i32_1 = arith.constant 0 : i32
    return %c0_i32, %c0_i32_0 : i32, i32
  }
  func.func @transform_2(%arg0: i32) -> (i32, i32) {
    %c0_i32 = arith.constant 0 : i32
    %c0_i32_0 = arith.constant 0 : i32
    %c0_i32_1 = arith.constant 0 : i32
    return %c0_i32, %c0_i32_0 : i32, i32
  }
  func.func @transform_3(%arg0: i32) -> (i32, i32) {
    %c0_i32 = arith.constant 0 : i32
    %c0_i32_0 = arith.constant 0 : i32
    %c0_i32_1 = arith.constant 0 : i32
    return %c0_i32, %c0_i32_0 : i32, i32
  }
  func.func @transform_4(%arg0: i32) -> (i32, i32) {
    %c0_i32 = arith.constant 0 : i32
    %c0_i32_0 = arith.constant 0 : i32
    %c0_i32_1 = arith.constant 0 : i32
    return %c0_i32, %c0_i32_0 : i32, i32
  }
  func.func @transform_5(%arg0: i32) -> (i32, i32) {
    %c0_i32 = arith.constant 0 : i32
    %c0_i32_0 = arith.constant 0 : i32
    %c0_i32_1 = arith.constant 0 : i32
    return %c0_i32, %c0_i32_0 : i32, i32
  }
  func.func @transform_6(%arg0: i32) -> (i32, i32) {
    %c0_i32 = arith.constant 0 : i32
    %c0_i32_0 = arith.constant 0 : i32
    %c0_i32_1 = arith.constant 0 : i32
    return %c0_i32, %c0_i32_0 : i32, i32
  }
  func.func @transform_7(%arg0: i32) -> (i32, i32) {
    %c0_i32 = arith.constant 0 : i32
    %c0_i32_0 = arith.constant 0 : i32
    %c0_i32_1 = arith.constant 0 : i32
    return %c0_i32, %c0_i32_0 : i32, i32
  }
  func.func @transform_8(%arg0: i32) -> (i32, i32) {
    %c0_i32 = arith.constant 0 : i32
    %c0_i32_0 = arith.constant 0 : i32
    %c0_i32_1 = arith.constant 0 : i32
    return %c0_i32, %c0_i32_0 : i32, i32
  }
  func.func @transform_9(%arg0: i32) -> (i32, i32, i32) {
    %c0_i32 = arith.constant 0 : i32
    %c0_i32_0 = arith.constant 0 : i32
    %c0_i32_1 = arith.constant 0 : i32
    return %arg0, %c0_i32, %c0_i32_0 : i32, i32, i32
  }
}

module attributes {stable_mosaic.version = 11 : i64} {
  func.func @q_path_kernel(%arg0: i32, %arg1: memref<1x8x192xbf16, #tpu.memory_space<vmem>>, %arg2: memref<192x128xbf16, #tpu.memory_space<vmem>>, %arg3: memref<128x128xbf16, #tpu.memory_space<vmem>>, %arg4: memref<1x128xf32, #tpu.memory_space<vmem>>, %arg5: memref<1x128xf32, #tpu.memory_space<vmem>>, %arg6: memref<128x128xbf16, #tpu.memory_space<vmem>>, %arg7: memref<1x128xf32, #tpu.memory_space<vmem>>, %arg8: memref<1x128xf32, #tpu.memory_space<vmem>>, %arg9: memref<128x128xbf16, #tpu.memory_space<vmem>>, %arg10: memref<128x128xbf16, #tpu.memory_space<vmem>>, %arg11: memref<1x128xf32, #tpu.memory_space<vmem>>, %arg12: memref<1x128xf32, #tpu.memory_space<vmem>>, %arg13: memref<128x128xbf16, #tpu.memory_space<vmem>>, %arg14: memref<1x2x128xf32, #tpu.memory_space<vmem>>) attributes {dimension_semantics = [#tpu.dimension_semantics<parallel>], iteration_bounds = array<i64: 2>, scalar_prefetch = 0 : i64, scratch_operands = 0 : i64, tpu.core_type = #tpu.core_type<tc>, window_params = [{transform_indices = @transform_0, window_bounds = array<i64: 1, 8, 192>}, {pipeline_mode = #tpu.pipeline_mode<synchronous>, transform_indices = @transform_1, window_bounds = array<i64: 192, 128>}, {pipeline_mode = #tpu.pipeline_mode<synchronous>, transform_indices = @transform_2, window_bounds = array<i64: 128, 128>}, {pipeline_mode = #tpu.pipeline_mode<synchronous>, transform_indices = @transform_3, window_bounds = array<i64: 1, 128>}, {pipeline_mode = #tpu.pipeline_mode<synchronous>, transform_indices = @transform_4, window_bounds = array<i64: 1, 128>}, {pipeline_mode = #tpu.pipeline_mode<synchronous>, transform_indices = @transform_5, window_bounds = array<i64: 128, 128>}, {pipeline_mode = #tpu.pipeline_mode<synchronous>, transform_indices = @transform_6, window_bounds = array<i64: 1, 128>}, {pipeline_mode = #tpu.pipeline_mode<synchronous>, transform_indices = @transform_7, window_bounds = array<i64: 1, 128>}, {pipeline_mode = #tpu.pipeline_mode<synchronous>, transform_indices = @transform_8, window_bounds = array<i64: 128, 128>}, {pipeline_mode = #tpu.pipeline_mode<synchronous>, transform_indices = @transform_9, window_bounds = array<i64: 128, 128>}, {pipeline_mode = #tpu.pipeline_mode<synchronous>, transform_indices = @transform_10, window_bounds = array<i64: 1, 128>}, {pipeline_mode = #tpu.pipeline_mode<synchronous>, transform_indices = @transform_11, window_bounds = array<i64: 1, 128>}, {pipeline_mode = #tpu.pipeline_mode<synchronous>, transform_indices = @transform_12, window_bounds = array<i64: 128, 128>}, {transform_indices = @transform_13, window_bounds = array<i64: 1, 2, 128>}]} {
    %c0 = arith.constant 0 : index
    %c0_0 = arith.constant 0 : index
    %c0_1 = arith.constant 0 : index
    %0 = vector.load %arg1[%c0, %c0_0, %c0_1] : memref<1x8x192xbf16, #tpu.memory_space<vmem>>, vector<1x8x192xbf16>
    %1 = vector.shape_cast %0 : vector<1x8x192xbf16> to vector<8x192xbf16>
    %c0_2 = arith.constant 0 : index
    %c0_3 = arith.constant 0 : index
    %2 = vector.load %arg2[%c0_2, %c0_3] : memref<192x128xbf16, #tpu.memory_space<vmem>>, vector<192x128xbf16>
    %c0_4 = arith.constant 0 : index
    %c0_5 = arith.constant 0 : index
    %3 = vector.load %arg3[%c0_4, %c0_5] : memref<128x128xbf16, #tpu.memory_space<vmem>>, vector<128x128xbf16>
    %c0_6 = arith.constant 0 : index
    %c0_7 = arith.constant 0 : index
    %4 = vector.load %arg4[%c0_6, %c0_7] : memref<1x128xf32, #tpu.memory_space<vmem>>, vector<1x128xf32>
    %c0_8 = arith.constant 0 : index
    %c0_9 = arith.constant 0 : index
    %5 = vector.load %arg5[%c0_8, %c0_9] : memref<1x128xf32, #tpu.memory_space<vmem>>, vector<1x128xf32>
    %c0_10 = arith.constant 0 : index
    %c0_11 = arith.constant 0 : index
    %6 = vector.load %arg6[%c0_10, %c0_11] : memref<128x128xbf16, #tpu.memory_space<vmem>>, vector<128x128xbf16>
    %c0_12 = arith.constant 0 : index
    %c0_13 = arith.constant 0 : index
    %7 = vector.load %arg7[%c0_12, %c0_13] : memref<1x128xf32, #tpu.memory_space<vmem>>, vector<1x128xf32>
    %c0_14 = arith.constant 0 : index
    %c0_15 = arith.constant 0 : index
    %8 = vector.load %arg8[%c0_14, %c0_15] : memref<1x128xf32, #tpu.memory_space<vmem>>, vector<1x128xf32>
    %c0_16 = arith.constant 0 : index
    %c0_17 = arith.constant 0 : index
    %9 = vector.load %arg9[%c0_16, %c0_17] : memref<128x128xbf16, #tpu.memory_space<vmem>>, vector<128x128xbf16>
    %cst = arith.constant dense<0.000000e+00> : vector<8x128xf32>
    %10 = tpu.matmul %1, %2, %cst {dimension_numbers = #tpu.dot_dimension_numbers<[1], [0], [0], [1], [0, 0, 1, 1], [], []>} : vector<8x192xbf16>, vector<192x128xbf16>, vector<8x128xf32> -> vector<8x128xf32>
    %11 = vector.shape_cast %10 : vector<8x128xf32> to vector<2x4x128xf32>
    %cst_18 = arith.constant dense<0.000000e+00> : vector<2x128xf32>
    %12 = vector.multi_reduction <add>, %11, %cst_18 [1] : vector<2x4x128xf32> to vector<2x128xf32>
    %cst_19 = arith.constant 4.000000e+00 : f32
    %13 = vector.broadcast %cst_19 : f32 to vector<2x128xf32>
    %14 = arith.divf %12, %13 : vector<2x128xf32>
    %15 = arith.truncf %14 : vector<2x128xf32> to vector<2x128xbf16>
    %cst_20 = arith.constant dense<0.000000e+00> : vector<2x128xf32>
    %16 = tpu.matmul %15, %3, %cst_20 {dimension_numbers = #tpu.dot_dimension_numbers<[1], [0], [0], [1], [0, 0, 1, 1], [], []>} : vector<2x128xbf16>, vector<128x128xbf16>, vector<2x128xf32> -> vector<2x128xf32>
    %cst_21 = arith.constant dense<0.000000e+00> : vector<128xf32>
    %17 = vector.multi_reduction <add>, %16, %cst_21 [0] : vector<2x128xf32> to vector<128xf32>
    %18 = vector.shape_cast %17 : vector<128xf32> to vector<1x128xf32>
    %cst_22 = arith.constant 2.000000e+00 : f32
    %19 = vector.broadcast %cst_22 : f32 to vector<1x128xf32>
    %20 = arith.divf %18, %19 : vector<1x128xf32>
    %21 = arith.mulf %16, %16 : vector<2x128xf32>
    %cst_23 = arith.constant dense<0.000000e+00> : vector<128xf32>
    %22 = vector.multi_reduction <add>, %21, %cst_23 [0] : vector<2x128xf32> to vector<128xf32>
    %23 = vector.shape_cast %22 : vector<128xf32> to vector<1x128xf32>
    %cst_24 = arith.constant 2.000000e+00 : f32
    %24 = vector.broadcast %cst_24 : f32 to vector<1x128xf32>
    %25 = arith.divf %23, %24 : vector<1x128xf32>
    %26 = arith.mulf %20, %20 : vector<1x128xf32>
    %27 = arith.subf %25, %26 : vector<1x128xf32>
    %28 = vector.broadcast %20 : vector<1x128xf32> to vector<2x128xf32>
    %29 = arith.subf %16, %28 : vector<2x128xf32>
    %cst_25 = arith.constant 9.99999974E-6 : f32
    %30 = vector.broadcast %cst_25 : f32 to vector<1x128xf32>
    %31 = arith.addf %27, %30 : vector<1x128xf32>
    %32 = math.rsqrt %31 : vector<1x128xf32>
    %33 = vector.broadcast %32 : vector<1x128xf32> to vector<2x128xf32>
    %34 = arith.mulf %29, %33 : vector<2x128xf32>
    %35 = vector.broadcast %4 : vector<1x128xf32> to vector<2x128xf32>
    %36 = arith.mulf %34, %35 : vector<2x128xf32>
    %37 = vector.broadcast %5 : vector<1x128xf32> to vector<2x128xf32>
    %38 = arith.addf %36, %37 : vector<2x128xf32>
    %cst_26 = arith.constant 0.000000e+00 : f32
    %39 = vector.broadcast %cst_26 : f32 to vector<2x128xf32>
    %40 = arith.maximumf %38, %39 : vector<2x128xf32>
    %41 = arith.truncf %40 : vector<2x128xf32> to vector<2x128xbf16>
    %cst_27 = arith.constant dense<0.000000e+00> : vector<2x128xf32>
    %42 = tpu.matmul %41, %6, %cst_27 {dimension_numbers = #tpu.dot_dimension_numbers<[1], [0], [0], [1], [0, 0, 1, 1], [], []>} : vector<2x128xbf16>, vector<128x128xbf16>, vector<2x128xf32> -> vector<2x128xf32>
    %cst_28 = arith.constant dense<0.000000e+00> : vector<128xf32>
    %43 = vector.multi_reduction <add>, %42, %cst_28 [0] : vector<2x128xf32> to vector<128xf32>
    %44 = vector.shape_cast %43 : vector<128xf32> to vector<1x128xf32>
    %cst_29 = arith.constant 2.000000e+00 : f32
    %45 = vector.broadcast %cst_29 : f32 to vector<1x128xf32>
    %46 = arith.divf %44, %45 : vector<1x128xf32>
    %47 = arith.mulf %42, %42 : vector<2x128xf32>
    %cst_30 = arith.constant dense<0.000000e+00> : vector<128xf32>
    %48 = vector.multi_reduction <add>, %47, %cst_30 [0] : vector<2x128xf32> to vector<128xf32>
    %49 = vector.shape_cast %48 : vector<128xf32> to vector<1x128xf32>
    %cst_31 = arith.constant 2.000000e+00 : f32
    %50 = vector.broadcast %cst_31 : f32 to vector<1x128xf32>
    %51 = arith.divf %49, %50 : vector<1x128xf32>
    %52 = arith.mulf %46, %46 : vector<1x128xf32>
    %53 = arith.subf %51, %52 : vector<1x128xf32>
    %54 = vector.broadcast %46 : vector<1x128xf32> to vector<2x128xf32>
    %55 = arith.subf %42, %54 : vector<2x128xf32>
    %cst_32 = arith.constant 9.99999974E-6 : f32
    %56 = vector.broadcast %cst_32 : f32 to vector<1x128xf32>
    %57 = arith.addf %53, %56 : vector<1x128xf32>
    %58 = math.rsqrt %57 : vector<1x128xf32>
    %59 = vector.broadcast %58 : vector<1x128xf32> to vector<2x128xf32>
    %60 = arith.mulf %55, %59 : vector<2x128xf32>
    %61 = vector.broadcast %7 : vector<1x128xf32> to vector<2x128xf32>
    %62 = arith.mulf %60, %61 : vector<2x128xf32>
    %63 = vector.broadcast %8 : vector<1x128xf32> to vector<2x128xf32>
    %64 = arith.addf %62, %63 : vector<2x128xf32>
    %cst_33 = arith.constant 0.000000e+00 : f32
    %65 = vector.broadcast %cst_33 : f32 to vector<2x128xf32>
    %66 = arith.maximumf %64, %65 : vector<2x128xf32>
    %67 = arith.truncf %66 : vector<2x128xf32> to vector<2x128xbf16>
    %cst_34 = arith.constant dense<0.000000e+00> : vector<2x128xf32>
    %68 = tpu.matmul %67, %9, %cst_34 {dimension_numbers = #tpu.dot_dimension_numbers<[1], [0], [0], [1], [0, 0, 1, 1], [], []>} : vector<2x128xbf16>, vector<128x128xbf16>, vector<2x128xf32> -> vector<2x128xf32>
    %cst_35 = arith.constant dense<0.000000e+00> : vector<128xf32>
    %69 = vector.multi_reduction <add>, %68, %cst_35 [0] : vector<2x128xf32> to vector<128xf32>
    %70 = vector.shape_cast %69 : vector<128xf32> to vector<1x128xf32>
    %cst_36 = arith.constant 2.000000e+00 : f32
    %71 = vector.broadcast %cst_36 : f32 to vector<1x128xf32>
    %72 = arith.divf %70, %71 : vector<1x128xf32>
    %73 = arith.mulf %68, %68 : vector<2x128xf32>
    %cst_37 = arith.constant dense<0.000000e+00> : vector<128xf32>
    %74 = vector.multi_reduction <add>, %73, %cst_37 [0] : vector<2x128xf32> to vector<128xf32>
    %75 = vector.shape_cast %74 : vector<128xf32> to vector<1x128xf32>
    %cst_38 = arith.constant 2.000000e+00 : f32
    %76 = vector.broadcast %cst_38 : f32 to vector<1x128xf32>
    %77 = arith.divf %75, %76 : vector<1x128xf32>
    %78 = arith.mulf %72, %72 : vector<1x128xf32>
    %79 = arith.subf %77, %78 : vector<1x128xf32>
    %80 = vector.broadcast %72 : vector<1x128xf32> to vector<2x128xf32>
    %81 = arith.subf %68, %80 : vector<2x128xf32>
    %cst_39 = arith.constant 9.99999974E-6 : f32
    %82 = vector.broadcast %cst_39 : f32 to vector<1x128xf32>
    %83 = arith.addf %79, %82 : vector<1x128xf32>
    %84 = math.rsqrt %83 : vector<1x128xf32>
    %85 = vector.broadcast %84 : vector<1x128xf32> to vector<2x128xf32>
    %86 = arith.mulf %81, %85 : vector<2x128xf32>
    %87 = arith.truncf %86 : vector<2x128xf32> to vector<2x128xbf16>
    %c0_40 = arith.constant 0 : index
    %c0_41 = arith.constant 0 : index
    %88 = vector.load %arg10[%c0_40, %c0_41] : memref<128x128xbf16, #tpu.memory_space<vmem>>, vector<128x128xbf16>
    %cst_42 = arith.constant dense<0.000000e+00> : vector<2x128xf32>
    %89 = tpu.matmul %87, %88, %cst_42 {dimension_numbers = #tpu.dot_dimension_numbers<[1], [0], [0], [1], [0, 0, 1, 1], [], []>} : vector<2x128xbf16>, vector<128x128xbf16>, vector<2x128xf32> -> vector<2x128xf32>
    %c0_43 = arith.constant 0 : index
    %c0_44 = arith.constant 0 : index
    %90 = vector.load %arg11[%c0_43, %c0_44] : memref<1x128xf32, #tpu.memory_space<vmem>>, vector<1x128xf32>
    %c0_45 = arith.constant 0 : index
    %c0_46 = arith.constant 0 : index
    %91 = vector.load %arg12[%c0_45, %c0_46] : memref<1x128xf32, #tpu.memory_space<vmem>>, vector<1x128xf32>
    %cst_47 = arith.constant dense<0.000000e+00> : vector<128xf32>
    %92 = vector.multi_reduction <add>, %89, %cst_47 [0] : vector<2x128xf32> to vector<128xf32>
    %93 = vector.shape_cast %92 : vector<128xf32> to vector<1x128xf32>
    %cst_48 = arith.constant 2.000000e+00 : f32
    %94 = vector.broadcast %cst_48 : f32 to vector<1x128xf32>
    %95 = arith.divf %93, %94 : vector<1x128xf32>
    %96 = arith.mulf %89, %89 : vector<2x128xf32>
    %cst_49 = arith.constant dense<0.000000e+00> : vector<128xf32>
    %97 = vector.multi_reduction <add>, %96, %cst_49 [0] : vector<2x128xf32> to vector<128xf32>
    %98 = vector.shape_cast %97 : vector<128xf32> to vector<1x128xf32>
    %cst_50 = arith.constant 2.000000e+00 : f32
    %99 = vector.broadcast %cst_50 : f32 to vector<1x128xf32>
    %100 = arith.divf %98, %99 : vector<1x128xf32>
    %101 = arith.mulf %95, %95 : vector<1x128xf32>
    %102 = arith.subf %100, %101 : vector<1x128xf32>
    %103 = vector.broadcast %95 : vector<1x128xf32> to vector<2x128xf32>
    %104 = arith.subf %89, %103 : vector<2x128xf32>
    %cst_51 = arith.constant 9.99999974E-6 : f32
    %105 = vector.broadcast %cst_51 : f32 to vector<1x128xf32>
    %106 = arith.addf %102, %105 : vector<1x128xf32>
    %107 = math.rsqrt %106 : vector<1x128xf32>
    %108 = vector.broadcast %107 : vector<1x128xf32> to vector<2x128xf32>
    %109 = arith.mulf %104, %108 : vector<2x128xf32>
    %110 = vector.broadcast %90 : vector<1x128xf32> to vector<2x128xf32>
    %111 = arith.mulf %109, %110 : vector<2x128xf32>
    %112 = vector.broadcast %91 : vector<1x128xf32> to vector<2x128xf32>
    %113 = arith.addf %111, %112 : vector<2x128xf32>
    %cst_52 = arith.constant 0.000000e+00 : f32
    %114 = vector.broadcast %cst_52 : f32 to vector<2x128xf32>
    %115 = arith.maximumf %113, %114 : vector<2x128xf32>
    %116 = arith.truncf %115 : vector<2x128xf32> to vector<2x128xbf16>
    %c0_53 = arith.constant 0 : index
    %c0_54 = arith.constant 0 : index
    %117 = vector.load %arg13[%c0_53, %c0_54] : memref<128x128xbf16, #tpu.memory_space<vmem>>, vector<128x128xbf16>
    %cst_55 = arith.constant dense<0.000000e+00> : vector<2x128xf32>
    %118 = tpu.matmul %116, %117, %cst_55 {dimension_numbers = #tpu.dot_dimension_numbers<[1], [0], [0], [1], [0, 0, 1, 1], [], []>} : vector<2x128xbf16>, vector<128x128xbf16>, vector<2x128xf32> -> vector<2x128xf32>
    %cst_56 = arith.constant dense<0.000000e+00> : vector<128xf32>
    %119 = vector.multi_reduction <add>, %118, %cst_56 [0] : vector<2x128xf32> to vector<128xf32>
    %120 = vector.shape_cast %119 : vector<128xf32> to vector<1x128xf32>
    %cst_57 = arith.constant 2.000000e+00 : f32
    %121 = vector.broadcast %cst_57 : f32 to vector<1x128xf32>
    %122 = arith.divf %120, %121 : vector<1x128xf32>
    %123 = arith.mulf %118, %118 : vector<2x128xf32>
    %cst_58 = arith.constant dense<0.000000e+00> : vector<128xf32>
    %124 = vector.multi_reduction <add>, %123, %cst_58 [0] : vector<2x128xf32> to vector<128xf32>
    %125 = vector.shape_cast %124 : vector<128xf32> to vector<1x128xf32>
    %cst_59 = arith.constant 2.000000e+00 : f32
    %126 = vector.broadcast %cst_59 : f32 to vector<1x128xf32>
    %127 = arith.divf %125, %126 : vector<1x128xf32>
    %128 = arith.mulf %122, %122 : vector<1x128xf32>
    %129 = arith.subf %127, %128 : vector<1x128xf32>
    %130 = vector.broadcast %122 : vector<1x128xf32> to vector<2x128xf32>
    %131 = arith.subf %118, %130 : vector<2x128xf32>
    %cst_60 = arith.constant 9.99999974E-6 : f32
    %132 = vector.broadcast %cst_60 : f32 to vector<1x128xf32>
    %133 = arith.addf %129, %132 : vector<1x128xf32>
    %134 = math.rsqrt %133 : vector<1x128xf32>
    %135 = vector.broadcast %134 : vector<1x128xf32> to vector<2x128xf32>
    %136 = arith.mulf %131, %135 : vector<2x128xf32>
    %c0_61 = arith.constant 0 : index
    %c0_62 = arith.constant 0 : index
    %c0_63 = arith.constant 0 : index
    %137 = vector.load %arg14[%c0_61, %c0_62, %c0_63] : memref<1x2x128xf32, #tpu.memory_space<vmem>>, vector<1x2x128xf32>
    %138 = vector.shape_cast %137 : vector<1x2x128xf32> to vector<2x128xf32>
    %139 = vector.shape_cast %136 : vector<2x128xf32> to vector<1x2x128xf32>
    tpu.vector_store %arg14[%c0_61, %c0_62, %c0_63], %139 {strides = array<i32>} : memref<1x2x128xf32, #tpu.memory_space<vmem>>, vector<1x2x128xf32>,
    return
  }
  func.func @transform_0(%arg0: i32) -> (i32, i32, i32) {
    %c0_i32 = arith.constant 0 : i32
    %c0_i32_0 = arith.constant 0 : i32
    %c0_i32_1 = arith.constant 0 : i32
    return %arg0, %c0_i32, %c0_i32_0 : i32, i32, i32
  }
  func.func @transform_1(%arg0: i32) -> (i32, i32) {
    %c0_i32 = arith.constant 0 : i32
    %c0_i32_0 = arith.constant 0 : i32
    %c0_i32_1 = arith.constant 0 : i32
    return %c0_i32, %c0_i32_0 : i32, i32
  }
  func.func @transform_2(%arg0: i32) -> (i32, i32) {
    %c0_i32 = arith.constant 0 : i32
    %c0_i32_0 = arith.constant 0 : i32
    %c0_i32_1 = arith.constant 0 : i32
    return %c0_i32, %c0_i32_0 : i32, i32
  }
  func.func @transform_3(%arg0: i32) -> (i32, i32) {
    %c0_i32 = arith.constant 0 : i32
    %c0_i32_0 = arith.constant 0 : i32
    %c0_i32_1 = arith.constant 0 : i32
    return %c0_i32, %c0_i32_0 : i32, i32
  }
  func.func @transform_4(%arg0: i32) -> (i32, i32) {
    %c0_i32 = arith.constant 0 : i32
    %c0_i32_0 = arith.constant 0 : i32
    %c0_i32_1 = arith.constant 0 : i32
    return %c0_i32, %c0_i32_0 : i32, i32
  }
  func.func @transform_5(%arg0: i32) -> (i32, i32) {
    %c0_i32 = arith.constant 0 : i32
    %c0_i32_0 = arith.constant 0 : i32
    %c0_i32_1 = arith.constant 0 : i32
    return %c0_i32, %c0_i32_0 : i32, i32
  }
  func.func @transform_6(%arg0: i32) -> (i32, i32) {
    %c0_i32 = arith.constant 0 : i32
    %c0_i32_0 = arith.constant 0 : i32
    %c0_i32_1 = arith.constant 0 : i32
    return %c0_i32, %c0_i32_0 : i32, i32
  }
  func.func @transform_7(%arg0: i32) -> (i32, i32) {
    %c0_i32 = arith.constant 0 : i32
    %c0_i32_0 = arith.constant 0 : i32
    %c0_i32_1 = arith.constant 0 : i32
    return %c0_i32, %c0_i32_0 : i32, i32
  }
  func.func @transform_8(%arg0: i32) -> (i32, i32) {
    %c0_i32 = arith.constant 0 : i32
    %c0_i32_0 = arith.constant 0 : i32
    %c0_i32_1 = arith.constant 0 : i32
    return %c0_i32, %c0_i32_0 : i32, i32
  }
  func.func @transform_9(%arg0: i32) -> (i32, i32) {
    %c0_i32 = arith.constant 0 : i32
    %c0_i32_0 = arith.constant 0 : i32
    %c0_i32_1 = arith.constant 0 : i32
    return %c0_i32, %c0_i32_0 : i32, i32
  }
  func.func @transform_10(%arg0: i32) -> (i32, i32) {
    %c0_i32 = arith.constant 0 : i32
    %c0_i32_0 = arith.constant 0 : i32
    %c0_i32_1 = arith.constant 0 : i32
    return %c0_i32, %c0_i32_0 : i32, i32
  }
  func.func @transform_11(%arg0: i32) -> (i32, i32) {
    %c0_i32 = arith.constant 0 : i32
    %c0_i32_0 = arith.constant 0 : i32
    %c0_i32_1 = arith.constant 0 : i32
    return %c0_i32, %c0_i32_0 : i32, i32
  }
  func.func @transform_12(%arg0: i32) -> (i32, i32) {
    %c0_i32 = arith.constant 0 : i32
    %c0_i32_0 = arith.constant 0 : i32
    %c0_i32_1 = arith.constant 0 : i32
    return %c0_i32, %c0_i32_0 : i32, i32
  }
  func.func @transform_13(%arg0: i32) -> (i32, i32, i32) {
    %c0_i32 = arith.constant 0 : i32
    %c0_i32_0 = arith.constant 0 : i32
    %c0_i32_1 = arith.constant 0 : i32
    return %arg0, %c0_i32, %c0_i32_0 : i32, i32, i32
  }
}

module attributes {stable_mosaic.version = 11 : i64} {
  func.func @logits_kernel(%arg0: i32, %arg1: memref<1x2x128xf32, #tpu.memory_space<vmem>>, %arg2: memref<1x128x128xf32, #tpu.memory_space<vmem>>, %arg3: memref<1x2x128xf32, #tpu.memory_space<vmem>>) attributes {dimension_semantics = [#tpu.dimension_semantics<parallel>], iteration_bounds = array<i64: 2>, scalar_prefetch = 0 : i64, scratch_operands = 0 : i64, tpu.core_type = #tpu.core_type<tc>, window_params = [{transform_indices = @transform_0, window_bounds = array<i64: 1, 2, 128>}, {transform_indices = @transform_1, window_bounds = array<i64: 1, 128, 128>}, {transform_indices = @transform_2, window_bounds = array<i64: 1, 2, 128>}]} {
    %c0 = arith.constant 0 : index
    %c0_0 = arith.constant 0 : index
    %c0_1 = arith.constant 0 : index
    %0 = vector.load %arg1[%c0, %c0_0, %c0_1] : memref<1x2x128xf32, #tpu.memory_space<vmem>>, vector<1x2x128xf32>
    %1 = vector.shape_cast %0 : vector<1x2x128xf32> to vector<2x128xf32>
    %2 = arith.mulf %1, %1 : vector<2x128xf32>
    %cst = arith.constant dense<0.000000e+00> : vector<2xf32>
    %3 = vector.multi_reduction <add>, %2, %cst [1] : vector<2x128xf32> to vector<2xf32>
    %4 = vector.shape_cast %3 : vector<2xf32> to vector<2x1xf32>
    %cst_2 = arith.constant 1.000000e-24 : f32
    %5 = vector.broadcast %cst_2 : f32 to vector<2x1xf32>
    %6 = arith.maximumf %4, %5 : vector<2x1xf32>
    %7 = math.rsqrt %6 : vector<2x1xf32>
    %8 = vector.broadcast %7 : vector<2x1xf32> to vector<2x128xf32>
    %9 = arith.mulf %1, %8 : vector<2x128xf32>
    %c0_3 = arith.constant 0 : index
    %c0_4 = arith.constant 0 : index
    %c0_5 = arith.constant 0 : index
    %10 = vector.load %arg2[%c0_3, %c0_4, %c0_5] : memref<1x128x128xf32, #tpu.memory_space<vmem>>, vector<1x128x128xf32>
    %11 = vector.shape_cast %10 : vector<1x128x128xf32> to vector<128x128xf32>
    %12 = arith.mulf %11, %11 : vector<128x128xf32>
    %cst_6 = arith.constant dense<0.000000e+00> : vector<128xf32>
    %13 = vector.multi_reduction <add>, %12, %cst_6 [1] : vector<128x128xf32> to vector<128xf32>
    %14 = vector.shape_cast %13 : vector<128xf32> to vector<128x1xf32>
    %cst_7 = arith.constant 1.000000e-24 : f32
    %15 = vector.broadcast %cst_7 : f32 to vector<128x1xf32>
    %16 = arith.maximumf %14, %15 : vector<128x1xf32>
    %17 = math.rsqrt %16 : vector<128x1xf32>
    %18 = vector.broadcast %17 : vector<128x1xf32> to vector<128x128xf32>
    %19 = arith.mulf %11, %18 : vector<128x128xf32>
    %20 = arith.truncf %9 : vector<2x128xf32> to vector<2x128xbf16>
    %21 = arith.truncf %19 : vector<128x128xf32> to vector<128x128xbf16>
    %cst_8 = arith.constant dense<0.000000e+00> : vector<2x128xf32>
    %22 = tpu.matmul %20, %21, %cst_8 {dimension_numbers = #tpu.dot_dimension_numbers<[1], [1], [0], [0], [0, 0, 1, 0], [], []>} : vector<2x128xbf16>, vector<128x128xbf16>, vector<2x128xf32> -> vector<2x128xf32>
    %cst_9 = arith.constant 1.000000e+00 : f32
    %23 = vector.broadcast %cst_9 : f32 to vector<2x128xf32>
    %24 = arith.mulf %22, %23 : vector<2x128xf32>
    %c0_10 = arith.constant 0 : index
    %c0_11 = arith.constant 0 : index
    %c0_12 = arith.constant 0 : index
    %25 = vector.load %arg3[%c0_10, %c0_11, %c0_12] : memref<1x2x128xf32, #tpu.memory_space<vmem>>, vector<1x2x128xf32>
    %26 = vector.shape_cast %25 : vector<1x2x128xf32> to vector<2x128xf32>
    %27 = vector.shape_cast %24 : vector<2x128xf32> to vector<1x2x128xf32>
    tpu.vector_store %arg3[%c0_10, %c0_11, %c0_12], %27 {strides = array<i32>} : memref<1x2x128xf32, #tpu.memory_space<vmem>>, vector<1x2x128xf32>,
    return
  }
  func.func @transform_0(%arg0: i32) -> (i32, i32, i32) {
    %c0_i32 = arith.constant 0 : i32
    %c0_i32_0 = arith.constant 0 : i32
    %c0_i32_1 = arith.constant 0 : i32
    return %arg0, %c0_i32, %c0_i32_0 : i32, i32, i32
  }
  func.func @transform_1(%arg0: i32) -> (i32, i32, i32) {
    %c1_i32 = arith.constant 1 : i32
    %0 = arith.subi %c1_i32, %arg0 : i32
    %c0_i32 = arith.constant 0 : i32
    %c0_i32_0 = arith.constant 0 : i32
    %c0_i32_1 = arith.constant 0 : i32
    return %0, %c0_i32, %c0_i32_0 : i32, i32, i32
  }
  func.func @transform_2(%arg0: i32) -> (i32, i32, i32) {
    %c0_i32 = arith.constant 0 : i32
    %c0_i32_0 = arith.constant 0 : i32
    %c0_i32_1 = arith.constant 0 : i32
    return %arg0, %c0_i32, %c0_i32_0 : i32, i32, i32
  }
}

</mosaic_0001>

<bundles_post_ra>
// kernel: squeeze.0
= control target key start
LH: loop header
LB: loop body
LE: loop exit
PB: predicated region body
PF: predicated region fallthrough
CT: control target
= control target key end

     0   :  { %vm195_vm0 = vcmask 64512   ;;  %v1423_v45 = vmov 0.0   ;;  %s1884_s0 = inlined_call_operand.vmem [shape: bf16[2,1,3,16,16], index: 0, kind: input, shape index: {}]   ;;  %s1885_s1 = inlined_call_operand.vmem [shape: bf16[2,3,2,8,2,8], index: 1, kind: output, shape index: {}]  }
   0x1   :  { %v1382_v0 = vld [vmem:[%s1884_s0] sm:$0xff]   ;;  %v1388_v1 = vld [vmem:[%s1884_s0 + $0x10] sm:$0xff]   ;;  %v1389_v2 = vld [vmem:[%s1884_s0 + $0x8] sm:$0xff]  }
   0x2   :  { %v1383_v3 = vunpack.c.l.bf16 %v1382_v0  ;;  %v1384_v4 = vunpack.c.h.bf16 %v1382_v0  ;;  %v1375_v5 = vunpack.c.l.bf16 %v1388_v1  ;;  %v1376_v6 = vunpack.c.h.bf16 %v1388_v1  ;;  %v1387_v7 = vld [vmem:[%s1884_s0 + $0x18] sm:$0xff]   ;;  %v1386_v8 = vld [vmem:[%s1884_s0 + $0x20] sm:$0xff]   ;;  %v1385_v9 = vld [vmem:[%s1884_s0 + $0x28] sm:$0xff]   ;;  %s1422_s0 = smov 120  }
   0x3   :  { %v1379_v10 = vunpack.c.l.bf16 %v1389_v2  ;;  %v1380_v11 = vunpack.c.h.bf16 %v1389_v2  ;;  %v1371_v12 = vunpack.c.l.bf16 %v1387_v7  ;;  %v1372_v13 = vunpack.c.h.bf16 %v1387_v7 }
   0x4   :  { %202 = vst.msk [vmem:[#allocation0 + $0x40] ss:$8 sm:$0xf] %vm195_vm0, %v1384_v4   ;;  %204 = vst.msk [vmem:[#allocation0 + $0x40] ss:$8 sm:$0xf0] %vm195_vm0, %v1384_v4   ;;  %v1392_v14 = vpack.i.bf16 %v1384_v4, %v1383_v3  ;;  %v1402_v15 = vpack.i.bf16 %v1376_v6, %v1375_v5  ;;  %v1367_v16 = vunpack.c.l.bf16 %v1386_v8  ;;  %v1368_v17 = vunpack.c.h.bf16 %v1386_v8 }
   0x5   :  { %196 = vst.msk [vmem:[#allocation0] ss:$8 sm:$0xf] %vm195_vm0, %v1383_v3   ;;  %197 = vst.msk [vmem:[#allocation0] ss:$8 sm:$0xf0] %vm195_vm0, %v1383_v3   ;;  %v1363_v18 = vunpack.c.l.bf16 %v1385_v9  ;;  %v1364_v19 = vunpack.c.h.bf16 %v1385_v9  ;;  %v1397_v20 = vpack.i.bf16 %v1380_v11, %v1379_v10  ;;  %v1407_v21 = vpack.i.bf16 %v1372_v13, %v1371_v12 }
   0x6   :  { %230 = vst.msk [vmem:[#allocation0 + $0x140] ss:$8 sm:$0xf] %vm195_vm0, %v1376_v6   ;;  %232 = vst.msk [vmem:[#allocation0 + $0x140] ss:$8 sm:$0xf0] %vm195_vm0, %v1376_v6   ;;  %1393 = vrot.lane.b32.xlu0 %v1392_v14, %s1422_s0  ;;  %1403 = vrot.lane.b32.xlu1 %v1402_v15, %s1422_s0  ;;  %v1412_v22 = vpack.i.bf16 %v1368_v17, %v1367_v16 }
   0x7   :  { %223 = vst.msk [vmem:[#allocation0 + $0x100] ss:$8 sm:$0xf] %vm195_vm0, %v1375_v5   ;;  %225 = vst.msk [vmem:[#allocation0 + $0x100] ss:$8 sm:$0xf0] %vm195_vm0, %v1375_v5   ;;  %v1417_v23 = vpack.i.bf16 %v1364_v19, %v1363_v18 }
   0x8   :  { %216 = vst.msk [vmem:[#allocation0 + $0xc0] ss:$8 sm:$0xf] %vm195_vm0, %v1380_v11   ;;  %218 = vst.msk [vmem:[#allocation0 + $0xc0] ss:$8 sm:$0xf0] %vm195_vm0, %v1380_v11  }
   0x9   :  { %209 = vst.msk [vmem:[#allocation0 + $0x80] ss:$8 sm:$0xf] %vm195_vm0, %v1379_v10   ;;  %211 = vst.msk [vmem:[#allocation0 + $0x80] ss:$8 sm:$0xf0] %vm195_vm0, %v1379_v10  }
   0xa   :  { %244 = vst.msk [vmem:[#allocation0 + $0x1c0] ss:$8 sm:$0xf] %vm195_vm0, %v1372_v13   ;;  %246 = vst.msk [vmem:[#allocation0 + $0x1c0] ss:$8 sm:$0xf0] %vm195_vm0, %v1372_v13   ;;  %1398 = vrot.lane.b32.xlu0 %v1397_v20, %s1422_s0  ;;  %1408 = vrot.lane.b32.xlu1 %v1407_v21, %s1422_s0 }
   0xb   :  { %237 = vst.msk [vmem:[#allocation0 + $0x180] ss:$8 sm:$0xf] %vm195_vm0, %v1371_v12   ;;  %239 = vst.msk [vmem:[#allocation0 + $0x180] ss:$8 sm:$0xf0] %vm195_vm0, %v1371_v12  }
   0xc   :  { %258 = vst.msk [vmem:[#allocation0 + $0x240] ss:$8 sm:$0xf] %vm195_vm0, %v1368_v17   ;;  %260 = vst.msk [vmem:[#allocation0 + $0x240] ss:$8 sm:$0xf0] %vm195_vm0, %v1368_v17  }
   0xd   :  { %251 = vst.msk [vmem:[#allocation0 + $0x200] ss:$8 sm:$0xf] %vm195_vm0, %v1367_v16   ;;  %253 = vst.msk [vmem:[#allocation0 + $0x200] ss:$8 sm:$0xf0] %vm195_vm0, %v1367_v16  }
   0xe   :  { %272 = vst.msk [vmem:[#allocation0 + $0x2c0] ss:$8 sm:$0xf] %vm195_vm0, %v1364_v19   ;;  %274 = vst.msk [vmem:[#allocation0 + $0x2c0] ss:$8 sm:$0xf0] %vm195_vm0, %v1364_v19   ;;  %1413 = vrot.lane.b32.xlu0 %v1412_v22, %s1422_s0  ;;  %1418 = vrot.lane.b32.xlu1 %v1417_v23, %s1422_s0 }
   0xf   :  { %265 = vst.msk [vmem:[#allocation0 + $0x280] ss:$8 sm:$0xf] %vm195_vm0, %v1363_v18   ;;  %267 = vst.msk [vmem:[#allocation0 + $0x280] ss:$8 sm:$0xf0] %vm195_vm0, %v1363_v18  }
  0x78   :  { %v1394_v24 = vpop.permute.xlu0 %1393  ;;  %v1404_v25 = vpop.permute.xlu1 %1403 }
  0x79   :  { %v1396_v26 = vunpack.i.h.bf16 %v1394_v24  ;;  %v1395_v27 = vunpack.i.l.bf16 %v1394_v24  ;;  %v1406_v28 = vunpack.i.h.bf16 %v1404_v25  ;;  %v1405_v29 = vunpack.i.l.bf16 %v1404_v25 }
  0x7b   :  { %289 = vst.msk [vmem:[#allocation0 + $0x41] ss:$8 sm:$0xf] %vm195_vm0, %v1396_v26   ;;  %291 = vst.msk [vmem:[#allocation0 + $0x41] ss:$8 sm:$0xf0] %vm195_vm0, %v1396_v26  }
  0x7c   :  { %280 = vst.msk [vmem:[#allocation0 + $0x1] ss:$8 sm:$0xf] %vm195_vm0, %v1395_v27   ;;  %282 = vst.msk [vmem:[#allocation0 + $0x1] ss:$8 sm:$0xf0] %vm195_vm0, %v1395_v27   ;;  %v1399_v30 = vpop.permute.xlu0 %1398  ;;  %v1409_v31 = vpop.permute.xlu1 %1408 }
  0x7d   :  { %325 = vst.msk [vmem:[#allocation0 + $0x141] ss:$8 sm:$0xf] %vm195_vm0, %v1406_v28   ;;  %327 = vst.msk [vmem:[#allocation0 + $0x141] ss:$8 sm:$0xf0] %vm195_vm0, %v1406_v28   ;;  %v1401_v32 = vunpack.i.h.bf16 %v1399_v30  ;;  %v1400_v33 = vunpack.i.l.bf16 %v1399_v30  ;;  %v1411_v34 = vunpack.i.h.bf16 %v1409_v31  ;;  %v1410_v35 = vunpack.i.l.bf16 %v1409_v31 }
  0x7e   :  { %316 = vst.msk [vmem:[#allocation0 + $0x101] ss:$8 sm:$0xf] %vm195_vm0, %v1405_v29   ;;  %318 = vst.msk [vmem:[#allocation0 + $0x101] ss:$8 sm:$0xf0] %vm195_vm0, %v1405_v29  }
  0x7f   :  { %307 = vst.msk [vmem:[#allocation0 + $0xc1] ss:$8 sm:$0xf] %vm195_vm0, %v1401_v32   ;;  %309 = vst.msk [vmem:[#allocation0 + $0xc1] ss:$8 sm:$0xf0] %vm195_vm0, %v1401_v32  }
  0x80   :  { %298 = vst.msk [vmem:[#allocation0 + $0x81] ss:$8 sm:$0xf] %vm195_vm0, %v1400_v33   ;;  %300 = vst.msk [vmem:[#allocation0 + $0x81] ss:$8 sm:$0xf0] %vm195_vm0, %v1400_v33   ;;  %v1414_v36 = vpop.permute.xlu0 %1413  ;;  %v1419_v37 = vpop.permute.xlu1 %1418 }
  0x81   :  { %343 = vst.msk [vmem:[#allocation0 + $0x1c1] ss:$8 sm:$0xf] %vm195_vm0, %v1411_v34   ;;  %345 = vst.msk [vmem:[#allocation0 + $0x1c1] ss:$8 sm:$0xf0] %vm195_vm0, %v1411_v34   ;;  %v1416_v38 = vunpack.i.h.bf16 %v1414_v36  ;;  %v1415_v39 = vunpack.i.l.bf16 %v1414_v36  ;;  %v1421_v40 = vunpack.i.h.bf16 %v1419_v37  ;;  %v1420_v41 = vunpack.i.l.bf16 %v1419_v37 }
  0x82   :  { %334 = vst.msk [vmem:[#allocation0 + $0x181] ss:$8 sm:$0xf] %vm195_vm0, %v1410_v35   ;;  %336 = vst.msk [vmem:[#allocation0 + $0x181] ss:$8 sm:$0xf0] %vm195_vm0, %v1410_v35  }
  0x83   :  { %v448_v42 = vld [vmem:[#allocation0 + $0x40] sm:$0x3]  ;;  %v456_v43 = vld [vmem:[#allocation0 + $0x48] sm:$0x3]  ;;  %v464_v44 = vld [vmem:[#allocation0 + $0x50] sm:$0x3] }
  0x84   :  { %v449_v46 = vpack.c.bf16 %v1423_v45, %v448_v42  ;;  %v457_v47 = vpack.c.bf16 %v1423_v45, %v456_v43  ;;  %v465_v48 = vpack.c.bf16 %v1423_v45, %v464_v44  ;;  %v472_v49 = vld [vmem:[#allocation0 + $0x58] sm:$0x3]  ;;  %v480_v50 = vld [vmem:[#allocation0 + $0x60] sm:$0x3]  ;;  %v488_v51 = vld [vmem:[#allocation0 + $0x68] sm:$0x3] }
  0x85   :  { %361 = vst.msk [vmem:[#allocation0 + $0x241] ss:$8 sm:$0xf] %vm195_vm0, %v1416_v38   ;;  %363 = vst.msk [vmem:[#allocation0 + $0x241] ss:$8 sm:$0xf0] %vm195_vm0, %v1416_v38   ;;  %v473_v52 = vpack.c.bf16 %v1423_v45, %v472_v49  ;;  %v481_v53 = vpack.c.bf16 %v1423_v45, %v480_v50  ;;  %v489_v54 = vpack.c.bf16 %v1423_v45, %v488_v51 }
  0x86   :  { %352 = vst.msk [vmem:[#allocation0 + $0x201] ss:$8 sm:$0xf] %vm195_vm0, %v1415_v39   ;;  %354 = vst.msk [vmem:[#allocation0 + $0x201] ss:$8 sm:$0xf0] %vm195_vm0, %v1415_v39  }
  0x87   :  { %379 = vst.msk [vmem:[#allocation0 + $0x2c1] ss:$8 sm:$0xf] %vm195_vm0, %v1421_v40   ;;  %381 = vst.msk [vmem:[#allocation0 + $0x2c1] ss:$8 sm:$0xf0] %vm195_vm0, %v1421_v40  }
  0x88   :  { %370 = vst.msk [vmem:[#allocation0 + $0x281] ss:$8 sm:$0xf] %vm195_vm0, %v1420_v41   ;;  %372 = vst.msk [vmem:[#allocation0 + $0x281] ss:$8 sm:$0xf0] %vm195_vm0, %v1420_v41  }
  0x89   :  { %v496_v55 = vld [vmem:[#allocation0 + $0x70] sm:$0x3]  ;;  %v504_v56 = vld [vmem:[#allocation0 + $0x78] sm:$0x3]  ;;  %v387_v57 = vld [vmem:[#allocation0] sm:$0x3] }
  0x8a   :  { %1273 = vst [vmem:[%s1885_s1 + $0x8] sm:$0x1] %v449_v46  ;;  %1274 = vst [vmem:[%s1885_s1 + $0x9] sm:$0x1] %v457_v47  ;;  %v497_v58 = vpack.c.bf16 %v1423_v45, %v496_v55  ;;  %v505_v59 = vpack.c.bf16 %v1423_v45, %v504_v56  ;;  %v388_v60 = vpack.c.bf16 %v1423_v45, %v387_v57  ;;  %v393_v61 = vld [vmem:[#allocation0 + $0x8] sm:$0x3] }
  0x8b   :  { %1275 = vst [vmem:[%s1885_s1 + $0xa] sm:$0x1] %v465_v48  ;;  %v400_v62 = vld [vmem:[#allocation0 + $0x10] sm:$0x3]  ;;  %v408_v63 = vld [vmem:[#allocation0 + $0x18] sm:$0x3]  ;;  %v394_v0 = vpack.c.bf16 %v1423_v45, %v393_v61 }
  0x8c   :  { %1276 = vst [vmem:[%s1885_s1 + $0xb] sm:$0x1] %v473_v52  ;;  %1277 = vst [vmem:[%s1885_s1 + $0xc] sm:$0x1] %v481_v53  ;;  %v401_v1 = vpack.c.bf16 %v1423_v45, %v400_v62  ;;  %v409_v2 = vpack.c.bf16 %v1423_v45, %v408_v63  ;;  %v416_v3 = vld [vmem:[#allocation0 + $0x20] sm:$0x3] }
  0x8d   :  { %1278 = vst [vmem:[%s1885_s1 + $0xd] sm:$0x1] %v489_v54  ;;  %v424_v4 = vld [vmem:[#allocation0 + $0x28] sm:$0x3]  ;;  %v432_v5 = vld [vmem:[#allocation0 + $0x30] sm:$0x3]  ;;  %v417_v6 = vpack.c.bf16 %v1423_v45, %v416_v3 }
  0x8e   :  { %1279 = vst [vmem:[%s1885_s1 + $0xe] sm:$0x1] %v497_v58  ;;  %1280 = vst [vmem:[%s1885_s1 + $0xf] sm:$0x1] %v505_v59  ;;  %v425_v7 = vpack.c.bf16 %v1423_v45, %v424_v4  ;;  %v433_v8 = vpack.c.bf16 %v1423_v45, %v432_v5  ;;  %v440_v9 = vld [vmem:[#allocation0 + $0x38] sm:$0x3] }
  0x8f   :  { %391 = vst [vmem:[%s1885_s1] sm:$0x1] %v388_v60  ;;  %v704_v10 = vld [vmem:[#allocation0 + $0x140] sm:$0x3]  ;;  %v712_v11 = vld [vmem:[#allocation0 + $0x148] sm:$0x3]  ;;  %v441_v12 = vpack.c.bf16 %v1423_v45, %v440_v9 }
  0x90   :  { %1266 = vst [vmem:[%s1885_s1 + $0x1] sm:$0x1] %v394_v0  ;;  %1267 = vst [vmem:[%s1885_s1 + $0x2] sm:$0x1] %v401_v1  ;;  %v705_v13 = vpack.c.bf16 %v1423_v45, %v704_v10  ;;  %v713_v14 = vpack.c.bf16 %v1423_v45, %v712_v11  ;;  %v720_v15 = vld [vmem:[#allocation0 + $0x150] sm:$0x3] }
  0x91   :  { %1268 = vst [vmem:[%s1885_s1 + $0x3] sm:$0x1] %v409_v2  ;;  %v728_v16 = vld [vmem:[#allocation0 + $0x158] sm:$0x3]  ;;  %v736_v17 = vld [vmem:[#allocation0 + $0x160] sm:$0x3]  ;;  %v721_v18 = vpack.c.bf16 %v1423_v45, %v720_v15 }
  0x92   :  { %1269 = vst [vmem:[%s1885_s1 + $0x4] sm:$0x1] %v417_v6  ;;  %1270 = vst [vmem:[%s1885_s1 + $0x5] sm:$0x1] %v425_v7  ;;  %v729_v19 = vpack.c.bf16 %v1423_v45, %v728_v16  ;;  %v737_v20 = vpack.c.bf16 %v1423_v45, %v736_v17  ;;  %v744_v21 = vld [vmem:[#allocation0 + $0x168] sm:$0x3] }
  0x93   :  { %1271 = vst [vmem:[%s1885_s1 + $0x6] sm:$0x1] %v433_v8  ;;  %v752_v22 = vld [vmem:[#allocation0 + $0x170] sm:$0x3]  ;;  %v760_v23 = vld [vmem:[#allocation0 + $0x178] sm:$0x3]  ;;  %v745_v24 = vpack.c.bf16 %v1423_v45, %v744_v21 }
  0x94   :  { %1272 = vst [vmem:[%s1885_s1 + $0x7] sm:$0x1] %v441_v12  ;;  %1305 = vst [vmem:[%s1885_s1 + $0x28] sm:$0x1] %v705_v13  ;;  %v753_v25 = vpack.c.bf16 %v1423_v45, %v752_v22  ;;  %v761_v26 = vpack.c.bf16 %v1423_v45, %v760_v23  ;;  %v640_v27 = vld [vmem:[#allocation0 + $0x100] sm:$0x3] }
  0x95   :  { %1306 = vst [vmem:[%s1885_s1 + $0x29] sm:$0x1] %v713_v14  ;;  %v648_v28 = vld [vmem:[#allocation0 + $0x108] sm:$0x3]  ;;  %v656_v29 = vld [vmem:[#allocation0 + $0x110] sm:$0x3]  ;;  %v641_v30 = vpack.c.bf16 %v1423_v45, %v640_v27 }
  0x96   :  { %1307 = vst [vmem:[%s1885_s1 + $0x2a] sm:$0x1] %v721_v18  ;;  %1308 = vst [vmem:[%s1885_s1 + $0x2b] sm:$0x1] %v729_v19  ;;  %v649_v31 = vpack.c.bf16 %v1423_v45, %v648_v28  ;;  %v657_v32 = vpack.c.bf16 %v1423_v45, %v656_v29  ;;  %v664_v33 = vld [vmem:[#allocation0 + $0x118] sm:$0x3] }
  0x97   :  { %1309 = vst [vmem:[%s1885_s1 + $0x2c] sm:$0x1] %v737_v20  ;;  %v672_v34 = vld [vmem:[#allocation0 + $0x120] sm:$0x3]  ;;  %v680_v35 = vld [vmem:[#allocation0 + $0x128] sm:$0x3]  ;;  %v665_v36 = vpack.c.bf16 %v1423_v45, %v664_v33 }
  0x98   :  { %1310 = vst [vmem:[%s1885_s1 + $0x2d] sm:$0x1] %v745_v24  ;;  %1311 = vst [vmem:[%s1885_s1 + $0x2e] sm:$0x1] %v753_v25  ;;  %v673_v37 = vpack.c.bf16 %v1423_v45, %v672_v34  ;;  %v681_v38 = vpack.c.bf16 %v1423_v45, %v680_v35  ;;  %v688_v39 = vld [vmem:[#allocation0 + $0x130] sm:$0x3] }
  0x99   :  { %1312 = vst [vmem:[%s1885_s1 + $0x2f] sm:$0x1] %v761_v26  ;;  %v696_v40 = vld [vmem:[#allocation0 + $0x138] sm:$0x3]  ;;  %v576_v41 = vld [vmem:[#allocation0 + $0xc0] sm:$0x3]  ;;  %v689_v42 = vpack.c.bf16 %v1423_v45, %v688_v39 }
  0x9a   :  { %1297 = vst [vmem:[%s1885_s1 + $0x20] sm:$0x1] %v641_v30  ;;  %1298 = vst [vmem:[%s1885_s1 + $0x21] sm:$0x1] %v649_v31  ;;  %v697_v43 = vpack.c.bf16 %v1423_v45, %v696_v40  ;;  %v577_v44 = vpack.c.bf16 %v1423_v45, %v576_v41  ;;  %v584_v46 = vld [vmem:[#allocation0 + $0xc8] sm:$0x3] }
  0x9b   :  { %1299 = vst [vmem:[%s1885_s1 + $0x22] sm:$0x1] %v657_v32  ;;  %v592_v47 = vld [vmem:[#allocation0 + $0xd0] sm:$0x3]  ;;  %v600_v48 = vld [vmem:[#allocation0 + $0xd8] sm:$0x3]  ;;  %v585_v49 = vpack.c.bf16 %v1423_v45, %v584_v46 }
  0x9c   :  { %1300 = vst [vmem:[%s1885_s1 + $0x23] sm:$0x1] %v665_v36  ;;  %1301 = vst [vmem:[%s1885_s1 + $0x24] sm:$0x1] %v673_v37  ;;  %v593_v50 = vpack.c.bf16 %v1423_v45, %v592_v47  ;;  %v601_v51 = vpack.c.bf16 %v1423_v45, %v600_v48  ;;  %v608_v52 = vld [vmem:[#allocation0 + $0xe0] sm:$0x3] }
  0x9d   :  { %1302 = vst [vmem:[%s1885_s1 + $0x25] sm:$0x1] %v681_v38  ;;  %v616_v53 = vld [vmem:[#allocation0 + $0xe8] sm:$0x3]  ;;  %v624_v54 = vld [vmem:[#allocation0 + $0xf0] sm:$0x3]  ;;  %v609_v55 = vpack.c.bf16 %v1423_v45, %v608_v52 }
  0x9e   :  { %1303 = vst [vmem:[%s1885_s1 + $0x26] sm:$0x1] %v689_v42  ;;  %1304 = vst [vmem:[%s1885_s1 + $0x27] sm:$0x1] %v697_v43  ;;  %v617_v56 = vpack.c.bf16 %v1423_v45, %v616_v53  ;;  %v625_v57 = vpack.c.bf16 %v1423_v45, %v624_v54  ;;  %v632_v58 = vld [vmem:[#allocation0 + $0xf8] sm:$0x3] }
  0x9f   :  { %1289 = vst [vmem:[%s1885_s1 + $0x18] sm:$0x1] %v577_v44  ;;  %v512_v59 = vld [vmem:[#allocation0 + $0x80] sm:$0x3]  ;;  %v520_v60 = vld [vmem:[#allocation0 + $0x88] sm:$0x3]  ;;  %v633_v61 = vpack.c.bf16 %v1423_v45, %v632_v58 }
  0xa0   :  { %1290 = vst [vmem:[%s1885_s1 + $0x19] sm:$0x1] %v585_v49  ;;  %1291 = vst [vmem:[%s1885_s1 + $0x1a] sm:$0x1] %v593_v50  ;;  %v513_v62 = vpack.c.bf16 %v1423_v45, %v512_v59  ;;  %v521_v63 = vpack.c.bf16 %v1423_v45, %v520_v60  ;;  %v528_v0 = vld [vmem:[#allocation0 + $0x90] sm:$0x3] }
  0xa1   :  { %1292 = vst [vmem:[%s1885_s1 + $0x1b] sm:$0x1] %v601_v51  ;;  %v536_v1 = vld [vmem:[#allocation0 + $0x98] sm:$0x3]  ;;  %v544_v2 = vld [vmem:[#allocation0 + $0xa0] sm:$0x3]  ;;  %v529_v3 = vpack.c.bf16 %v1423_v45, %v528_v0 }
  0xa2   :  { %1293 = vst [vmem:[%s1885_s1 + $0x1c] sm:$0x1] %v609_v55  ;;  %1294 = vst [vmem:[%s1885_s1 + $0x1d] sm:$0x1] %v617_v56  ;;  %v537_v4 = vpack.c.bf16 %v1423_v45, %v536_v1  ;;  %v545_v5 = vpack.c.bf16 %v1423_v45, %v544_v2  ;;  %v552_v6 = vld [vmem:[#allocation0 + $0xa8] sm:$0x3] }
  0xa3   :  { %1295 = vst [vmem:[%s1885_s1 + $0x1e] sm:$0x1] %v625_v57  ;;  %v560_v7 = vld [vmem:[#allocation0 + $0xb0] sm:$0x3]  ;;  %v568_v8 = vld [vmem:[#allocation0 + $0xb8] sm:$0x3]  ;;  %v553_v9 = vpack.c.bf16 %v1423_v45, %v552_v6 }
  0xa4   :  { %1296 = vst [vmem:[%s1885_s1 + $0x1f] sm:$0x1] %v633_v61  ;;  %1281 = vst [vmem:[%s1885_s1 + $0x10] sm:$0x1] %v513_v62  ;;  %v561_v10 = vpack.c.bf16 %v1423_v45, %v560_v7  ;;  %v569_v11 = vpack.c.bf16 %v1423_v45, %v568_v8  ;;  %v832_v12 = vld [vmem:[#allocation0 + $0x1c0] sm:$0x3] }
  0xa5   :  { %1282 = vst [vmem:[%s1885_s1 + $0x11] sm:$0x1] %v521_v63  ;;  %v840_v13 = vld [vmem:[#allocation0 + $0x1c8] sm:$0x3]  ;;  %v848_v14 = vld [vmem:[#allocation0 + $0x1d0] sm:$0x3]  ;;  %v833_v15 = vpack.c.bf16 %v1423_v45, %v832_v12 }
  0xa6   :  { %1283 = vst [vmem:[%s1885_s1 + $0x12] sm:$0x1] %v529_v3  ;;  %1284 = vst [vmem:[%s1885_s1 + $0x13] sm:$0x1] %v537_v4  ;;  %v841_v16 = vpack.c.bf16 %v1423_v45, %v840_v13  ;;  %v849_v17 = vpack.c.bf16 %v1423_v45, %v848_v14  ;;  %v856_v18 = vld [vmem:[#allocation0 + $0x1d8] sm:$0x3] }
  0xa7   :  { %1285 = vst [vmem:[%s1885_s1 + $0x14] sm:$0x1] %v545_v5  ;;  %v864_v19 = vld [vmem:[#allocation0 + $0x1e0] sm:$0x3]  ;;  %v872_v20 = vld [vmem:[#allocation0 + $0x1e8] sm:$0x3]  ;;  %v857_v21 = vpack.c.bf16 %v1423_v45, %v856_v18 }
  0xa8   :  { %1286 = vst [vmem:[%s1885_s1 + $0x15] sm:$0x1] %v553_v9  ;;  %1287 = vst [vmem:[%s1885_s1 + $0x16] sm:$0x1] %v561_v10  ;;  %v865_v22 = vpack.c.bf16 %v1423_v45, %v864_v19  ;;  %v873_v23 = vpack.c.bf16 %v1423_v45, %v872_v20  ;;  %v880_v24 = vld [vmem:[#allocation0 + $0x1f0] sm:$0x3] }
  0xa9   :  { %1288 = vst [vmem:[%s1885_s1 + $0x17] sm:$0x1] %v569_v11  ;;  %v888_v25 = vld [vmem:[#allocation0 + $0x1f8] sm:$0x3]  ;;  %v768_v26 = vld [vmem:[#allocation0 + $0x180] sm:$0x3]  ;;  %v881_v27 = vpack.c.bf16 %v1423_v45, %v880_v24 }
  0xaa   :  { %1321 = vst [vmem:[%s1885_s1 + $0x38] sm:$0x1] %v833_v15  ;;  %1322 = vst [vmem:[%s1885_s1 + $0x39] sm:$0x1] %v841_v16  ;;  %v889_v28 = vpack.c.bf16 %v1423_v45, %v888_v25  ;;  %v769_v29 = vpack.c.bf16 %v1423_v45, %v768_v26  ;;  %v776_v30 = vld [vmem:[#allocation0 + $0x188] sm:$0x3] }
  0xab   :  { %1323 = vst [vmem:[%s1885_s1 + $0x3a] sm:$0x1] %v849_v17  ;;  %v784_v31 = vld [vmem:[#allocation0 + $0x190] sm:$0x3]  ;;  %v792_v32 = vld [vmem:[#allocation0 + $0x198] sm:$0x3]  ;;  %v777_v33 = vpack.c.bf16 %v1423_v45, %v776_v30 }
  0xac   :  { %1324 = vst [vmem:[%s1885_s1 + $0x3b] sm:$0x1] %v857_v21  ;;  %1325 = vst [vmem:[%s1885_s1 + $0x3c] sm:$0x1] %v865_v22  ;;  %v785_v34 = vpack.c.bf16 %v1423_v45, %v784_v31  ;;  %v793_v35 = vpack.c.bf16 %v1423_v45, %v792_v32  ;;  %v800_v36 = vld [vmem:[#allocation0 + $0x1a0] sm:$0x3] }
  0xad   :  { %1326 = vst [vmem:[%s1885_s1 + $0x3d] sm:$0x1] %v873_v23  ;;  %v808_v37 = vld [vmem:[#allocation0 + $0x1a8] sm:$0x3]  ;;  %v816_v38 = vld [vmem:[#allocation0 + $0x1b0] sm:$0x3]  ;;  %v801_v39 = vpack.c.bf16 %v1423_v45, %v800_v36 }
  0xae   :  { %1327 = vst [vmem:[%s1885_s1 + $0x3e] sm:$0x1] %v881_v27  ;;  %1328 = vst [vmem:[%s1885_s1 + $0x3f] sm:$0x1] %v889_v28  ;;  %v809_v40 = vpack.c.bf16 %v1423_v45, %v808_v37  ;;  %v817_v41 = vpack.c.bf16 %v1423_v45, %v816_v38  ;;  %v824_v42 = vld [vmem:[#allocation0 + $0x1b8] sm:$0x3] }
  0xaf   :  { %1313 = vst [vmem:[%s1885_s1 + $0x30] sm:$0x1] %v769_v29  ;;  %v960_v43 = vld [vmem:[#allocation0 + $0x240] sm:$0x3]  ;;  %v968_v44 = vld [vmem:[#allocation0 + $0x248] sm:$0x3]  ;;  %v825_v46 = vpack.c.bf16 %v1423_v45, %v824_v42 }
  0xb0   :  { %1314 = vst [vmem:[%s1885_s1 + $0x31] sm:$0x1] %v777_v33  ;;  %1315 = vst [vmem:[%s1885_s1 + $0x32] sm:$0x1] %v785_v34  ;;  %v961_v47 = vpack.c.bf16 %v1423_v45, %v960_v43  ;;  %v969_v48 = vpack.c.bf16 %v1423_v45, %v968_v44  ;;  %v976_v49 = vld [vmem:[#allocation0 + $0x250] sm:$0x3] }
  0xb1   :  { %1316 = vst [vmem:[%s1885_s1 + $0x33] sm:$0x1] %v793_v35  ;;  %v984_v50 = vld [vmem:[#allocation0 + $0x258] sm:$0x3]  ;;  %v992_v51 = vld [vmem:[#allocation0 + $0x260] sm:$0x3]  ;;  %v977_v52 = vpack.c.bf16 %v1423_v45, %v976_v49 }
  0xb2   :  { %1317 = vst [vmem:[%s1885_s1 + $0x34] sm:$0x1] %v801_v39  ;;  %1318 = vst [vmem:[%s1885_s1 + $0x35] sm:$0x1] %v809_v40  ;;  %v985_v53 = vpack.c.bf16 %v1423_v45, %v984_v50  ;;  %v993_v54 = vpack.c.bf16 %v1423_v45, %v992_v51  ;;  %v1000_v55 = vld [vmem:[#allocation0 + $0x268] sm:$0x3] }
  0xb3   :  { %1319 = vst [vmem:[%s1885_s1 + $0x36] sm:$0x1] %v817_v41  ;;  %v1008_v56 = vld [vmem:[#allocation0 + $0x270] sm:$0x3]  ;;  %v1016_v57 = vld [vmem:[#allocation0 + $0x278] sm:$0x3]  ;;  %v1001_v58 = vpack.c.bf16 %v1423_v45, %v1000_v55 }
  0xb4   :  { %1320 = vst [vmem:[%s1885_s1 + $0x37] sm:$0x1] %v825_v46  ;;  %1337 = vst [vmem:[%s1885_s1 + $0x48] sm:$0x1] %v961_v47  ;;  %v1009_v59 = vpack.c.bf16 %v1423_v45, %v1008_v56  ;;  %v1017_v60 = vpack.c.bf16 %v1423_v45, %v1016_v57  ;;  %v896_v61 = vld [vmem:[#allocation0 + $0x200] sm:$0x3] }
  0xb5   :  { %1338 = vst [vmem:[%s1885_s1 + $0x49] sm:$0x1] %v969_v48  ;;  %v904_v62 = vld [vmem:[#allocation0 + $0x208] sm:$0x3]  ;;  %v912_v63 = vld [vmem:[#allocation0 + $0x210] sm:$0x3]  ;;  %v897_v0 = vpack.c.bf16 %v1423_v45, %v896_v61 }
  0xb6   :  { %1339 = vst [vmem:[%s1885_s1 + $0x4a] sm:$0x1] %v977_v52  ;;  %1340 = vst [vmem:[%s1885_s1 + $0x4b] sm:$0x1] %v985_v53  ;;  %v905_v1 = vpack.c.bf16 %v1423_v45, %v904_v62  ;;  %v913_v2 = vpack.c.bf16 %v1423_v45, %v912_v63  ;;  %v920_v3 = vld [vmem:[#allocation0 + $0x218] sm:$0x3] }
  0xb7   :  { %1341 = vst [vmem:[%s1885_s1 + $0x4c] sm:$0x1] %v993_v54  ;;  %v928_v4 = vld [vmem:[#allocation0 + $0x220] sm:$0x3]  ;;  %v936_v5 = vld [vmem:[#allocation0 + $0x228] sm:$0x3]  ;;  %v921_v6 = vpack.c.bf16 %v1423_v45, %v920_v3 }
  0xb8   :  { %1342 = vst [vmem:[%s1885_s1 + $0x4d] sm:$0x1] %v1001_v58  ;;  %1343 = vst [vmem:[%s1885_s1 + $0x4e] sm:$0x1] %v1009_v59  ;;  %v929_v7 = vpack.c.bf16 %v1423_v45, %v928_v4  ;;  %v937_v8 = vpack.c.bf16 %v1423_v45, %v936_v5  ;;  %v944_v9 = vld [vmem:[#allocation0 + $0x230] sm:$0x3] }
  0xb9   :  { %1344 = vst [vmem:[%s1885_s1 + $0x4f] sm:$0x1] %v1017_v60  ;;  %v952_v10 = vld [vmem:[#allocation0 + $0x238] sm:$0x3]  ;;  %v1088_v11 = vld [vmem:[#allocation0 + $0x2c0] sm:$0x3]  ;;  %v945_v12 = vpack.c.bf16 %v1423_v45, %v944_v9 }
  0xba   :  { %1329 = vst [vmem:[%s1885_s1 + $0x40] sm:$0x1] %v897_v0  ;;  %1330 = vst [vmem:[%s1885_s1 + $0x41] sm:$0x1] %v905_v1  ;;  %v953_v13 = vpack.c.bf16 %v1423_v45, %v952_v10  ;;  %v1089_v14 = vpack.c.bf16 %v1423_v45, %v1088_v11  ;;  %v1096_v15 = vld [vmem:[#allocation0 + $0x2c8] sm:$0x3] }
  0xbb   :  { %1331 = vst [vmem:[%s1885_s1 + $0x42] sm:$0x1] %v913_v2  ;;  %v1104_v16 = vld [vmem:[#allocation0 + $0x2d0] sm:$0x3]  ;;  %v1112_v17 = vld [vmem:[#allocation0 + $0x2d8] sm:$0x3]  ;;  %v1097_v18 = vpack.c.bf16 %v1423_v45, %v1096_v15 }
  0xbc   :  { %1332 = vst [vmem:[%s1885_s1 + $0x43] sm:$0x1] %v921_v6  ;;  %1333 = vst [vmem:[%s1885_s1 + $0x44] sm:$0x1] %v929_v7  ;;  %v1105_v19 = vpack.c.bf16 %v1423_v45, %v1104_v16  ;;  %v1113_v20 = vpack.c.bf16 %v1423_v45, %v1112_v17  ;;  %v1120_v21 = vld [vmem:[#allocation0 + $0x2e0] sm:$0x3] }
  0xbd   :  { %1334 = vst [vmem:[%s1885_s1 + $0x45] sm:$0x1] %v937_v8  ;;  %v1128_v22 = vld [vmem:[#allocation0 + $0x2e8] sm:$0x3]  ;;  %v1136_v23 = vld [vmem:[#allocation0 + $0x2f0] sm:$0x3]  ;;  %v1121_v24 = vpack.c.bf16 %v1423_v45, %v1120_v21 }
  0xbe   :  { %1335 = vst [vmem:[%s1885_s1 + $0x46] sm:$0x1] %v945_v12  ;;  %1336 = vst [vmem:[%s1885_s1 + $0x47] sm:$0x1] %v953_v13  ;;  %v1129_v25 = vpack.c.bf16 %v1423_v45, %v1128_v22  ;;  %v1137_v26 = vpack.c.bf16 %v1423_v45, %v1136_v23  ;;  %v1144_v27 = vld [vmem:[#allocation0 + $0x2f8] sm:$0x3] }
  0xbf   :  { %1353 = vst [vmem:[%s1885_s1 + $0x58] sm:$0x1] %v1089_v14  ;;  %v1024_v28 = vld [vmem:[#allocation0 + $0x280] sm:$0x3]  ;;  %v1032_v29 = vld [vmem:[#allocation0 + $0x288] sm:$0x3]  ;;  %v1145_v30 = vpack.c.bf16 %v1423_v45, %v1144_v27 }
  0xc0   :  { %1354 = vst [vmem:[%s1885_s1 + $0x59] sm:$0x1] %v1097_v18  ;;  %1355 = vst [vmem:[%s1885_s1 + $0x5a] sm:$0x1] %v1105_v19  ;;  %v1025_v31 = vpack.c.bf16 %v1423_v45, %v1024_v28  ;;  %v1033_v32 = vpack.c.bf16 %v1423_v45, %v1032_v29  ;;  %v1040_v33 = vld [vmem:[#allocation0 + $0x290] sm:$0x3] }
  0xc1   :  { %1356 = vst [vmem:[%s1885_s1 + $0x5b] sm:$0x1] %v1113_v20  ;;  %v1048_v34 = vld [vmem:[#allocation0 + $0x298] sm:$0x3]  ;;  %v1056_v35 = vld [vmem:[#allocation0 + $0x2a0] sm:$0x3]  ;;  %v1041_v36 = vpack.c.bf16 %v1423_v45, %v1040_v33 }
  0xc2   :  { %1357 = vst [vmem:[%s1885_s1 + $0x5c] sm:$0x1] %v1121_v24  ;;  %1358 = vst [vmem:[%s1885_s1 + $0x5d] sm:$0x1] %v1129_v25  ;;  %v1049_v37 = vpack.c.bf16 %v1423_v45, %v1048_v34  ;;  %v1057_v38 = vpack.c.bf16 %v1423_v45, %v1056_v35  ;;  %v1064_v39 = vld [vmem:[#allocation0 + $0x2a8] sm:$0x3] }
  0xc3   :  { %1359 = vst [vmem:[%s1885_s1 + $0x5e] sm:$0x1] %v1137_v26  ;;  %v1072_v40 = vld [vmem:[#allocation0 + $0x2b0] sm:$0x3]  ;;  %v1080_v41 = vld [vmem:[#allocation0 + $0x2b8] sm:$0x3]  ;;  %v1065_v42 = vpack.c.bf16 %v1423_v45, %v1064_v39 }
  0xc4   :  { %1360 = vst [vmem:[%s1885_s1 + $0x5f] sm:$0x1] %v1145_v30  ;;  %1345 = vst [vmem:[%s1885_s1 + $0x50] sm:$0x1] %v1025_v31  ;;  %v1073_v43 = vpack.c.bf16 %v1423_v45, %v1072_v40  ;;  %v1081_v45 = vpack.c.bf16 %v1423_v45, %v1080_v41 }
  0xc5   :  { %1346 = vst [vmem:[%s1885_s1 + $0x51] sm:$0x1] %v1033_v32  ;;  %1347 = vst [vmem:[%s1885_s1 + $0x52] sm:$0x1] %v1041_v36 }
  0xc6   :  { %1348 = vst [vmem:[%s1885_s1 + $0x53] sm:$0x1] %v1049_v37  ;;  %1349 = vst [vmem:[%s1885_s1 + $0x54] sm:$0x1] %v1057_v38 }
  0xc7   :  { %1350 = vst [vmem:[%s1885_s1 + $0x55] sm:$0x1] %v1065_v42  ;;  %1351 = vst [vmem:[%s1885_s1 + $0x56] sm:$0x1] %v1073_v43 }
  0xc8   :  { %1352 = vst [vmem:[%s1885_s1 + $0x57] sm:$0x1] %v1081_v45 }

// kernel: moco_vit_forward.7
= control target key start
LH: loop header
LB: loop body
LE: loop exit
PB: predicated region body
PF: predicated region fallthrough
CT: control target
= control target key end

     0   :  { %7 = vsyncpa [#allocation3], 0  ;;  %s835_s0 = inlined_call_operand.vmem [shape: f32[2,2,128], index: 0, kind: input, shape index: {}]   ;;  %s836_s1 = inlined_call_operand.vmem [shape: f32[2,128,128], index: 1, kind: input, shape index: {}]   ;;  %s837_s2 = inlined_call_operand.hbm [shape: f32[2,2,128], index: 2, kind: output, shape index: {}]  }
   0x1   :  { %9 = vsyncpa [#allocation3 + $0x1], 0  ;;  %s620_s9 = smov 0   ;;  %s622_s10 = smov 0  }
   0x2   :  { %s624_s11 = smov 0   ;;  %s626_s12 = smov 0  }
   0x3 LB: > { %s641_s13 = sadd.s32 4294967295, %s600_s12   ;;  %s423_s14 = sadd.s32 4294967294, %s600_s12   ;;  %s600_s12 = sphi %s626_s12, %s843_s12   ;;  %s596_s11 = sphi %s624_s11, %s842_s11   ;;  %s592_s10 = sphi %s622_s10, %s841_s10   ;;  %s588_s9 = sphi %s620_s9, %s840_s9  }
   0x4   : > { %s645_s15 = sadd.s32 1, %s600_s12   ;;  %s76_s16 = sadd.s32 1, %s596_s11 }
   0x5   : > { %s73_s17 = ssub.s32 %s600_s12, %s645_s15  ;;  %p86_p0 = scmp.ne.s32.totalorder %s596_s11, %s592_s10 }
   0x6   : > { %p74_p1 = scmp.eq.s32.totalorder %s73_s17, 0  ;;  %p87_p2 = scmp.eq.s32.totalorder %s641_s13, 1 }
   0x7   : > { %p92_p3 = scmp.ne.s32.totalorder %s592_s10, %s588_s9  ;;  %p93_p4 = scmp.eq.s32.totalorder %s423_s14, 1 }
   0x8   : > { %s656_s18 = scalar_select %p74_p1, %s596_s11, %s76_s16  }
   0x9   : > { %p658_p5 = por %p87_p2, %p86_p0  ;;  %p662_p6 = por %p93_p4, %p92_p3 }
   0xa   : > { %p426_p7 = scmp.ge.s32.totalorder %s600_s12, 1  ;;  %p128_p8 = scmp.lt.s32.totalorder %s600_s12, 3 }
   0xc   : > { %p129_p9 = pnand %p426_p7, %p128_p8 }
   0xd   : > { %s159_s21 = ssub.s32 (!%p129_p9), 1, %s641_s13  ;;  %p155_p11 = scmp.lt.s32.totalorder (!%p129_p9), %s641_s13, 1 }
   0xe   : > { %132 = sbr.rel (%p129_p9) target bundleno = 459 (0x1cb), region = 28  ;;  %p160_p10 = scmp.lt.s32.totalorder (!%p129_p9), %s159_s21, 1 }
   0xf   : > { %s152_s3 = sand.u32 (!%p129_p9), 1, %s592_s10   ;;  %s432_s7 = sshll.u32 (!%p129_p9), %s641_s13, 5 }
  0x10   : > { %s427_s4 = sshll.u32 (!%p129_p9), %s152_s3, 1  ;;  %s796_s16 = scalar_lea.hbm (!%p129_p9), %s837_s2, %s432_s7 }
  0x11   : > { %s154_s5 = scalar_lea.vmem (!%p129_p9), [#allocation2], %s427_s4  ;;  %s339_s17 = scalar_lea.sflag (!%p129_p9), [#allocation3], %s152_s3 }
  0x12   : > { %s352_s6 = sshll.u32 (!%p129_p9), %s154_s5, 4  ;;  %s791_s6 = int_to_ptr.vmem [resolvable:$true] %s352_s6 }
  0x13   : > { %s845_s21 = smov (!%p160_p10, %s159_s21), 1  ;;  %v602_v31 = vmov 0.0   ;;  %vm169_vm0 = vcmask 1041408   ;;  %vm603_vm1 = vmmov 0  }
  0x14   : > { %s435_s22 = sshll.u32 %s845_s21, 7  ;;  %445 = vmatprep.subr.bf16.mxu0 %v602_v31  ;;  %461 = vmatprep.mubr.msk.bf16.mxu0 %vm603_vm1, %v602_v31  ;;  %s540_s21 = scalar_lea.vmem %s791_s6, 32 }
  0x15   : > { %s672_s25 = scalar_lea.vmem %s836_s1, %s435_s22  ;;  %p541_p12 = scmp.ne.s32.totalorder %s791_s6, %s540_s21 }
  0x16   : > { %v675_v0 = vld [vmem:[%s672_s25 + $0x70] sm:$0xff]  ;;  %v678_v1 = vld [vmem:[%s672_s25 + $0x78] sm:$0xff]  ;;  %v681_v2 = vld [vmem:[%s672_s25 + $0x60] sm:$0xff]  ;;  %s156_s26 = scalar_select %p155_p11, %s641_s13, 1 }
  0x17   : > { %v206_v3 = vmul.f32 %v675_v0, %v675_v0  ;;  %v204_v4 = vmul.f32 %v681_v2, %v681_v2  ;;  %v688_v5 = vld [vmem:[%s672_s25 + $0x68] sm:$0xff]  ;;  %v207_v6 = vmul.f32 %v678_v1, %v678_v1  ;;  %v695_v8 = vld [vmem:[%s672_s25 + $0x58] sm:$0xff]  ;;  %v698_v9 = vld [vmem:[%s672_s25 + $0x50] sm:$0xff]  ;;  %p542_p13 = pnand %p541_p12, %p658_p5  ;;  %s604_s13 = smov [#allocation2]  }
  0x18   : > { %v205_v7 = vmul.f32 %v688_v5, %v688_v5  ;;  %v203_v10 = vmul.f32 %v695_v8, %v695_v8  ;;  %v202_v11 = vmul.f32 %v698_v9, %v698_v9  ;;  %v705_v12 = vld [vmem:[%s672_s25 + $0x48] sm:$0xff]  ;;  %v708_v13 = vld [vmem:[%s672_s25 + $0x40] sm:$0xff]  ;;  %v716_v16 = vld [vmem:[%s672_s25 + $0x38] sm:$0xff]  ;;  %s428_s27 = sshll.u32 %s156_s26, 1  ;;  %s544_s22 = sshll.u32 %s604_s13, 4  ;;  %s545_s22 = int_to_ptr.vmem [resolvable:$false] %s544_s22 }
  0x19   : > { %236 = vadd.xlane.f32.xlu0 %v206_v3  ;;  %232 = vadd.xlane.f32.xlu1 %v204_v4  ;;  %v201_v14 = vmul.f32 %v705_v12, %v705_v12  ;;  %v200_v15 = vmul.f32 %v708_v13, %v708_v13  ;;  %v719_v17 = vld [vmem:[%s672_s25 + $0x30] sm:$0xff]  ;;  %v199_v18 = vmul.f32 %v716_v16, %v716_v16  ;;  %v727_v20 = vld [vmem:[%s672_s25 + $0x28] sm:$0xff]  ;;  %v730_v21 = vld [vmem:[%s672_s25 + $0x20] sm:$0xff]  ;;  %s158_s30 = scalar_lea.vmem %s835_s0, %s428_s27  ;;  %p543_p0 = pneg %p542_p13 }
  0x1a   : > { %v198_v19 = vmul.f32 %v719_v17, %v719_v17  ;;  %v197_v22 = vmul.f32 %v727_v20, %v727_v20  ;;  %v196_v23 = vmul.f32 %v730_v21, %v730_v21  ;;  %v737_v24 = vld [vmem:[%s672_s25 + $0x18] sm:$0xff]  ;;  %v740_v25 = vld [vmem:[%s672_s25 + $0x10] sm:$0xff]  ;;  %v750_v28 = vld [vmem:[%s672_s25 + $0x8] sm:$0xff]  ;;  %s546_s23 = scalar_lea.vmem %s545_s22, 64  ;;  %p547_p1 = scmp.lt.s32.totalorder %s791_s6, %s545_s22 }
  0x1b   : > { %v195_v26 = vmul.f32 %v737_v24, %v737_v24  ;;  %v194_v27 = vmul.f32 %v740_v25, %v740_v25  ;;  %v753_v29 = vld [vmem:[%s672_s25] sm:$0xff]  ;;  %v193_v32 = vmul.f32 %v750_v28, %v750_v28  ;;  %p548_p2 = scmp.lt.s32.totalorder %s546_s23, %s540_s21 }
  0x1c   : > { %v755_v30 = vld [vmem:[%s158_s30] sm:$0x3]  ;;  %v192_v33 = vmul.f32 %v753_v29, %v753_v29 }
  0x1d   : > { %238 = vadd.xlane.f32.xlu0 %v207_v6  ;;  %234 = vadd.xlane.f32.xlu1 %v205_v7  ;;  %v168_v34 = vmul.f32 %v755_v30, %v755_v30  ;;  %p549_p3 = por %p548_p2, %p547_p1 }
  0x1f   : > { %v170_v35 = vsel %vm169_vm0, %v168_v34, 0.0  ;;  %p550_p4 = pnand %p549_p3, %p543_p0 }
  0x21   : > { %230 = vadd.xlane.f32.xlu1 %v203_v10  ;;  %228 = vadd.xlane.f32.xlu0 %v202_v11 }
  0x25   : > { %226 = vadd.xlane.f32.xlu1 %v201_v14  ;;  %224 = vadd.xlane.f32.xlu0 %v200_v15 }
  0x29   : > { %222 = vadd.xlane.f32.xlu1 %v199_v18  ;;  %220 = vadd.xlane.f32.xlu0 %v198_v19 }
  0x2d   : > { %218 = vadd.xlane.f32.xlu1 %v197_v22  ;;  %216 = vadd.xlane.f32.xlu0 %v196_v23 }
  0x31   : > { %214 = vadd.xlane.f32.xlu1 %v195_v26  ;;  %212 = vadd.xlane.f32.xlu0 %v194_v27 }
  0x35   : > { %210 = vadd.xlane.f32.xlu1 %v193_v32  ;;  %208 = vadd.xlane.f32.xlu0 %v192_v33 }
  0x39   : > { %171 = vadd.xlane.f32.xlu0 %v170_v35 }
  0xa2   : > { %v237_v36 = vpop.xlane.xlu0 %236  ;;  %v233_v37 = vpop.xlane.xlu1 %232 }
  0xa3   : > { %v254_v38 = vmax.f32 %v237_v36, 1e-24  ;;  %v252_v42 = vmax.f32 %v233_v37, 1e-24 }
  0xa5   : > { %506 = vrsqrt.f32 %v254_v38 }
  0xa6   : > { %v239_v39 = vpop.xlane.xlu0 %238  ;;  %v235_v40 = vpop.xlane.xlu1 %234 }
  0xa7   : > { %v255_v41 = vmax.f32 %v239_v39, 1e-24  ;;  %v253_v43 = vmax.f32 %v235_v40, 1e-24 }
  0xa9   : > { %508 = vrsqrt.f32 %v255_v41 }
  0xaa   : > { %v231_v44 = vpop.xlane.xlu1 %230  ;;  %510 = vrsqrt.f32 %v252_v42  ;;  %v229_v45 = vpop.xlane.xlu0 %228 }
  0xab   : > { %512 = vrsqrt.f32 %v253_v43  ;;  %v251_v46 = vmax.f32 %v231_v44, 1e-24  ;;  %v250_v47 = vmax.f32 %v229_v45, 1e-24 }
  0xad   : > { %514 = vrsqrt.f32 %v251_v46 }
  0xae   : > { %516 = vrsqrt.f32 %v250_v47  ;;  %v227_v48 = vpop.xlane.xlu1 %226  ;;  %v225_v50 = vpop.xlane.xlu0 %224 }
  0xaf   : > { %v249_v52 = vmax.f32 %v227_v48, 1e-24  ;;  %v248_v55 = vmax.f32 %v225_v50, 1e-24 }
  0xb1   : > { %518 = vrsqrt.f32 %v249_v52 }
  0xb2   : > { %v507_v49 = vpop.eup %506  ;;  %520 = vrsqrt.f32 %v248_v55  ;;  %v223_v59 = vpop.xlane.xlu1 %222 }
  0xb3   : > { %v286_v53 = vmul.f32 %v507_v49, %v675_v0  ;;  %v221_v60 = vpop.xlane.xlu0 %220  ;;  %v247_v63 = vmax.f32 %v223_v59, 1e-24 }
  0xb4   : > { %v246_v0 = vmax.f32 %v221_v60, 1e-24 }
  0xb5   : > { %522 = vrsqrt.f32 %v247_v63 }
  0xb6   : > { %v509_v51 = vpop.eup %508  ;;  %524 = vrsqrt.f32 %v246_v0  ;;  %v219_v10 = vpop.xlane.xlu1 %218 }
  0xb7   : > { %v287_v54 = vmul.f32 %v509_v51, %v678_v1  ;;  %v511_v56 = vpop.eup %510  ;;  %v217_v11 = vpop.xlane.xlu0 %216  ;;  %v245_v14 = vmax.f32 %v219_v10, 1e-24 }
  0xb8   : > { %v513_v58 = vpop.eup %512  ;;  %v284_v61 = vmul.f32 %v511_v56, %v681_v2 }
  0xb9   : > { %v296_v57 = vpack.c.bf16 %v287_v54, %v286_v53  ;;  %v285_v62 = vmul.f32 %v513_v58, %v688_v5  ;;  %v244_v5 = vmax.f32 %v217_v11, 1e-24  ;;  %526 = vrsqrt.f32 %v245_v14 }
  0xba   : > { %v515_v3 = vpop.eup %514  ;;  %v215_v23 = vpop.xlane.xlu1 %214 }
  0xbb   : > { %446 = vmatpush3.bf16.xpose.msra.mxu0 %v296_v57  ;;  %v517_v4 = vpop.eup %516  ;;  %v295_v1 = vpack.c.bf16 %v285_v62, %v284_v61  ;;  %v283_v7 = vmul.f32 %v515_v3, %v695_v8  ;;  %528 = vrsqrt.f32 %v244_v5  ;;  %v213_v8 = vpop.xlane.xlu0 %212 }
  0xbc   : > { %447 = vmatprep.subr.bf16.mxu0 %v602_v31  ;;  %v282_v6 = vmul.f32 %v517_v4, %v698_v9  ;;  %v243_v9 = vmax.f32 %v215_v23, 1e-24  ;;  %v242_v32 = vmax.f32 %v213_v8, 1e-24 }
  0xbe   : > { %v519_v2 = vpop.eup %518  ;;  %v294_v15 = vpack.c.bf16 %v283_v7, %v282_v6  ;;  %530 = vrsqrt.f32 %v243_v9  ;;  %v211_v36 = vpop.xlane.xlu1 %210 }
  0xbf   : > { %v521_v18 = vpop.eup %520  ;;  %v281_v22 = vmul.f32 %v519_v2, %v705_v12  ;;  %532 = vrsqrt.f32 %v242_v32  ;;  %v209_v12 = vpop.xlane.xlu0 %208 }
  0xc0   : > { %v280_v19 = vmul.f32 %v521_v18, %v708_v13  ;;  %v241_v13 = vmax.f32 %v211_v36, 1e-24  ;;  %v240_v39 = vmax.f32 %v209_v12, 1e-24 }
  0xc2   : > { %v523_v26 = vpop.eup %522  ;;  %v293_v27 = vpack.c.bf16 %v281_v22, %v280_v19  ;;  %534 = vrsqrt.f32 %v241_v13 }
  0xc3   : > { %448 = vmatpush3.bf16.xpose.msra.mxu0 %v295_v1  ;;  %v525_v33 = vpop.eup %524  ;;  %v279_v35 = vmul.f32 %v523_v26, %v716_v16  ;;  %536 = vrsqrt.f32 %v240_v39  ;;  %v172_v43 = vpop.xlane.xlu0 %171 }
  0xc4   : > { %449 = vmatprep.subr.bf16.mxu0 %v602_v31  ;;  %v278_v34 = vmul.f32 %v525_v33, %v719_v17  ;;  %v173_v16 = vmax.f32 %v172_v43, 1e-24 }
  0xc6   : > { %v527_v37 = vpop.eup %526  ;;  %v292_v38 = vpack.c.bf16 %v279_v35, %v278_v34  ;;  %538 = vrsqrt.f32 %v173_v16 }
  0xc7   : > { %v277_v42 = vmul.f32 %v527_v37, %v727_v20 }
  0xc8   : > { %v529_v40 = vpop.eup %528 }
  0xc9   : > { %v276_v41 = vmul.f32 %v529_v40, %v730_v21 }
  0xcb   : > { %450 = vmatpush3.bf16.xpose.msra.mxu0 %v294_v15  ;;  %v531_v17 = vpop.eup %530  ;;  %v291_v44 = vpack.c.bf16 %v277_v42, %v276_v41 }
  0xcc   : > { %451 = vmatprep.subr.bf16.mxu0 %v602_v31  ;;  %v533_v45 = vpop.eup %532  ;;  %v275_v47 = vmul.f32 %v531_v17, %v737_v24 }
  0xcd   : > { %v274_v46 = vmul.f32 %v533_v45, %v740_v25 }
  0xcf   : > { %v535_v48 = vpop.eup %534  ;;  %v290_v21 = vpack.c.bf16 %v275_v47, %v274_v46 }
  0xd0   : > { %v537_v20 = vpop.eup %536  ;;  %v273_v50 = vmul.f32 %v535_v48, %v750_v28 }
  0xd1   : > { %v272_v49 = vmul.f32 %v537_v20, %v753_v29 }
  0xd3   : > { %452 = vmatpush3.bf16.xpose.msra.mxu0 %v293_v27  ;;  %v539_v51 = vpop.eup %538  ;;  %v289_v52 = vpack.c.bf16 %v273_v50, %v272_v49 }
  0xd4   : > { %453 = vmatprep.subr.bf16.mxu0 %v602_v31  ;;  %v175_v25 = vmul.f32 %v539_v51, %v755_v30 }
  0xd6   : > { %v288_v24 = vpack.c.bf16 %v175_v25, %v175_v25 }
  0xdb   : > { %454 = vmatpush3.bf16.xpose.msra.mxu0 %v292_v38 }
  0xdc   : > { %455 = vmatprep.subr.bf16.mxu0 %v602_v31 }
  0xe3   : > { %456 = vmatpush3.bf16.xpose.msra.mxu0 %v291_v44 }
  0xe4   : > { %457 = vmatprep.subr.bf16.mxu0 %v602_v31 }
  0xeb   : > { %458 = vmatpush3.bf16.xpose.msra.mxu0 %v290_v21 }
  0xec   : > { %459 = vmatprep.subr.bf16.mxu0 %v602_v31 }
  0xf3   : > { %460 = vmatpush3.bf16.xpose.msra.mxu0 %v289_v52 }
  0xfa   : > { %462 = vmatmul.mubr.bf16.vlgmr.msra.gmra.mxu0 %v288_v24 }
 0x1ba   : > { %v331_v28 = vpop.f32.mrf.mxu0 }
 0x1bb   : > { %337 = vst [vmem:[%s154_s5] sm:$0x3] %v331_v28 }
 0x1bc   : > { %v463_v29 = vpop.f32.mrf.mxu0 }
 0x1bd   : > { %553 = shalt.err (!%p550_p4)
}
 0x1be   : > { %s554_s24 = scalar_lea.hbm %s796_s16, 32  ;;  %s558_s27 = scalar_lea.hbm %s837_s2, 64 }
 0x1bf   : > { %p555_p7 = scmp.ne.s32.totalorder %s796_s16, %s554_s24  ;;  %p559_p10 = scmp.lt.s32.totalorder %s796_s16, %s837_s2 }
 0x1c0   : > { %p560_p11 = scmp.lt.s32.totalorder %s558_s27, %s554_s24 }
 0x1c1   : > { %p556_p8 = pnand %p555_p7, %p658_p5 }
 0x1c2   : > { %p561_p12 = por %p560_p11, %p559_p10 }
 0x1c3   : > { %p557_p9 = pneg %p556_p8 }
 0x1c5   : > { %p562_p13 = pnand %p561_p12, %p557_p9 }
 0x1c7   : > { %565 = shalt.err (!%p562_p13)
}
 0x1c8   : > { %465 = dma.vmem_to_hbm [thread:$0]  (%p658_p5), %s791_s6, 32, %s796_s16, %s339_s17   ;;  %v334_v30 = vpop.f32.mrf.mxu0 }
 0x1ca   : > { %v464_v31 = vpop.f32.mrf.mxu0 }
 0x1cb PF: > { %p471_p0 = scmp.ge.s32.totalorder %s600_s12, 2  ;;  %s364_s30 = sand.u32 1, %s588_s9  }
 0x1cc   : > { %s365_s3 = scalar_lea.sflag [#allocation3], %s364_s30 }
 0x1cd   : > { %p468_p1 = pnand %p471_p0, %p662_p6 }
 0x1cf   : > { %p469_p2 = pneg %p468_p1 }
 0x1d1   : > { %583 = dma.done.wait (%p469_p2), %s365_s3, 32  }
 0x1d2   : > { %585 = vsyncadd (%p469_p2), %s365_s3, 4294967264  ;;  %p12_p5 = scmp.ge.s32.totalorder %s645_s15, 4   ;;  %s840_s9 = smov %s592_s10 }
 0x1d3   : > { %s841_s10 = smov %s596_s11  ;;  %s842_s11 = smov %s656_s18 }
 0x1d4   : > { %s843_s12 = smov %s645_s15  ;;  %14 = sbr.rel (!%p12_p5) target bundleno = 3 (0x3), region = 66 }
 0x1d9   :  { %370 = vsyncpa [#allocation3], 1 }
 0x1da   :  { %372 = vsyncpa [#allocation3 + $0x1], 1 }

// kernel: moco_vit_forward.5
= control target key start
LH: loop header
LB: loop body
LE: loop exit
PB: predicated region body
PF: predicated region fallthrough
CT: control target
= control target key end

     0   :  { %s1353_s0 = inlined_call_operand.vmem [shape: f32[1,128], index: 0, kind: input, shape index: {}, may-alias: {0,16}]   ;;  %s1354_s8 = inlined_call_operand.vmem [shape: f32[1,128], index: 8, kind: input, shape index: {}]   ;;  %s1355_s1 = inlined_call_operand.vmem [shape: f32[1,128], index: 1, kind: input, shape index: {}, may-alias: {1,17}]   ;;  %s1356_s9 = inlined_call_operand.vmem [shape: f32[1,128], index: 9, kind: input, shape index: {}]   ;;  %s1357_s2 = inlined_call_operand.vmem [shape: f32[1,128], index: 2, kind: input, shape index: {}, may-alias: {2,18}]   ;;  %s1358_s10 = inlined_call_operand.vmem [shape: f32[1,128], index: 10, kind: input, shape index: {}]   ;;  %s1359_s3 = inlined_call_operand.vmem [shape: f32[1,128], index: 3, kind: input, shape index: {}, may-alias: {3,19}]   ;;  %s1360_s11 = inlined_call_operand.vmem [shape: f32[1,128], index: 11, kind: input, shape index: {}]   ;;  %s1361_s4 = inlined_call_operand.vmem [shape: f32[128,128], index: 4, kind: input, shape index: {}, may-alias: {4,20}]   ;;  %s1362_s16 = inlined_call_operand.vmem [shape: f32[1,128], index: 16, kind: output, shape index: {0}, may-alias: {0,16}]   ;;  %s1363_s12 = inlined_call_operand.vmem [shape: f32[128,128], index: 12, kind: input, shape index: {}]   ;;  %s1364_s17 = inlined_call_operand.vmem [shape: f32[1,128], index: 17, kind: output, shape index: {1}, may-alias: {1,17}]   ;;  %s1365_s18 = inlined_call_operand.vmem [shape: f32[1,128], index: 18, kind: output, shape index: {2}, may-alias: {2,18}]   ;;  %s1366_s19 = inlined_call_operand.vmem [shape: f32[1,128], index: 19, kind: output, shape index: {3}, may-alias: {3,19}]   ;;  %s1367_s20 = inlined_call_operand.vmem [shape: f32[128,128], index: 20, kind: output, shape index: {4}, may-alias: {4,20}]   ;;  %s1368_s5 = inlined_call_operand.vmem [shape: f32[128,128], index: 5, kind: input, shape index: {}, may-alias: {5,21}]   ;;  %s1369_s13 = inlined_call_operand.vmem [shape: f32[128,128], index: 13, kind: input, shape index: {}]   ;;  %s1370_s21 = inlined_call_operand.vmem [shape: f32[128,128], index: 21, kind: output, shape index: {5}, may-alias: {5,21}]   ;;  %s1371_s6 = inlined_call_operand.vmem [shape: f32[128,128], index: 6, kind: input, shape index: {}, may-alias: {6,22}]   ;;  %s1372_s14 = inlined_call_operand.vmem [shape: f32[128,128], index: 14, kind: input, shape index: {}]   ;;  %s1373_s22 = inlined_call_operand.vmem [shape: f32[128,128], index: 22, kind: output, shape index: {6}, may-alias: {6,22}]   ;;  %s1374_s7 = inlined_call_operand.vmem [shape: f32[192,128], index: 7, kind: input, shape index: {}, may-alias: {7,23}]   ;;  %s1375_s15 = inlined_call_operand.vmem [shape: f32[192,128], index: 15, kind: input, shape index: {}]   ;;  %s1376_s23 = inlined_call_operand.vmem [shape: f32[192,128], index: 23, kind: output, shape index: {7}, may-alias: {7,23}]  }
   0x1   :  { %1378 = sst [smem:[#allocation2_spill]] %s1353_s0  ;;  %v85_v15 = vld [vmem:[%s1361_s4] sm:$0xff]  ;;  %v86_v21 = vld [vmem:[%s1361_s4 + $0x8] sm:$0xff]  ;;  %v87_v27 = vld [vmem:[%s1361_s4 + $0x10] sm:$0xff] }
   0x2   :  { %1379 = sst [smem:[#allocation3_spill]] %s1354_s8  ;;  %v117_v20 = vld [vmem:[%s1363_s12] sm:$0xff]  ;;  %v101_v22 = vmul.f32 0.999, %v85_v15  ;;  %v102_v24 = vmul.f32 0.999, %v86_v21 }
   0x3   :  { %1380 = sst [smem:[#allocation4_spill]] %s1355_s1  ;;  %v133_v23 = vmul.f32 0.001, %v117_v20  ;;  %v118_v26 = vld [vmem:[%s1363_s12 + $0x8] sm:$0xff]  ;;  %v119_v28 = vld [vmem:[%s1363_s12 + $0x10] sm:$0xff]  ;;  %v88_v33 = vld [vmem:[%s1361_s4 + $0x18] sm:$0xff] }
   0x4   :  { %1381 = sst [smem:[#allocation5_spill]] %s1356_s9  ;;  %v134_v30 = vmul.f32 0.001, %v118_v26  ;;  %v103_v31 = vmul.f32 0.999, %v87_v27  ;;  %v120_v34 = vld [vmem:[%s1363_s12 + $0x18] sm:$0xff] }
   0x5   :  { %1382 = sst [smem:[#allocation6_spill]] %s1357_s2  ;;  %v149_v29 = vadd.f32 %v133_v23, %v101_v22  ;;  %v135_v32 = vmul.f32 0.001, %v119_v28  ;;  %v89_v35 = vld [vmem:[%s1361_s4 + $0x20] sm:$0xff]  ;;  %v104_v38 = vmul.f32 0.999, %v88_v33 }
   0x6   :  { %1383 = sst [smem:[#allocation7_spill]] %s1358_s10  ;;  %v150_v36 = vadd.f32 %v134_v30, %v102_v24  ;;  %v136_v39 = vmul.f32 0.001, %v120_v34  ;;  %v121_v40 = vld [vmem:[%s1363_s12 + $0x20] sm:$0xff]  ;;  %v105_v42 = vmul.f32 0.999, %v89_v35 }
   0x7   :  { %1384 = sst [smem:[#allocation8_spill]] %s1359_s3  ;;  %165 = vst [vmem:[%s1367_s20] sm:$0xff] %v149_v29  ;;  %v151_v37 = vadd.f32 %v135_v32, %v103_v31  ;;  %v137_v43 = vmul.f32 0.001, %v121_v40  ;;  %v122_v46 = vld [vmem:[%s1363_s12 + $0x28] sm:$0xff]  ;;  %v123_v48 = vld [vmem:[%s1363_s12 + $0x30] sm:$0xff]  ;;  %v124_v54 = vld [vmem:[%s1363_s12 + $0x38] sm:$0xff] }
   0x8   :  { %1385 = sst [smem:[#allocation9_spill]] %s1360_s11  ;;  %v152_v45 = vadd.f32 %v136_v39, %v104_v38  ;;  %v138_v50 = vmul.f32 0.001, %v122_v46  ;;  %v139_v52 = vmul.f32 0.001, %v123_v48  ;;  %v125_v60 = vld [vmem:[%s1363_s12 + $0x40] sm:$0xff] }
   0x9   :  { %1386 = sst [smem:[#allocation10_spill]] %s1371_s6  ;;  %v153_v49 = vadd.f32 %v137_v43, %v105_v42  ;;  %v140_v59 = vmul.f32 0.001, %v124_v54  ;;  %v141_v63 = vmul.f32 0.001, %v125_v60  ;;  %v130_v22 = vld [vmem:[%s1363_s12 + $0x68] sm:$0xff] }
   0xa   :  { %s1387_s24 = sld [smem:[#allocation2_spill]]  ;;  %v131_v24 = vld [vmem:[%s1363_s12 + $0x70] sm:$0xff]  ;;  %v146_v26 = vmul.f32 0.001, %v130_v22  ;;  %v132_v30 = vld [vmem:[%s1363_s12 + $0x78] sm:$0xff]  ;;  %v181_v31 = vld [vmem:[%s1368_s5] sm:$0xff] }
   0xb   :  { %s1388_s6 = sld [smem:[#allocation3_spill]]  ;;  %v147_v28 = vmul.f32 0.001, %v131_v24  ;;  %v148_v35 = vmul.f32 0.001, %v132_v30  ;;  %v214_v42 = vld [vmem:[%s1369_s13 + $0x8] sm:$0xff] }
   0xc   :  { %s1389_s1 = sld [smem:[#allocation4_spill]]  ;;  %v197_v38 = vmul.f32 0.999, %v181_v31  ;;  %v183_v43 = vld [vmem:[%s1368_s5 + $0x10] sm:$0xff]  ;;  %v230_v46 = vmul.f32 0.001, %v214_v42 }
   0xd   :  { %s1390_s11 = sld [smem:[#allocation5_spill]] }
   0xe   :  { %s1391_s9 = sld [smem:[#allocation6_spill]]  ;;  %v90_v41 = vld [vmem:[%s1361_s4 + $0x28] sm:$0xff] }
   0xf   :  { %s1392_s30 = sld [smem:[#allocation7_spill]]  ;;  %v106_v44 = vmul.f32 0.999, %v90_v41  ;;  %166 = vst [vmem:[%s1367_s20 + $0x8] sm:$0xff] %v150_v36  ;;  %167 = vst [vmem:[%s1367_s20 + $0x10] sm:$0xff] %v151_v37  ;;  %v213_v36 = vld [vmem:[%s1369_s13] sm:$0xff] }
  0x10   :  { %v61_v0 = vld [vmem:[%s1387_s24] sm:$0x1]  ;;  %s1393_s25 = sld [smem:[#allocation8_spill]]  ;;  %v182_v37 = vld [vmem:[%s1368_s5 + $0x8] sm:$0xff]  ;;  %v229_v39 = vmul.f32 0.001, %v213_v36 }
  0x11   :  { %v63_v1 = vld [vmem:[%s1388_s6] sm:$0x1]  ;;  %v62_v3 = vmul.f32 0.999, %v61_v0  ;;  %s1394_s26 = sld [smem:[#allocation9_spill]]  ;;  %v154_v56 = vadd.f32 %v138_v50, %v106_v44  ;;  %v215_v44 = vld [vmem:[%s1369_s13 + $0x10] sm:$0xff] }
  0x12   :  { %v67_v2 = vld [vmem:[%s1389_s1] sm:$0x1]  ;;  %v64_v4 = vmul.f32 0.001, %v63_v1  ;;  %v198_v40 = vmul.f32 0.999, %v182_v37 }
  0x13   :  { %v68_v5 = vmul.f32 0.999, %v67_v2  ;;  %v69_v6 = vld [vmem:[%s1390_s11] sm:$0x1]  ;;  %v126_v2 = vld [vmem:[%s1363_s12 + $0x48] sm:$0xff]  ;;  %v216_v50 = vld [vmem:[%s1369_s13 + $0x18] sm:$0xff] }
  0x14   :  { %v73_v7 = vld [vmem:[%s1391_s9] sm:$0x1]  ;;  %v65_v9 = vadd.f32 %v64_v4, %v62_v3  ;;  %v70_v10 = vmul.f32 0.001, %v69_v6  ;;  %v127_v4 = vld [vmem:[%s1363_s12 + $0x50] sm:$0xff] }
  0x15   :  { %v75_v8 = vld [vmem:[%s1392_s30] sm:$0x1]  ;;  %v74_v11 = vmul.f32 0.999, %v73_v7  ;;  %v142_v6 = vmul.f32 0.001, %v126_v2 }
  0x16   :  { %v76_v12 = vmul.f32 0.001, %v75_v8  ;;  %v79_v13 = vld [vmem:[%s1393_s25] sm:$0x1]  ;;  %66 = vst [vmem:[%s1362_s16] sm:$0x1] %v65_v9  ;;  %v71_v16 = vadd.f32 %v70_v10, %v68_v5  ;;  %v91_v47 = vld [vmem:[%s1361_s4 + $0x30] sm:$0xff] }
  0x17   :  { %v81_v14 = vld [vmem:[%s1394_s26] sm:$0x1]  ;;  %v80_v18 = vmul.f32 0.999, %v79_v13  ;;  %v107_v51 = vmul.f32 0.999, %v91_v47 }
  0x18   :  { %v77_v17 = vadd.f32 %v76_v12, %v74_v11  ;;  %v82_v19 = vmul.f32 0.001, %v81_v14  ;;  %72 = vst [vmem:[%s1364_s17] sm:$0x1] %v71_v16  ;;  %168 = vst [vmem:[%s1367_s20 + $0x18] sm:$0xff] %v152_v45  ;;  %v143_v8 = vmul.f32 0.001, %v127_v4  ;;  %v245_v45 = vadd.f32 %v229_v39, %v197_v38 }
  0x19   :  { %v155_v57 = vadd.f32 %v139_v52, %v107_v51  ;;  %v128_v10 = vld [vmem:[%s1363_s12 + $0x58] sm:$0xff]  ;;  %v129_v16 = vld [vmem:[%s1363_s12 + $0x60] sm:$0xff]  ;;  %v199_v47 = vmul.f32 0.999, %v183_v43  ;;  %v231_v48 = vmul.f32 0.001, %v215_v44  ;;  %v246_v52 = vadd.f32 %v230_v46, %v198_v40 }
  0x1a   :  { %78 = vst [vmem:[%s1365_s18] sm:$0x1] %v77_v17  ;;  %v83_v25 = vadd.f32 %v82_v19, %v80_v18  ;;  %v144_v15 = vmul.f32 0.001, %v128_v10  ;;  %v145_v19 = vmul.f32 0.001, %v129_v16  ;;  %v185_v51 = vld [vmem:[%s1368_s5 + $0x20] sm:$0xff] }
  0x1b   :  { %v226_v38 = vld [vmem:[%s1369_s13 + $0x68] sm:$0xff]  ;;  %v227_v40 = vld [vmem:[%s1369_s13 + $0x70] sm:$0xff]  ;;  %v228_v46 = vld [vmem:[%s1369_s13 + $0x78] sm:$0xff] }
  0x1c   :  { %84 = vst [vmem:[%s1366_s19] sm:$0x1] %v83_v25  ;;  %v242_v42 = vmul.f32 0.001, %v226_v38  ;;  %v243_v44 = vmul.f32 0.001, %v227_v40 }
  0x1f   :  { %v92_v53 = vld [vmem:[%s1361_s4 + $0x38] sm:$0xff]  ;;  %v93_v55 = vld [vmem:[%s1361_s4 + $0x40] sm:$0xff] }
  0x20   :  { %169 = vst [vmem:[%s1367_s20 + $0x20] sm:$0xff] %v153_v49  ;;  %v108_v58 = vmul.f32 0.999, %v92_v53  ;;  %v109_v62 = vmul.f32 0.999, %v93_v55  ;;  %v184_v49 = vld [vmem:[%s1368_s5 + $0x18] sm:$0xff]  ;;  %v247_v53 = vadd.f32 %v231_v48, %v199_v47 }
  0x21   :  { %261 = vst [vmem:[%s1370_s21] sm:$0xff] %v245_v45  ;;  %v200_v54 = vmul.f32 0.999, %v184_v49  ;;  %v232_v55 = vmul.f32 0.001, %v216_v50 }
  0x22   :  { %v156_v1 = vadd.f32 %v140_v59, %v108_v58  ;;  %v157_v5 = vadd.f32 %v141_v63, %v109_v62  ;;  %v201_v58 = vmul.f32 0.999, %v185_v51  ;;  %v218_v62 = vld [vmem:[%s1369_s13 + $0x28] sm:$0xff]  ;;  %v244_v51 = vmul.f32 0.001, %v228_v46 }
  0x23   :  { %v234_v2 = vmul.f32 0.001, %v218_v62 }
  0x27   :  { %v94_v61 = vld [vmem:[%s1361_s4 + $0x48] sm:$0xff] }
  0x28   :  { %v110_v0 = vmul.f32 0.999, %v94_v61  ;;  %170 = vst [vmem:[%s1367_s20 + $0x28] sm:$0xff] %v154_v56  ;;  %171 = vst [vmem:[%s1367_s20 + $0x30] sm:$0xff] %v155_v57  ;;  %v217_v56 = vld [vmem:[%s1369_s13 + $0x20] sm:$0xff]  ;;  %v186_v57 = vld [vmem:[%s1368_s5 + $0x28] sm:$0xff]  ;;  %v248_v61 = vadd.f32 %v232_v55, %v200_v54 }
  0x29   :  { %v233_v59 = vmul.f32 0.001, %v217_v56  ;;  %v202_v60 = vmul.f32 0.999, %v186_v57  ;;  %262 = vst [vmem:[%s1370_s21 + $0x8] sm:$0xff] %v246_v52  ;;  %263 = vst [vmem:[%s1370_s21 + $0x10] sm:$0xff] %v247_v53 }
  0x2a   :  { %v158_v12 = vadd.f32 %v142_v6, %v110_v0  ;;  %v219_v0 = vld [vmem:[%s1369_s13 + $0x30] sm:$0xff]  ;;  %v220_v6 = vld [vmem:[%s1369_s13 + $0x38] sm:$0xff]  ;;  %v309_v52 = vld [vmem:[%s1372_s14] sm:$0xff] }
  0x2b   :  { %v235_v4 = vmul.f32 0.001, %v219_v0  ;;  %v325_v55 = vmul.f32 0.001, %v309_v52 }
  0x2f   :  { %v95_v3 = vld [vmem:[%s1361_s4 + $0x50] sm:$0xff] }
  0x30   :  { %v111_v7 = vmul.f32 0.999, %v95_v3  ;;  %172 = vst [vmem:[%s1367_s20 + $0x38] sm:$0xff] %v156_v1  ;;  %v187_v63 = vld [vmem:[%s1368_s5 + $0x30] sm:$0xff]  ;;  %v249_v1 = vadd.f32 %v233_v59, %v201_v58  ;;  %v310_v58 = vld [vmem:[%s1372_s14 + $0x8] sm:$0xff] }
  0x31   :  { %v203_v3 = vmul.f32 0.999, %v187_v63  ;;  %264 = vst [vmem:[%s1370_s21 + $0x18] sm:$0xff] %v248_v61  ;;  %v326_v62 = vmul.f32 0.001, %v310_v58 }
  0x32   :  { %v159_v13 = vadd.f32 %v143_v8, %v111_v7  ;;  %v250_v8 = vadd.f32 %v234_v2, %v202_v60  ;;  %v311_v60 = vld [vmem:[%s1372_s14 + $0x10] sm:$0xff]  ;;  %v312_v2 = vld [vmem:[%s1372_s14 + $0x18] sm:$0xff] }
  0x33   :  { %v327_v0 = vmul.f32 0.001, %v311_v60 }
  0x37   :  { %v96_v9 = vld [vmem:[%s1361_s4 + $0x58] sm:$0xff]  ;;  %v97_v11 = vld [vmem:[%s1361_s4 + $0x60] sm:$0xff] }
  0x38   :  { %173 = vst [vmem:[%s1367_s20 + $0x40] sm:$0xff] %v157_v5  ;;  %v112_v14 = vmul.f32 0.999, %v96_v9  ;;  %v113_v18 = vmul.f32 0.999, %v97_v11  ;;  %v188_v5 = vld [vmem:[%s1368_s5 + $0x38] sm:$0xff]  ;;  %v251_v9 = vadd.f32 %v235_v4, %v203_v3 }
  0x39   :  { %v189_v7 = vld [vmem:[%s1368_s5 + $0x40] sm:$0xff]  ;;  %v204_v10 = vmul.f32 0.999, %v188_v5  ;;  %v236_v11 = vmul.f32 0.001, %v220_v6 }
  0x3a   :  { %v160_v21 = vadd.f32 %v144_v15, %v112_v14  ;;  %v161_v25 = vadd.f32 %v145_v19, %v113_v18  ;;  %265 = vst [vmem:[%s1370_s21 + $0x20] sm:$0xff] %v249_v1  ;;  %v205_v14 = vmul.f32 0.999, %v189_v7  ;;  %v222_v18 = vld [vmem:[%s1369_s13 + $0x48] sm:$0xff]  ;;  %v328_v7 = vmul.f32 0.001, %v312_v2 }
  0x3b   :  { %v238_v22 = vmul.f32 0.001, %v222_v18 }
  0x3f   :  { %v98_v17 = vld [vmem:[%s1361_s4 + $0x68] sm:$0xff] }
  0x40   :  { %v114_v20 = vmul.f32 0.999, %v98_v17  ;;  %174 = vst [vmem:[%s1367_s20 + $0x48] sm:$0xff] %v158_v12  ;;  %175 = vst [vmem:[%s1367_s20 + $0x50] sm:$0xff] %v159_v13  ;;  %v221_v12 = vld [vmem:[%s1369_s13 + $0x40] sm:$0xff]  ;;  %v252_v17 = vadd.f32 %v236_v11, %v204_v10 }
  0x41   :  { %v190_v13 = vld [vmem:[%s1368_s5 + $0x48] sm:$0xff]  ;;  %v237_v15 = vmul.f32 0.001, %v221_v12 }
  0x42   :  { %v162_v32 = vadd.f32 %v146_v26, %v114_v20  ;;  %v206_v16 = vmul.f32 0.999, %v190_v13  ;;  %266 = vst [vmem:[%s1370_s21 + $0x28] sm:$0xff] %v250_v8  ;;  %267 = vst [vmem:[%s1370_s21 + $0x30] sm:$0xff] %v251_v9  ;;  %v223_v20 = vld [vmem:[%s1369_s13 + $0x50] sm:$0xff]  ;;  %v224_v26 = vld [vmem:[%s1369_s13 + $0x58] sm:$0xff] }
  0x43   :  { %v239_v24 = vmul.f32 0.001, %v223_v20  ;;  %v240_v31 = vmul.f32 0.001, %v224_v26  ;;  %v313_v8 = vld [vmem:[%s1372_s14 + $0x20] sm:$0xff] }
  0x44   :  { %v329_v11 = vmul.f32 0.001, %v313_v8 }
  0x47   :  { %v99_v23 = vld [vmem:[%s1361_s4 + $0x70] sm:$0xff] }
  0x48   :  { %v115_v27 = vmul.f32 0.999, %v99_v23  ;;  %176 = vst [vmem:[%s1367_s20 + $0x58] sm:$0xff] %v160_v21  ;;  %v253_v21 = vadd.f32 %v237_v15, %v205_v14  ;;  %v314_v14 = vld [vmem:[%s1372_s14 + $0x28] sm:$0xff] }
  0x49   :  { %v191_v19 = vld [vmem:[%s1368_s5 + $0x50] sm:$0xff]  ;;  %v330_v18 = vmul.f32 0.001, %v314_v14 }
  0x4a   :  { %v163_v33 = vadd.f32 %v147_v28, %v115_v27  ;;  %v207_v23 = vmul.f32 0.999, %v191_v19  ;;  %268 = vst [vmem:[%s1370_s21 + $0x38] sm:$0xff] %v252_v17  ;;  %v254_v28 = vadd.f32 %v238_v22, %v206_v16  ;;  %v315_v16 = vld [vmem:[%s1372_s14 + $0x30] sm:$0xff]  ;;  %v316_v22 = vld [vmem:[%s1372_s14 + $0x38] sm:$0xff] }
  0x4b   :  { %v331_v20 = vmul.f32 0.001, %v315_v16 }
  0x4f   :  { %v100_v29 = vld [vmem:[%s1361_s4 + $0x78] sm:$0xff]  ;;  %s1395_s4 = sld [smem:[#allocation10_spill]] }
  0x50   :  { %177 = vst [vmem:[%s1367_s20 + $0x60] sm:$0xff] %v161_v25  ;;  %v116_v34 = vmul.f32 0.999, %v100_v29  ;;  %178 = vst [vmem:[%s1367_s20 + $0x68] sm:$0xff] %v162_v32  ;;  %v255_v29 = vadd.f32 %v239_v24, %v207_v23  ;;  %v225_v32 = vld [vmem:[%s1369_s13 + $0x60] sm:$0xff] }
  0x51   :  { %179 = vst [vmem:[%s1367_s20 + $0x70] sm:$0xff] %v163_v33  ;;  %v192_v25 = vld [vmem:[%s1368_s5 + $0x58] sm:$0xff]  ;;  %v193_v27 = vld [vmem:[%s1368_s5 + $0x60] sm:$0xff] }
  0x52   :  { %v164_v41 = vadd.f32 %v148_v35, %v116_v34  ;;  %269 = vst [vmem:[%s1370_s21 + $0x40] sm:$0xff] %v253_v21  ;;  %v208_v30 = vmul.f32 0.999, %v192_v25  ;;  %v209_v34 = vmul.f32 0.999, %v193_v27 }
  0x53   :  { %v241_v35 = vmul.f32 0.001, %v225_v32  ;;  %v332_v27 = vmul.f32 0.001, %v316_v22 }
  0x54   :  { %180 = vst [vmem:[%s1367_s20 + $0x78] sm:$0xff] %v164_v41  ;;  %v256_v37 = vadd.f32 %v240_v31, %v208_v30 }
  0x55   :  { %v257_v41 = vadd.f32 %v241_v35, %v209_v34  ;;  %v277_v47 = vld [vmem:[%s1395_s4] sm:$0xff]  ;;  %v278_v53 = vld [vmem:[%s1395_s4 + $0x8] sm:$0xff]  ;;  %v279_v59 = vld [vmem:[%s1395_s4 + $0x10] sm:$0xff] }
  0x56   :  { %v293_v54 = vmul.f32 0.999, %v277_v47  ;;  %v294_v56 = vmul.f32 0.999, %v278_v53  ;;  %v295_v63 = vmul.f32 0.999, %v279_v59 }
  0x57   :  { %v280_v1 = vld [vmem:[%s1395_s4 + $0x18] sm:$0xff]  ;;  %v281_v3 = vld [vmem:[%s1395_s4 + $0x20] sm:$0xff]  ;;  %v318_v34 = vld [vmem:[%s1372_s14 + $0x48] sm:$0xff] }
  0x58   :  { %v341_v61 = vadd.f32 %v325_v55, %v293_v54  ;;  %v342_v4 = vadd.f32 %v326_v62, %v294_v56  ;;  %v343_v5 = vadd.f32 %v327_v0, %v295_v63  ;;  %v296_v6 = vmul.f32 0.999, %v280_v1  ;;  %v322_v54 = vld [vmem:[%s1372_s14 + $0x68] sm:$0xff]  ;;  %v323_v56 = vld [vmem:[%s1372_s14 + $0x70] sm:$0xff]  ;;  %v324_v62 = vld [vmem:[%s1372_s14 + $0x78] sm:$0xff] }
  0x59   :  { %v194_v33 = vld [vmem:[%s1368_s5 + $0x68] sm:$0xff]  ;;  %v297_v10 = vmul.f32 0.999, %v281_v3  ;;  %v334_v38 = vmul.f32 0.001, %v318_v34  ;;  %v373_v63 = vld [vmem:[%s1374_s7] sm:$0xff] }
  0x5a   :  { %v210_v36 = vmul.f32 0.999, %v194_v33  ;;  %270 = vst [vmem:[%s1370_s21 + $0x48] sm:$0xff] %v254_v28  ;;  %271 = vst [vmem:[%s1370_s21 + $0x50] sm:$0xff] %v255_v29  ;;  %v344_v13 = vadd.f32 %v328_v7, %v296_v6  ;;  %v317_v28 = vld [vmem:[%s1372_s14 + $0x40] sm:$0xff] }
  0x5b   :  { %357 = vst [vmem:[%s1373_s22] sm:$0xff] %v341_v61  ;;  %v345_v17 = vadd.f32 %v329_v11, %v297_v10  ;;  %v333_v31 = vmul.f32 0.001, %v317_v28  ;;  %v338_v58 = vmul.f32 0.001, %v322_v54  ;;  %v339_v60 = vmul.f32 0.001, %v323_v56 }
  0x5c   :  { %v258_v48 = vadd.f32 %v242_v42, %v210_v36  ;;  %v319_v36 = vld [vmem:[%s1372_s14 + $0x50] sm:$0xff]  ;;  %v320_v42 = vld [vmem:[%s1372_s14 + $0x58] sm:$0xff]  ;;  %v340_v3 = vmul.f32 0.001, %v324_v62  ;;  %v397_v6 = vmul.f32 0.999, %v373_v63 }
  0x5d   :  { %v335_v40 = vmul.f32 0.001, %v319_v36  ;;  %v336_v47 = vmul.f32 0.001, %v320_v42  ;;  %v422_v10 = vld [vmem:[%s1375_s15 + $0x8] sm:$0xff]  ;;  %v375_v11 = vld [vmem:[%s1374_s7 + $0x10] sm:$0xff] }
  0x5e   :  { %v446_v14 = vmul.f32 0.001, %v422_v10 }
  0x61   :  { %v195_v39 = vld [vmem:[%s1368_s5 + $0x70] sm:$0xff] }
  0x62   :  { %v211_v43 = vmul.f32 0.999, %v195_v39  ;;  %272 = vst [vmem:[%s1370_s21 + $0x58] sm:$0xff] %v256_v37  ;;  %v282_v9 = vld [vmem:[%s1395_s4 + $0x28] sm:$0xff] }
  0x63   :  { %v298_v12 = vmul.f32 0.999, %v282_v9  ;;  %358 = vst [vmem:[%s1373_s22 + $0x8] sm:$0xff] %v342_v4  ;;  %359 = vst [vmem:[%s1373_s22 + $0x10] sm:$0xff] %v343_v5  ;;  %v421_v4 = vld [vmem:[%s1375_s15] sm:$0xff]  ;;  %v374_v5 = vld [vmem:[%s1374_s7 + $0x8] sm:$0xff] }
  0x64   :  { %v259_v49 = vadd.f32 %v243_v44, %v211_v43  ;;  %v445_v7 = vmul.f32 0.001, %v421_v4  ;;  %v398_v8 = vmul.f32 0.999, %v374_v5 }
  0x65   :  { %v346_v24 = vadd.f32 %v330_v18, %v298_v12  ;;  %v423_v12 = vld [vmem:[%s1375_s15 + $0x10] sm:$0xff]  ;;  %v424_v18 = vld [vmem:[%s1375_s15 + $0x18] sm:$0xff] }
  0x66   :  { %v447_v16 = vmul.f32 0.001, %v423_v12 }
  0x69   :  { %v196_v45 = vld [vmem:[%s1368_s5 + $0x78] sm:$0xff] }
  0x6a   :  { %273 = vst [vmem:[%s1370_s21 + $0x60] sm:$0xff] %v257_v41  ;;  %v212_v50 = vmul.f32 0.999, %v196_v45  ;;  %274 = vst [vmem:[%s1370_s21 + $0x68] sm:$0xff] %v258_v48  ;;  %v283_v15 = vld [vmem:[%s1395_s4 + $0x30] sm:$0xff]  ;;  %v321_v48 = vld [vmem:[%s1372_s14 + $0x60] sm:$0xff] }
  0x6b   :  { %275 = vst [vmem:[%s1370_s21 + $0x70] sm:$0xff] %v259_v49  ;;  %v299_v19 = vmul.f32 0.999, %v283_v15  ;;  %360 = vst [vmem:[%s1373_s22 + $0x18] sm:$0xff] %v344_v13  ;;  %v469_v13 = vadd.f32 %v445_v7, %v397_v6  ;;  %v399_v15 = vmul.f32 0.999, %v375_v11 }
  0x6c   :  { %v260_v57 = vadd.f32 %v244_v51, %v212_v50  ;;  %v337_v51 = vmul.f32 0.001, %v321_v48  ;;  %v434_v6 = vld [vmem:[%s1375_s15 + $0x68] sm:$0xff] }
  0x6d   :  { %v347_v25 = vadd.f32 %v331_v20, %v299_v19  ;;  %v377_v19 = vld [vmem:[%s1374_s7 + $0x20] sm:$0xff]  ;;  %v470_v20 = vadd.f32 %v446_v14, %v398_v8  ;;  %v435_v8 = vld [vmem:[%s1375_s15 + $0x70] sm:$0xff]  ;;  %v458_v10 = vmul.f32 0.001, %v434_v6  ;;  %v436_v14 = vld [vmem:[%s1375_s15 + $0x78] sm:$0xff] }
  0x6e   :  { %276 = vst [vmem:[%s1370_s21 + $0x78] sm:$0xff] %v260_v57  ;;  %v459_v12 = vmul.f32 0.001, %v435_v8 }
  0x72   :  { %v284_v21 = vld [vmem:[%s1395_s4 + $0x38] sm:$0xff]  ;;  %v285_v23 = vld [vmem:[%s1395_s4 + $0x40] sm:$0xff] }
  0x73   :  { %361 = vst [vmem:[%s1373_s22 + $0x20] sm:$0xff] %v345_v17  ;;  %v300_v26 = vmul.f32 0.999, %v284_v21  ;;  %v301_v30 = vmul.f32 0.999, %v285_v23  ;;  %v376_v17 = vld [vmem:[%s1374_s7 + $0x18] sm:$0xff]  ;;  %v471_v21 = vadd.f32 %v447_v16, %v399_v15 }
  0x74   :  { %493 = vst [vmem:[%s1376_s23] sm:$0xff] %v469_v13  ;;  %v400_v22 = vmul.f32 0.999, %v376_v17  ;;  %v448_v23 = vmul.f32 0.001, %v424_v18 }
  0x75   :  { %v348_v33 = vadd.f32 %v332_v27, %v300_v26  ;;  %v349_v37 = vadd.f32 %v333_v31, %v301_v30  ;;  %v401_v26 = vmul.f32 0.999, %v377_v19  ;;  %v426_v30 = vld [vmem:[%s1375_s15 + $0x28] sm:$0xff]  ;;  %v460_v19 = vmul.f32 0.001, %v436_v14 }
  0x76   :  { %v450_v34 = vmul.f32 0.001, %v426_v30 }
  0x7a   :  { %v286_v29 = vld [vmem:[%s1395_s4 + $0x48] sm:$0xff] }
  0x7b   :  { %v302_v32 = vmul.f32 0.999, %v286_v29  ;;  %362 = vst [vmem:[%s1373_s22 + $0x28] sm:$0xff] %v346_v24  ;;  %363 = vst [vmem:[%s1373_s22 + $0x30] sm:$0xff] %v347_v25  ;;  %v425_v24 = vld [vmem:[%s1375_s15 + $0x20] sm:$0xff]  ;;  %v378_v25 = vld [vmem:[%s1374_s7 + $0x28] sm:$0xff]  ;;  %v472_v29 = vadd.f32 %v448_v23, %v400_v22 }
  0x7c   :  { %v449_v27 = vmul.f32 0.001, %v425_v24  ;;  %v402_v28 = vmul.f32 0.999, %v378_v25  ;;  %494 = vst [vmem:[%s1376_s23 + $0x8] sm:$0xff] %v470_v20  ;;  %495 = vst [vmem:[%s1376_s23 + $0x10] sm:$0xff] %v471_v21 }
  0x7d   :  { %v350_v44 = vadd.f32 %v334_v38, %v302_v32  ;;  %v427_v32 = vld [vmem:[%s1375_s15 + $0x30] sm:$0xff]  ;;  %v428_v38 = vld [vmem:[%s1375_s15 + $0x38] sm:$0xff]  ;;  %v437_v20 = vld [vmem:[%s1375_s15 + $0x80] sm:$0xff] }
  0x7e   :  { %v451_v36 = vmul.f32 0.001, %v427_v32  ;;  %v461_v23 = vmul.f32 0.001, %v437_v20 }
  0x82   :  { %v287_v35 = vld [vmem:[%s1395_s4 + $0x50] sm:$0xff] }
  0x83   :  { %v303_v39 = vmul.f32 0.999, %v287_v35  ;;  %364 = vst [vmem:[%s1373_s22 + $0x38] sm:$0xff] %v348_v33  ;;  %v379_v31 = vld [vmem:[%s1374_s7 + $0x30] sm:$0xff]  ;;  %v473_v33 = vadd.f32 %v449_v27, %v401_v26  ;;  %v438_v26 = vld [vmem:[%s1375_s15 + $0x88] sm:$0xff] }
  0x84   :  { %v403_v35 = vmul.f32 0.999, %v379_v31  ;;  %496 = vst [vmem:[%s1376_s23 + $0x18] sm:$0xff] %v472_v29  ;;  %v462_v30 = vmul.f32 0.001, %v438_v26 }
  0x85   :  { %v351_v45 = vadd.f32 %v335_v40, %v303_v39  ;;  %v474_v40 = vadd.f32 %v450_v34, %v402_v28  ;;  %v439_v28 = vld [vmem:[%s1375_s15 + $0x90] sm:$0xff]  ;;  %v440_v34 = vld [vmem:[%s1375_s15 + $0x98] sm:$0xff] }
  0x86   :  { %v463_v32 = vmul.f32 0.001, %v439_v28 }
  0x8a   :  { %v288_v41 = vld [vmem:[%s1395_s4 + $0x58] sm:$0xff]  ;;  %v289_v43 = vld [vmem:[%s1395_s4 + $0x60] sm:$0xff] }
  0x8b   :  { %365 = vst [vmem:[%s1373_s22 + $0x40] sm:$0xff] %v349_v37  ;;  %v304_v46 = vmul.f32 0.999, %v288_v41  ;;  %v305_v50 = vmul.f32 0.999, %v289_v43  ;;  %v380_v37 = vld [vmem:[%s1374_s7 + $0x38] sm:$0xff]  ;;  %v475_v41 = vadd.f32 %v451_v36, %v403_v35 }
  0x8c   :  { %v381_v39 = vld [vmem:[%s1374_s7 + $0x40] sm:$0xff]  ;;  %v404_v42 = vmul.f32 0.999, %v380_v37  ;;  %v452_v43 = vmul.f32 0.001, %v428_v38 }
  0x8d   :  { %v352_v53 = vadd.f32 %v336_v47, %v304_v46  ;;  %v353_v57 = vadd.f32 %v337_v51, %v305_v50  ;;  %497 = vst [vmem:[%s1376_s23 + $0x20] sm:$0xff] %v473_v33  ;;  %v405_v46 = vmul.f32 0.999, %v381_v39  ;;  %v430_v50 = vld [vmem:[%s1375_s15 + $0x48] sm:$0xff]  ;;  %v464_v39 = vmul.f32 0.001, %v440_v34 }
  0x8e   :  { %v454_v54 = vmul.f32 0.001, %v430_v50 }
  0x92   :  { %v290_v49 = vld [vmem:[%s1395_s4 + $0x68] sm:$0xff] }
  0x93   :  { %v306_v52 = vmul.f32 0.999, %v290_v49  ;;  %366 = vst [vmem:[%s1373_s22 + $0x48] sm:$0xff] %v350_v44  ;;  %367 = vst [vmem:[%s1373_s22 + $0x50] sm:$0xff] %v351_v45  ;;  %v429_v44 = vld [vmem:[%s1375_s15 + $0x40] sm:$0xff]  ;;  %v476_v49 = vadd.f32 %v452_v43, %v404_v42 }
  0x94   :  { %v382_v45 = vld [vmem:[%s1374_s7 + $0x48] sm:$0xff]  ;;  %v453_v47 = vmul.f32 0.001, %v429_v44 }
  0x95   :  { %v354_v0 = vadd.f32 %v338_v58, %v306_v52  ;;  %v406_v48 = vmul.f32 0.999, %v382_v45  ;;  %498 = vst [vmem:[%s1376_s23 + $0x28] sm:$0xff] %v474_v40  ;;  %499 = vst [vmem:[%s1376_s23 + $0x30] sm:$0xff] %v475_v41  ;;  %v431_v52 = vld [vmem:[%s1375_s15 + $0x50] sm:$0xff]  ;;  %v432_v58 = vld [vmem:[%s1375_s15 + $0x58] sm:$0xff] }
  0x96   :  { %v455_v56 = vmul.f32 0.001, %v431_v52  ;;  %v456_v63 = vmul.f32 0.001, %v432_v58  ;;  %v441_v40 = vld [vmem:[%s1375_s15 + $0xa0] sm:$0xff] }
  0x97   :  { %v465_v43 = vmul.f32 0.001, %v441_v40 }
  0x9a   :  { %v291_v55 = vld [vmem:[%s1395_s4 + $0x70] sm:$0xff] }
  0x9b   :  { %v307_v59 = vmul.f32 0.999, %v291_v55  ;;  %368 = vst [vmem:[%s1373_s22 + $0x58] sm:$0xff] %v352_v53  ;;  %v477_v53 = vadd.f32 %v453_v47, %v405_v46  ;;  %v442_v46 = vld [vmem:[%s1375_s15 + $0xa8] sm:$0xff] }
  0x9c   :  { %v383_v51 = vld [vmem:[%s1374_s7 + $0x50] sm:$0xff]  ;;  %v466_v50 = vmul.f32 0.001, %v442_v46 }
  0x9d   :  { %v355_v1 = vadd.f32 %v339_v60, %v307_v59  ;;  %v407_v55 = vmul.f32 0.999, %v383_v51  ;;  %500 = vst [vmem:[%s1376_s23 + $0x38] sm:$0xff] %v476_v49  ;;  %v478_v60 = vadd.f32 %v454_v54, %v406_v48  ;;  %v443_v48 = vld [vmem:[%s1375_s15 + $0xb0] sm:$0xff]  ;;  %v444_v54 = vld [vmem:[%s1375_s15 + $0xb8] sm:$0xff] }
  0x9e   :  { %v467_v52 = vmul.f32 0.001, %v443_v48  ;;  %v468_v58 = vmul.f32 0.001, %v444_v54 }
  0xa2   :  { %v292_v61 = vld [vmem:[%s1395_s4 + $0x78] sm:$0xff] }
  0xa3   :  { %369 = vst [vmem:[%s1373_s22 + $0x60] sm:$0xff] %v353_v57  ;;  %v308_v2 = vmul.f32 0.999, %v292_v61  ;;  %370 = vst [vmem:[%s1373_s22 + $0x68] sm:$0xff] %v354_v0  ;;  %v479_v61 = vadd.f32 %v455_v56, %v407_v55  ;;  %v433_v0 = vld [vmem:[%s1375_s15 + $0x60] sm:$0xff] }
  0xa4   :  { %371 = vst [vmem:[%s1373_s22 + $0x70] sm:$0xff] %v355_v1  ;;  %v384_v57 = vld [vmem:[%s1374_s7 + $0x58] sm:$0xff]  ;;  %v385_v59 = vld [vmem:[%s1374_s7 + $0x60] sm:$0xff] }
  0xa5   :  { %v356_v9 = vadd.f32 %v340_v3, %v308_v2  ;;  %501 = vst [vmem:[%s1376_s23 + $0x40] sm:$0xff] %v477_v53  ;;  %v408_v62 = vmul.f32 0.999, %v384_v57  ;;  %v409_v2 = vmul.f32 0.999, %v385_v59 }
  0xa6   :  { %v457_v3 = vmul.f32 0.001, %v433_v0 }
  0xa7   :  { %372 = vst [vmem:[%s1373_s22 + $0x78] sm:$0xff] %v356_v9  ;;  %v480_v5 = vadd.f32 %v456_v63, %v408_v62 }
  0xa8   :  { %v481_v9 = vadd.f32 %v457_v3, %v409_v2 }
  0xac   :  { %v386_v1 = vld [vmem:[%s1374_s7 + $0x68] sm:$0xff] }
  0xad   :  { %v410_v4 = vmul.f32 0.999, %v386_v1  ;;  %502 = vst [vmem:[%s1376_s23 + $0x48] sm:$0xff] %v478_v60  ;;  %503 = vst [vmem:[%s1376_s23 + $0x50] sm:$0xff] %v479_v61 }
  0xaf   :  { %v482_v16 = vadd.f32 %v458_v10, %v410_v4 }
  0xb4   :  { %v387_v7 = vld [vmem:[%s1374_s7 + $0x70] sm:$0xff] }
  0xb5   :  { %v411_v11 = vmul.f32 0.999, %v387_v7  ;;  %504 = vst [vmem:[%s1376_s23 + $0x58] sm:$0xff] %v480_v5 }
  0xb7   :  { %v483_v17 = vadd.f32 %v459_v12, %v411_v11 }
  0xbc   :  { %v388_v13 = vld [vmem:[%s1374_s7 + $0x78] sm:$0xff]  ;;  %v389_v15 = vld [vmem:[%s1374_s7 + $0x80] sm:$0xff] }
  0xbd   :  { %505 = vst [vmem:[%s1376_s23 + $0x60] sm:$0xff] %v481_v9  ;;  %v412_v18 = vmul.f32 0.999, %v388_v13  ;;  %v413_v22 = vmul.f32 0.999, %v389_v15 }
  0xbf   :  { %v484_v25 = vadd.f32 %v460_v19, %v412_v18  ;;  %v485_v29 = vadd.f32 %v461_v23, %v413_v22 }
  0xc4   :  { %v390_v21 = vld [vmem:[%s1374_s7 + $0x88] sm:$0xff] }
  0xc5   :  { %v414_v24 = vmul.f32 0.999, %v390_v21  ;;  %506 = vst [vmem:[%s1376_s23 + $0x68] sm:$0xff] %v482_v16  ;;  %507 = vst [vmem:[%s1376_s23 + $0x70] sm:$0xff] %v483_v17 }
  0xc7   :  { %v486_v36 = vadd.f32 %v462_v30, %v414_v24 }
  0xcc   :  { %v391_v27 = vld [vmem:[%s1374_s7 + $0x90] sm:$0xff] }
  0xcd   :  { %v415_v31 = vmul.f32 0.999, %v391_v27  ;;  %508 = vst [vmem:[%s1376_s23 + $0x78] sm:$0xff] %v484_v25 }
  0xcf   :  { %v487_v37 = vadd.f32 %v463_v32, %v415_v31 }
  0xd4   :  { %v392_v33 = vld [vmem:[%s1374_s7 + $0x98] sm:$0xff]  ;;  %v393_v35 = vld [vmem:[%s1374_s7 + $0xa0] sm:$0xff] }
  0xd5   :  { %509 = vst [vmem:[%s1376_s23 + $0x80] sm:$0xff] %v485_v29  ;;  %v416_v38 = vmul.f32 0.999, %v392_v33  ;;  %v417_v42 = vmul.f32 0.999, %v393_v35 }
  0xd7   :  { %v488_v45 = vadd.f32 %v464_v39, %v416_v38  ;;  %v489_v49 = vadd.f32 %v465_v43, %v417_v42 }
  0xdc   :  { %v394_v41 = vld [vmem:[%s1374_s7 + $0xa8] sm:$0xff] }
  0xdd   :  { %v418_v44 = vmul.f32 0.999, %v394_v41  ;;  %510 = vst [vmem:[%s1376_s23 + $0x88] sm:$0xff] %v486_v36  ;;  %511 = vst [vmem:[%s1376_s23 + $0x90] sm:$0xff] %v487_v37 }
  0xdf   :  { %v490_v55 = vadd.f32 %v466_v50, %v418_v44 }
  0xe4   :  { %v395_v47 = vld [vmem:[%s1374_s7 + $0xb0] sm:$0xff] }
  0xe5   :  { %v419_v51 = vmul.f32 0.999, %v395_v47  ;;  %512 = vst [vmem:[%s1376_s23 + $0x98] sm:$0xff] %v488_v45 }
  0xe7   :  { %v491_v56 = vadd.f32 %v467_v52, %v419_v51 }
  0xec   :  { %v396_v53 = vld [vmem:[%s1374_s7 + $0xb8] sm:$0xff] }
  0xed   :  { %513 = vst [vmem:[%s1376_s23 + $0xa0] sm:$0xff] %v489_v49  ;;  %v420_v57 = vmul.f32 0.999, %v396_v53  ;;  %514 = vst [vmem:[%s1376_s23 + $0xa8] sm:$0xff] %v490_v55 }
  0xee   :  { %515 = vst [vmem:[%s1376_s23 + $0xb0] sm:$0xff] %v491_v56 }
  0xef   :  { %v492_v59 = vadd.f32 %v468_v58, %v420_v57 }
  0xf1   :  { %516 = vst [vmem:[%s1376_s23 + $0xb8] sm:$0xff] %v492_v59 }

// kernel: moco_vit_forward.6
= control target key start
LH: loop header
LB: loop body
LE: loop exit
PB: predicated region body
PF: predicated region fallthrough
CT: control target
= control target key end

     0   :  { %s1240_s30 = smov 0   ;;  %s1417_s0 = inlined_call_operand.vmem [shape: bf16[2,8,192], index: 0, kind: input, shape index: {}]   ;;  %s1418_s1 = inlined_call_operand.vmem [shape: bf16[192,128], index: 1, kind: input, shape index: {}]   ;;  %s1419_s2 = inlined_call_operand.vmem [shape: bf16[128,128], index: 2, kind: input, shape index: {}]   ;;  %s1420_s3 = inlined_call_operand.vmem [shape: f32[1,128], index: 3, kind: input, shape index: {}]   ;;  %s1421_s4 = inlined_call_operand.vmem [shape: f32[1,128], index: 4, kind: input, shape index: {}]   ;;  %s1422_s5 = inlined_call_operand.vmem [shape: bf16[128,128], index: 5, kind: input, shape index: {}]   ;;  %s1423_s6 = inlined_call_operand.vmem [shape: f32[1,128], index: 6, kind: input, shape index: {}]   ;;  %s1424_s7 = inlined_call_operand.vmem [shape: f32[1,128], index: 7, kind: input, shape index: {}]   ;;  %s1425_s8 = inlined_call_operand.vmem [shape: bf16[128,128], index: 8, kind: input, shape index: {}]   ;;  %s1426_s9 = inlined_call_operand.vmem [shape: f32[2,2,128], index: 9, kind: output, shape index: {}]  }
   0x1 LB: > { %s983_s10 = sadd.s32 4294967295, %s1185_s30   ;;  %p987_p0 = scmp.ge.s32.totalorder %s1185_s30, 1  ;;  %s1185_s30 = sphi %s1240_s30, %s19_s30  }
   0x2   : > { %p287_p1 = scmp.lt.s32.totalorder %s1185_s30, 3 }
   0x4   : > { %p288_p2 = pnand %p987_p0, %p287_p1 }
   0x5   : > { %p322_p3 = scmp.lt.s32.totalorder (!%p288_p2), %s983_s10, 1 }
   0x6   : > { %291 = sbr.rel (%p288_p2) target bundleno = 984 (0x3d8), region = 56 }
   0xb   : > { %v1135_v0 = vld [vmem:[%s1418_s1 + $0x38] sm:$0xff]   ;;  %v1187_v1 = vmov 0   ;;  %v1136_v2 = vld [vmem:[%s1418_s1 + $0x30] sm:$0xff]   ;;  %s1428_s10 = smov (!%p322_p3, %s983_s10), 1  ;;  %v1188_v3 = vmov 0.0   ;;  %v1137_v4 = vld [vmem:[%s1418_s1 + $0x28] sm:$0xff]  }
   0xc   : > { %491 = vmatprep.subr.bf16.mxu0 %v1187_v1  ;;  %1064 = vmatprep.subr.bf16.mxu1 %v1188_v3  ;;  %s1036_s17 = sshll.u32 %s1428_s10, 3  ;;  %v1138_v5 = vld [vmem:[%s1418_s1 + $0x20] sm:$0xff]   ;;  %v1139_v6 = vld [vmem:[%s1418_s1 + $0x18] sm:$0xff]   ;;  %vm487_vm0 = vcmask 523264   ;;  %v1150_v10 = vld [vmem:[%s1419_s2 + $0x30] sm:$0xff]   ;;  %vm1189_vm1 = vmmov 0  }
   0xd   : > { %492 = vmatpush1.bf16.msra.mxu0 %v1135_v0  ;;  %s326_s20 = scalar_lea.vmem %s1417_s0, %s1036_s17  ;;  %v1149_v9 = vld [vmem:[%s1419_s2 + $0x38] sm:$0xff]   ;;  %v1140_v11 = vld [vmem:[%s1418_s1 + $0x10] sm:$0xff]   ;;  %v1141_v12 = vld [vmem:[%s1418_s1 + $0x8] sm:$0xff]   ;;  %1080 = vmatprep.mubr.msk.bf16.mxu1 %vm1189_vm1, %v1188_v3  ;;  %vm534_vm2 = vcmask 1043456   ;;  %vm558_vm3 = vcmask 1041409   ;;  %vm650_vm4 = vcmask 1041408  }
   0xe   : > { %493 = vmatprep.subr.bf16.mxu0 %v1187_v1  ;;  %v332_v7 = vld [vmem:[%s326_s20] sm:$0xff]  ;;  %1065 = vmatpush3.bf16.msra.mxu1 %v1149_v9  ;;  %v1143_v14 = vld [vmem:[%s1418_s1 + $0x58] sm:$0xff]   ;;  %v1144_v15 = vld [vmem:[%s1418_s1 + $0x50] sm:$0xff]   ;;  %s990_s19 = sshll.u32 %s1428_s10, 1 }
   0xf   : > { %v992_v8 = vcombine.high %v332_v7, %v332_v7  ;;  %1066 = vmatprep.subr.bf16.mxu1 %v1188_v3  ;;  %v1142_v13 = vld [vmem:[%s1418_s1] sm:$0xff]   ;;  %v1145_v16 = vld [vmem:[%s1418_s1 + $0x48] sm:$0xff]   ;;  %v991_v18 = vcombine.low %v332_v7, %v332_v7  ;;  %v1153_v21 = vld [vmem:[%s1419_s2 + $0x18] sm:$0xff]   ;;  %s330_s22 = scalar_lea.vmem %s1426_s9, %s990_s19 }
  0x10   : > { %v1146_v17 = vld [vmem:[%s1418_s1 + $0x40] sm:$0xff]   ;;  %v1151_v19 = vld [vmem:[%s1419_s2 + $0x28] sm:$0xff]   ;;  %v1154_v22 = vld [vmem:[%s1419_s2 + $0x10] sm:$0xff]  }
  0x11   : > { %494 = vmatpush1.bf16.msra.mxu0 %v1136_v2  ;;  %1005 = vmatprep.mubr.msk.bf16.mxu0 %vm487_vm0, %v992_v8  ;;  %v1152_v20 = vld [vmem:[%s1419_s2 + $0x20] sm:$0xff]   ;;  %v1155_v23 = vld [vmem:[%s1419_s2 + $0x8] sm:$0xff]   ;;  %v1157_v52 = vld [vmem:[%s1422_s5 + $0x38] sm:$0xff]  }
  0x12   : > { %495 = vmatprep.subr.bf16.mxu0 %v1187_v1  ;;  %1067 = vmatpush3.bf16.msra.mxu1 %v1150_v10  ;;  %v1156_v24 = vld [vmem:[%s1419_s2] sm:$0xff]   ;;  %v1158_v53 = vld [vmem:[%s1422_s5 + $0x30] sm:$0xff]   ;;  %v1159_v54 = vld [vmem:[%s1422_s5 + $0x28] sm:$0xff]  }
  0x13   : > { %1068 = vmatprep.subr.bf16.mxu1 %v1188_v3  ;;  %v1160_v55 = vld [vmem:[%s1422_s5 + $0x20] sm:$0xff]   ;;  %v1161_v56 = vld [vmem:[%s1422_s5 + $0x18] sm:$0xff]   ;;  %v1162_v57 = vld [vmem:[%s1422_s5 + $0x10] sm:$0xff]  }
  0x14   : > { %v1163_v58 = vld [vmem:[%s1422_s5 + $0x8] sm:$0xff]   ;;  %v1164_v59 = vld [vmem:[%s1422_s5] sm:$0xff]  }
  0x15   : > { %496 = vmatpush1.bf16.msra.mxu0 %v1137_v4 }
  0x16   : > { %497 = vmatprep.subr.bf16.mxu0 %v1187_v1  ;;  %1069 = vmatpush3.bf16.msra.mxu1 %v1151_v19 }
  0x17   : > { %1070 = vmatprep.subr.bf16.mxu1 %v1188_v3 }
  0x19   : > { %498 = vmatpush1.bf16.msra.mxu0 %v1138_v5 }
  0x1a   : > { %499 = vmatprep.subr.bf16.mxu0 %v1187_v1  ;;  %1071 = vmatpush3.bf16.msra.mxu1 %v1152_v20 }
  0x1b   : > { %1072 = vmatprep.subr.bf16.mxu1 %v1188_v3 }
  0x1d   : > { %500 = vmatpush1.bf16.msra.mxu0 %v1139_v6 }
  0x1e   : > { %501 = vmatprep.subr.bf16.mxu0 %v1187_v1  ;;  %1073 = vmatpush3.bf16.msra.mxu1 %v1153_v21 }
  0x1f   : > { %1074 = vmatprep.subr.bf16.mxu1 %v1188_v3 }
  0x21   : > { %502 = vmatpush1.bf16.msra.mxu0 %v1140_v11 }
  0x22   : > { %503 = vmatprep.subr.bf16.mxu0 %v1187_v1  ;;  %1075 = vmatpush3.bf16.msra.mxu1 %v1154_v22 }
  0x23   : > { %1076 = vmatprep.subr.bf16.mxu1 %v1188_v3 }
  0x25   : > { %504 = vmatpush1.bf16.msra.mxu0 %v1141_v12 }
  0x26   : > { %505 = vmatprep.subr.bf16.mxu0 %v1187_v1  ;;  %1077 = vmatpush3.bf16.msra.mxu1 %v1155_v23  ;;  %v1014_v23 = vld [vmem:[%s1420_s3] ss:$0 sm:$0xff] }
  0x27   : > { %1078 = vmatprep.subr.bf16.mxu1 %v1188_v3 }
  0x29   : > { %506 = vmatpush1.bf16.msra.mxu0 %v1142_v13 }
  0x2a   : > { %515 = vmatprep.subr.bf16.mxu0 %v1187_v1  ;;  %1079 = vmatpush3.bf16.msra.mxu1 %v1156_v24 }
  0x2b   : > { %1084 = vmatprep.subr.bf16.mxu1 %v1188_v3 }
  0x2d   : > { %516 = vmatpush2.bf16.msra.mxu0 %v1143_v14 }
  0x2e   : > { %517 = vmatprep.subr.bf16.mxu0 %v1187_v1 }
  0x31   : > { %518 = vmatpush2.bf16.msra.mxu0 %v1144_v15 }
  0x32   : > { %519 = vmatprep.subr.bf16.mxu0 %v1187_v1 }
  0x35   : > { %520 = vmatpush2.bf16.msra.mxu0 %v1145_v16 }
  0x36   : > { %521 = vmatprep.subr.bf16.mxu0 %v1187_v1 }
  0x39   : > { %522 = vmatpush2.bf16.msra.mxu0 %v1146_v17 }
  0x3a   : > { %1104 = vmatprep.subr.bf16.mxu0 %v1188_v3 }
  0x3c   : > { %524 = vmatmul.mubr.bf16.vlgmr.msra.gmra.mxu0 %v991_v18 }
  0x3d   : > { %1120 = vmatprep.mubr.msk.bf16.mxu0 %vm1189_vm1, %v1188_v3 }
  0xfc   : > { %v525_v25 = vpop.f32.mrf.mxu0 }
  0xfd   : > { %v532_v26 = vcombine.high %v525_v25, %v525_v25  ;;  %v535_v27 = vsel %vm534_vm2, %v525_v25, 0.0  ;;  %v1015_v25 = vld [vmem:[%s1421_s4] ss:$0 sm:$0xff] }
  0xfe   : > { %v536_v28 = vrot.slane %v535_v27, 4  ;;  %v527_v29 = vpop.f32.mrf.mxu0 }
  0xff   : > { %v542_v30 = vsel %vm534_vm2, %v532_v26, 0.0 }
 0x100   : > { %v537_v31 = vadd.f32 %v536_v28, %v535_v27  ;;  %v543_v32 = vrot.slane %v542_v30, 4  ;;  %v528_v33 = vpop.f32.mrf.mxu0 }
 0x101   : > { %v1168_v33 = vld [vmem:[%s1425_s8 + $0x20] sm:$0xff]  }
 0x102   : > { %v538_v34 = vrot.slane %v537_v31, 2  ;;  %v544_v35 = vadd.f32 %v543_v32, %v542_v30  ;;  %v529_v36 = vpop.f32.mrf.mxu0  ;;  %v1165_v30 = vld [vmem:[%s1425_s8 + $0x38] sm:$0xff]   ;;  %v1167_v32 = vld [vmem:[%s1425_s8 + $0x28] sm:$0xff]  }
 0x103   : > { %1105 = vmatpush3.bf16.msra.mxu0 %v1165_v30  ;;  %v1171_v36 = vld [vmem:[%s1425_s8 + $0x8] sm:$0xff]  }
 0x104   : > { %v539_v37 = vadd.f32 %v538_v34, %v537_v31  ;;  %v545_v38 = vrot.slane %v544_v35, 2  ;;  %1106 = vmatprep.subr.bf16.mxu0 %v1188_v3  ;;  %v1166_v31 = vld [vmem:[%s1425_s8 + $0x30] sm:$0xff]   ;;  %v1169_v34 = vld [vmem:[%s1425_s8 + $0x18] sm:$0xff]  }
 0x106   : > { %v540_v39 = vrot.slane %v539_v37, 1  ;;  %v546_v40 = vadd.f32 %v545_v38, %v544_v35  ;;  %v1170_v35 = vld [vmem:[%s1425_s8 + $0x10] sm:$0xff]  }
 0x107   : > { %1107 = vmatpush3.bf16.msra.mxu0 %v1166_v31 }
 0x108   : > { %v541_v41 = vadd.f32 %v540_v39, %v539_v37  ;;  %v547_v42 = vrot.slane %v546_v40, 1  ;;  %1108 = vmatprep.subr.bf16.mxu0 %v1188_v3  ;;  %v1172_v37 = vld [vmem:[%s1425_s8] sm:$0xff]  }
 0x10a   : > { %v548_v43 = vadd.f32 %v547_v42, %v546_v40  ;;  %v550_v44 = vmul.f32 0.25, %v541_v41 }
 0x10b   : > { %1109 = vmatpush3.bf16.msra.mxu0 %v1167_v32 }
 0x10c   : > { %v551_v45 = vmul.f32 0.25, %v548_v43  ;;  %v552_v46 = vpack.c.bf16 %v550_v44, %v550_v44  ;;  %1110 = vmatprep.subr.bf16.mxu0 %v1188_v3 }
 0x10e   : > { %v553_v47 = vpack.c.bf16 %v551_v45, %v551_v45  ;;  %v556_v48 = vunpack.c.l.b16 %v552_v46 }
 0x10f   : > { %1111 = vmatpush3.bf16.msra.mxu0 %v1168_v33 }
 0x110   : > { %v557_v49 = vunpack.c.l.b16 %v553_v47  ;;  %1112 = vmatprep.subr.bf16.mxu0 %v1188_v3 }
 0x112   : > { %v559_v50 = vsel %vm558_vm3, %v557_v49, %v556_v48 }
 0x113   : > { %v560_v51 = vpack.c.b16 %v559_v50, %v559_v50  ;;  %1113 = vmatpush3.bf16.msra.mxu0 %v1169_v34 }
 0x114   : > { %1114 = vmatprep.subr.bf16.mxu0 %v1188_v3 }
 0x115   : > { %1081 = vmatmul.mubr.bf16.vlgmr.msra.gmra.mxu1 %v560_v51 }
 0x116   : > { %1100 = vmatprep.mubr.msk.bf16.mxu1 %vm1189_vm1, %v1188_v3  ;;  %1085 = vmatpush3.bf16.msra.mxu1 %v1157_v52 }
 0x117   : > { %1086 = vmatprep.subr.bf16.mxu1 %v1188_v3  ;;  %1115 = vmatpush3.bf16.msra.mxu0 %v1170_v35 }
 0x118   : > { %1116 = vmatprep.subr.bf16.mxu0 %v1188_v3 }
 0x11a   : > { %1087 = vmatpush3.bf16.msra.mxu1 %v1158_v53 }
 0x11b   : > { %1088 = vmatprep.subr.bf16.mxu1 %v1188_v3  ;;  %1117 = vmatpush3.bf16.msra.mxu0 %v1171_v36 }
 0x11c   : > { %1118 = vmatprep.subr.bf16.mxu0 %v1188_v3 }
 0x11e   : > { %1089 = vmatpush3.bf16.msra.mxu1 %v1159_v54 }
 0x11f   : > { %1090 = vmatprep.subr.bf16.mxu1 %v1188_v3  ;;  %1119 = vmatpush3.bf16.msra.mxu0 %v1172_v37 }
 0x122   : > { %1091 = vmatpush3.bf16.msra.mxu1 %v1160_v55 }
 0x123   : > { %1092 = vmatprep.subr.bf16.mxu1 %v1188_v3 }
 0x126   : > { %1093 = vmatpush3.bf16.msra.mxu1 %v1161_v56 }
 0x127   : > { %1094 = vmatprep.subr.bf16.mxu1 %v1188_v3 }
 0x12a   : > { %1095 = vmatpush3.bf16.msra.mxu1 %v1162_v57 }
 0x12b   : > { %1096 = vmatprep.subr.bf16.mxu1 %v1188_v3 }
 0x12e   : > { %1097 = vmatpush3.bf16.msra.mxu1 %v1163_v58 }
 0x12f   : > { %1098 = vmatprep.subr.bf16.mxu1 %v1188_v3 }
 0x132   : > { %1099 = vmatpush3.bf16.msra.mxu1 %v1164_v59 }
 0x1d5   : > { %v644_v60 = vpop.f32.mrf.mxu1 }
 0x1d6   : > { %v651_v61 = vsel %vm650_vm4, %v644_v60, 0.0  ;;  %v660_v62 = vmul.f32 %v644_v60, %v644_v60 }
 0x1d7   : > { %v652_v63 = vrot.slane %v651_v61, 4  ;;  %v1082_v0 = vpop.f32.mrf.mxu1 }
 0x1d8   : > { %v661_v1 = vsel %vm650_vm4, %v660_v62, 0.0 }
 0x1d9   : > { %v653_v2 = vadd.f32 %v652_v63, %v651_v61  ;;  %v662_v4 = vrot.slane %v661_v1, 4  ;;  %v647_v5 = vpop.f32.mrf.mxu1  ;;  %v1024_v63 = vld [vmem:[%s1423_s6] ss:$0 sm:$0xff] }
 0x1db   : > { %v654_v6 = vrot.slane %v653_v2, 2  ;;  %v663_v7 = vadd.f32 %v662_v4, %v661_v1  ;;  %v1083_v8 = vpop.f32.mrf.mxu1  ;;  %v1025_v1 = vld [vmem:[%s1424_s7] ss:$0 sm:$0xff] }
 0x1dd   : > { %v655_v9 = vadd.f32 %v654_v6, %v653_v2  ;;  %v664_v10 = vrot.slane %v663_v7, 2 }
 0x1df   : > { %v656_v11 = vrot.slane %v655_v9, 1  ;;  %v665_v12 = vadd.f32 %v664_v10, %v663_v7 }
 0x1e1   : > { %v657_v13 = vadd.f32 %v656_v11, %v655_v9  ;;  %v666_v14 = vrot.slane %v665_v12, 1 }
 0x1e3   : > { %v659_v15 = vmul.f32 0.5, %v657_v13  ;;  %v667_v16 = vadd.f32 %v666_v14, %v665_v12 }
 0x1e5   : > { %v668_v17 = vmul.f32 0.5, %v667_v16  ;;  %v669_v18 = vmul.f32 %v659_v15, %v659_v15  ;;  %v671_v21 = vsub.f32 %v644_v60, %v659_v15 }
 0x1e7   : > { %v670_v19 = vsub.f32 %v668_v17, %v669_v18 }
 0x1e9   : > { %v672_v20 = vadd.f32 1e-05, %v670_v19 }
 0x1eb   : > { %1173 = vrsqrt.f32 %v672_v20 }
 0x1f8   : > { %v1174_v22 = vpop.eup %1173 }
 0x1f9   : > { %v674_v24 = vmul.f32 %v1174_v22, %v671_v21 }
 0x1fb   : > { %v681_v26 = vmul.f32 %v1014_v23, %v674_v24 }
 0x1fd   : > { %v688_v27 = vadd.f32 %v1015_v25, %v681_v26 }
 0x1ff   : > { %v689_v28 = vmax.f32 %v688_v27, 0.0 }
 0x201   : > { %v690_v29 = vpack.c.bf16 %v689_v28, %v689_v28 }
 0x203   : > { %1101 = vmatmul.mubr.bf16.vlgmr.msra.gmra.mxu1 %v690_v29 }
 0x2c3   : > { %v773_v38 = vpop.f32.mrf.mxu1 }
 0x2c4   : > { %v779_v39 = vsel %vm650_vm4, %v773_v38, 0.0  ;;  %v787_v40 = vmul.f32 %v773_v38, %v773_v38 }
 0x2c5   : > { %v780_v41 = vrot.slane %v779_v39, 4  ;;  %v1102_v42 = vpop.f32.mrf.mxu1 }
 0x2c6   : > { %v788_v43 = vsel %vm650_vm4, %v787_v40, 0.0 }
 0x2c7   : > { %v781_v44 = vadd.f32 %v780_v41, %v779_v39  ;;  %v789_v45 = vrot.slane %v788_v43, 4  ;;  %v776_v46 = vpop.f32.mrf.mxu1 }
 0x2c9   : > { %v782_v47 = vrot.slane %v781_v44, 2  ;;  %v790_v48 = vadd.f32 %v789_v45, %v788_v43  ;;  %v1103_v49 = vpop.f32.mrf.mxu1 }
 0x2cb   : > { %v783_v50 = vadd.f32 %v782_v47, %v781_v44  ;;  %v791_v51 = vrot.slane %v790_v48, 2 }
 0x2cd   : > { %v784_v52 = vrot.slane %v783_v50, 1  ;;  %v792_v53 = vadd.f32 %v791_v51, %v790_v48 }
 0x2cf   : > { %v785_v3 = vadd.f32 %v784_v52, %v783_v50  ;;  %v793_v54 = vrot.slane %v792_v53, 1 }
 0x2d1   : > { %v786_v55 = vmul.f32 0.5, %v785_v3  ;;  %v794_v56 = vadd.f32 %v793_v54, %v792_v53 }
 0x2d3   : > { %v795_v57 = vmul.f32 0.5, %v794_v56  ;;  %v796_v58 = vmul.f32 %v786_v55, %v786_v55  ;;  %v798_v61 = vsub.f32 %v773_v38, %v786_v55 }
 0x2d5   : > { %v797_v59 = vsub.f32 %v795_v57, %v796_v58 }
 0x2d7   : > { %v799_v60 = vadd.f32 1e-05, %v797_v59 }
 0x2d9   : > { %1175 = vrsqrt.f32 %v799_v60 }
 0x2e6   : > { %v1176_v62 = vpop.eup %1175 }
 0x2e7   : > { %v801_v0 = vmul.f32 %v1176_v62, %v798_v61 }
 0x2e9   : > { %v808_v2 = vmul.f32 %v1024_v63, %v801_v0 }
 0x2eb   : > { %v815_v4 = vadd.f32 %v1025_v1, %v808_v2 }
 0x2ed   : > { %v816_v5 = vmax.f32 %v815_v4, 0.0 }
 0x2ef   : > { %v817_v6 = vpack.c.bf16 %v816_v5, %v816_v5 }
 0x2f1   : > { %1121 = vmatmul.mubr.bf16.vlgmr.msra.gmra.mxu0 %v817_v6 }
 0x3b1   : > { %v900_v7 = vpop.f32.mrf.mxu0 }
 0x3b2   : > { %v906_v8 = vsel %vm650_vm4, %v900_v7, 0.0  ;;  %v914_v9 = vmul.f32 %v900_v7, %v900_v7 }
 0x3b3   : > { %v907_v10 = vrot.slane %v906_v8, 4  ;;  %v1122_v11 = vpop.f32.mrf.mxu0 }
 0x3b4   : > { %v915_v12 = vsel %vm650_vm4, %v914_v9, 0.0 }
 0x3b5   : > { %v908_v13 = vadd.f32 %v907_v10, %v906_v8  ;;  %v916_v14 = vrot.slane %v915_v12, 4  ;;  %v903_v15 = vpop.f32.mrf.mxu0 }
 0x3b7   : > { %v909_v16 = vrot.slane %v908_v13, 2  ;;  %v917_v17 = vadd.f32 %v916_v14, %v915_v12  ;;  %v1123_v18 = vpop.f32.mrf.mxu0 }
 0x3b9   : > { %v910_v19 = vadd.f32 %v909_v16, %v908_v13  ;;  %v918_v20 = vrot.slane %v917_v17, 2 }
 0x3bb   : > { %v911_v21 = vrot.slane %v910_v19, 1  ;;  %v919_v22 = vadd.f32 %v918_v20, %v917_v17 }
 0x3bd   : > { %v912_v23 = vadd.f32 %v911_v21, %v910_v19  ;;  %v920_v24 = vrot.slane %v919_v22, 1 }
 0x3bf   : > { %v913_v25 = vmul.f32 0.5, %v912_v23  ;;  %v921_v26 = vadd.f32 %v920_v24, %v919_v22 }
 0x3c1   : > { %v922_v27 = vmul.f32 0.5, %v921_v26  ;;  %v923_v28 = vmul.f32 %v913_v25, %v913_v25  ;;  %v925_v31 = vsub.f32 %v900_v7, %v913_v25 }
 0x3c3   : > { %v924_v29 = vsub.f32 %v922_v27, %v923_v28 }
 0x3c5   : > { %v926_v30 = vadd.f32 1e-05, %v924_v29 }
 0x3c7   : > { %1177 = vrsqrt.f32 %v926_v30 }
 0x3d4   : > { %v1178_v32 = vpop.eup %1177 }
 0x3d5   : > { %v928_v33 = vmul.f32 %v1178_v32, %v925_v31 }
 0x3d7   : > { %929 = vst [vmem:[%s330_s22] sm:$0x3] %v928_v33 }
 0x3d8 PF: > { %s19_s30 = sadd.s32 1, %s1185_s30  }
 0x3d9   : > { %p16_p4 = scmp.ge.s32.totalorder %s19_s30, 4  }
 0x3db   :  { %18 = sbr.rel (!%p16_p4) target bundleno = 1 (0x1), region = 86 }

// kernel: moco_vit_forward.4
= control target key start
LH: loop header
LB: loop body
LE: loop exit
PB: predicated region body
PF: predicated region fallthrough
CT: control target
= control target key end

     0   :  { %s1737_s25 = smov 0   ;;  %s1992_s0 = inlined_call_operand.vmem [shape: bf16[2,8,192], index: 0, kind: input, shape index: {}]   ;;  %s1993_s1 = inlined_call_operand.vmem [shape: bf16[192,128], index: 1, kind: input, shape index: {}]   ;;  %s1994_s2 = inlined_call_operand.vmem [shape: bf16[128,128], index: 2, kind: input, shape index: {}]   ;;  %s1995_s3 = inlined_call_operand.vmem [shape: f32[1,128], index: 3, kind: input, shape index: {}]   ;;  %s1996_s4 = inlined_call_operand.vmem [shape: f32[1,128], index: 4, kind: input, shape index: {}]   ;;  %s1997_s5 = inlined_call_operand.vmem [shape: bf16[128,128], index: 5, kind: input, shape index: {}]   ;;  %s1998_s6 = inlined_call_operand.vmem [shape: f32[1,128], index: 6, kind: input, shape index: {}]   ;;  %s1999_s7 = inlined_call_operand.vmem [shape: f32[1,128], index: 7, kind: input, shape index: {}]   ;;  %s2000_s8 = inlined_call_operand.vmem [shape: bf16[128,128], index: 8, kind: input, shape index: {}]   ;;  %s2001_s9 = inlined_call_operand.vmem [shape: bf16[128,128], index: 9, kind: input, shape index: {}]   ;;  %s2002_s10 = inlined_call_operand.vmem [shape: f32[1,128], index: 10, kind: input, shape index: {}]   ;;  %s2003_s11 = inlined_call_operand.vmem [shape: f32[1,128], index: 11, kind: input, shape index: {}]   ;;  %s2004_s12 = inlined_call_operand.vmem [shape: bf16[128,128], index: 12, kind: input, shape index: {}]   ;;  %s2005_s13 = inlined_call_operand.vmem [shape: f32[2,2,128], index: 13, kind: output, shape index: {}]  }
   0x1 LB: > { %s1364_s26 = sadd.s32 4294967295, %s1662_s25   ;;  %p1368_p0 = scmp.ge.s32.totalorder %s1662_s25, 1  ;;  %s1662_s25 = sphi %s1737_s25, %s23_s25  }
   0x2   : > { %p387_p1 = scmp.lt.s32.totalorder %s1662_s25, 3 }
   0x4   : > { %p388_p2 = pnand %p1368_p0, %p387_p1 }
   0x5   : > { %p430_p3 = scmp.lt.s32.totalorder (!%p388_p2), %s1364_s26, 1 }
   0x6   : > { %391 = sbr.rel (%p388_p2) target bundleno = 1454 (0x5ae), region = 72 }
   0xb   : > { %v1592_v0 = vld [vmem:[%s1993_s1 + $0x38] sm:$0xff]   ;;  %v1664_v1 = vmov 0   ;;  %v1593_v2 = vld [vmem:[%s1993_s1 + $0x30] sm:$0xff]   ;;  %s2007_s26 = smov (!%p430_p3, %s1364_s26), 1  ;;  %v1665_v3 = vmov 0.0   ;;  %v1594_v4 = vld [vmem:[%s1993_s1 + $0x28] sm:$0xff]  }
   0xc   : > { %599 = vmatprep.subr.bf16.mxu0 %v1664_v1  ;;  %1481 = vmatprep.subr.bf16.mxu1 %v1665_v3  ;;  %s1435_s16 = sshll.u32 %s2007_s26, 3  ;;  %v1595_v5 = vld [vmem:[%s1993_s1 + $0x20] sm:$0xff]   ;;  %v1596_v6 = vld [vmem:[%s1993_s1 + $0x18] sm:$0xff]   ;;  %vm595_vm0 = vcmask 523264   ;;  %v1607_v10 = vld [vmem:[%s1994_s2 + $0x30] sm:$0xff]   ;;  %vm1666_vm1 = vmmov 0  }
   0xd   : > { %600 = vmatpush1.bf16.msra.mxu0 %v1592_v0  ;;  %s434_s19 = scalar_lea.vmem %s1992_s0, %s1435_s16  ;;  %v1606_v9 = vld [vmem:[%s1994_s2 + $0x38] sm:$0xff]   ;;  %v1597_v11 = vld [vmem:[%s1993_s1 + $0x10] sm:$0xff]   ;;  %v1598_v12 = vld [vmem:[%s1993_s1 + $0x8] sm:$0xff]   ;;  %1497 = vmatprep.mubr.msk.bf16.mxu1 %vm1666_vm1, %v1665_v3  ;;  %vm642_vm2 = vcmask 1043456   ;;  %vm666_vm3 = vcmask 1041409   ;;  %vm758_vm4 = vcmask 1041408  }
   0xe   : > { %601 = vmatprep.subr.bf16.mxu0 %v1664_v1  ;;  %v440_v7 = vld [vmem:[%s434_s19] sm:$0xff]  ;;  %1482 = vmatpush3.bf16.msra.mxu1 %v1606_v9  ;;  %v1600_v14 = vld [vmem:[%s1993_s1 + $0x58] sm:$0xff]   ;;  %v1601_v15 = vld [vmem:[%s1993_s1 + $0x50] sm:$0xff]   ;;  %s1371_s27 = sshll.u32 %s2007_s26, 1 }
   0xf   : > { %v1373_v8 = vcombine.high %v440_v7, %v440_v7  ;;  %1483 = vmatprep.subr.bf16.mxu1 %v1665_v3  ;;  %v1599_v13 = vld [vmem:[%s1993_s1] sm:$0xff]   ;;  %v1602_v16 = vld [vmem:[%s1993_s1 + $0x48] sm:$0xff]   ;;  %v1372_v18 = vcombine.low %v440_v7, %v440_v7  ;;  %v1610_v21 = vld [vmem:[%s1994_s2 + $0x18] sm:$0xff]   ;;  %s438_s30 = scalar_lea.vmem %s2005_s13, %s1371_s27 }
  0x10   : > { %v1603_v17 = vld [vmem:[%s1993_s1 + $0x40] sm:$0xff]   ;;  %v1608_v19 = vld [vmem:[%s1994_s2 + $0x28] sm:$0xff]   ;;  %v1611_v22 = vld [vmem:[%s1994_s2 + $0x10] sm:$0xff]  }
  0x11   : > { %602 = vmatpush1.bf16.msra.mxu0 %v1593_v2  ;;  %1386 = vmatprep.mubr.msk.bf16.mxu0 %vm595_vm0, %v1373_v8  ;;  %v1609_v20 = vld [vmem:[%s1994_s2 + $0x20] sm:$0xff]   ;;  %v1612_v23 = vld [vmem:[%s1994_s2 + $0x8] sm:$0xff]   ;;  %v1614_v52 = vld [vmem:[%s1997_s5 + $0x38] sm:$0xff]  }
  0x12   : > { %603 = vmatprep.subr.bf16.mxu0 %v1664_v1  ;;  %1484 = vmatpush3.bf16.msra.mxu1 %v1607_v10  ;;  %v1613_v24 = vld [vmem:[%s1994_s2] sm:$0xff]   ;;  %v1615_v53 = vld [vmem:[%s1997_s5 + $0x30] sm:$0xff]   ;;  %v1616_v54 = vld [vmem:[%s1997_s5 + $0x28] sm:$0xff]  }
  0x13   : > { %1485 = vmatprep.subr.bf16.mxu1 %v1665_v3  ;;  %v1617_v55 = vld [vmem:[%s1997_s5 + $0x20] sm:$0xff]   ;;  %v1618_v56 = vld [vmem:[%s1997_s5 + $0x18] sm:$0xff]   ;;  %v1619_v57 = vld [vmem:[%s1997_s5 + $0x10] sm:$0xff]  }
  0x14   : > { %v1620_v58 = vld [vmem:[%s1997_s5 + $0x8] sm:$0xff]   ;;  %v1621_v59 = vld [vmem:[%s1997_s5] sm:$0xff]  }
  0x15   : > { %604 = vmatpush1.bf16.msra.mxu0 %v1594_v4 }
  0x16   : > { %605 = vmatprep.subr.bf16.mxu0 %v1664_v1  ;;  %1486 = vmatpush3.bf16.msra.mxu1 %v1608_v19 }
  0x17   : > { %1487 = vmatprep.subr.bf16.mxu1 %v1665_v3 }
  0x19   : > { %606 = vmatpush1.bf16.msra.mxu0 %v1595_v5 }
  0x1a   : > { %607 = vmatprep.subr.bf16.mxu0 %v1664_v1  ;;  %1488 = vmatpush3.bf16.msra.mxu1 %v1609_v20 }
  0x1b   : > { %1489 = vmatprep.subr.bf16.mxu1 %v1665_v3 }
  0x1d   : > { %608 = vmatpush1.bf16.msra.mxu0 %v1596_v6 }
  0x1e   : > { %609 = vmatprep.subr.bf16.mxu0 %v1664_v1  ;;  %1490 = vmatpush3.bf16.msra.mxu1 %v1610_v21 }
  0x1f   : > { %1491 = vmatprep.subr.bf16.mxu1 %v1665_v3 }
  0x21   : > { %610 = vmatpush1.bf16.msra.mxu0 %v1597_v11 }
  0x22   : > { %611 = vmatprep.subr.bf16.mxu0 %v1664_v1  ;;  %1492 = vmatpush3.bf16.msra.mxu1 %v1611_v22 }
  0x23   : > { %1493 = vmatprep.subr.bf16.mxu1 %v1665_v3 }
  0x25   : > { %612 = vmatpush1.bf16.msra.mxu0 %v1598_v12 }
  0x26   : > { %613 = vmatprep.subr.bf16.mxu0 %v1664_v1  ;;  %1494 = vmatpush3.bf16.msra.mxu1 %v1612_v23  ;;  %v1395_v23 = vld [vmem:[%s1995_s3] ss:$0 sm:$0xff] }
  0x27   : > { %1495 = vmatprep.subr.bf16.mxu1 %v1665_v3 }
  0x29   : > { %614 = vmatpush1.bf16.msra.mxu0 %v1599_v13 }
  0x2a   : > { %623 = vmatprep.subr.bf16.mxu0 %v1664_v1  ;;  %1496 = vmatpush3.bf16.msra.mxu1 %v1613_v24 }
  0x2b   : > { %1501 = vmatprep.subr.bf16.mxu1 %v1665_v3 }
  0x2d   : > { %624 = vmatpush2.bf16.msra.mxu0 %v1600_v14 }
  0x2e   : > { %625 = vmatprep.subr.bf16.mxu0 %v1664_v1 }
  0x31   : > { %626 = vmatpush2.bf16.msra.mxu0 %v1601_v15 }
  0x32   : > { %627 = vmatprep.subr.bf16.mxu0 %v1664_v1 }
  0x35   : > { %628 = vmatpush2.bf16.msra.mxu0 %v1602_v16 }
  0x36   : > { %629 = vmatprep.subr.bf16.mxu0 %v1664_v1 }
  0x39   : > { %630 = vmatpush2.bf16.msra.mxu0 %v1603_v17 }
  0x3a   : > { %1521 = vmatprep.subr.bf16.mxu0 %v1665_v3 }
  0x3c   : > { %632 = vmatmul.mubr.bf16.vlgmr.msra.gmra.mxu0 %v1372_v18 }
  0x3d   : > { %1537 = vmatprep.mubr.msk.bf16.mxu0 %vm1666_vm1, %v1665_v3 }
  0xfc   : > { %v633_v25 = vpop.f32.mrf.mxu0 }
  0xfd   : > { %v640_v26 = vcombine.high %v633_v25, %v633_v25  ;;  %v643_v27 = vsel %vm642_vm2, %v633_v25, 0.0  ;;  %v1396_v25 = vld [vmem:[%s1996_s4] ss:$0 sm:$0xff] }
  0xfe   : > { %v644_v28 = vrot.slane %v643_v27, 4  ;;  %v635_v29 = vpop.f32.mrf.mxu0 }
  0xff   : > { %v650_v30 = vsel %vm642_vm2, %v640_v26, 0.0 }
 0x100   : > { %v645_v31 = vadd.f32 %v644_v28, %v643_v27  ;;  %v651_v32 = vrot.slane %v650_v30, 4  ;;  %v636_v33 = vpop.f32.mrf.mxu0 }
 0x101   : > { %v1625_v33 = vld [vmem:[%s2000_s8 + $0x20] sm:$0xff]  }
 0x102   : > { %v646_v34 = vrot.slane %v645_v31, 2  ;;  %v652_v35 = vadd.f32 %v651_v32, %v650_v30  ;;  %v637_v36 = vpop.f32.mrf.mxu0  ;;  %v1622_v30 = vld [vmem:[%s2000_s8 + $0x38] sm:$0xff]   ;;  %v1624_v32 = vld [vmem:[%s2000_s8 + $0x28] sm:$0xff]  }
 0x103   : > { %1522 = vmatpush3.bf16.msra.mxu0 %v1622_v30  ;;  %v1628_v36 = vld [vmem:[%s2000_s8 + $0x8] sm:$0xff]  }
 0x104   : > { %v647_v37 = vadd.f32 %v646_v34, %v645_v31  ;;  %v653_v38 = vrot.slane %v652_v35, 2  ;;  %1523 = vmatprep.subr.bf16.mxu0 %v1665_v3  ;;  %v1623_v31 = vld [vmem:[%s2000_s8 + $0x30] sm:$0xff]   ;;  %v1626_v34 = vld [vmem:[%s2000_s8 + $0x18] sm:$0xff]  }
 0x106   : > { %v648_v39 = vrot.slane %v647_v37, 1  ;;  %v654_v40 = vadd.f32 %v653_v38, %v652_v35  ;;  %v1627_v35 = vld [vmem:[%s2000_s8 + $0x10] sm:$0xff]  }
 0x107   : > { %1524 = vmatpush3.bf16.msra.mxu0 %v1623_v31 }
 0x108   : > { %v649_v41 = vadd.f32 %v648_v39, %v647_v37  ;;  %v655_v42 = vrot.slane %v654_v40, 1  ;;  %1525 = vmatprep.subr.bf16.mxu0 %v1665_v3  ;;  %v1629_v37 = vld [vmem:[%s2000_s8] sm:$0xff]  }
 0x10a   : > { %v656_v43 = vadd.f32 %v655_v42, %v654_v40  ;;  %v658_v44 = vmul.f32 0.25, %v649_v41 }
 0x10b   : > { %1526 = vmatpush3.bf16.msra.mxu0 %v1624_v32 }
 0x10c   : > { %v659_v45 = vmul.f32 0.25, %v656_v43  ;;  %v660_v46 = vpack.c.bf16 %v658_v44, %v658_v44  ;;  %1527 = vmatprep.subr.bf16.mxu0 %v1665_v3 }
 0x10e   : > { %v661_v47 = vpack.c.bf16 %v659_v45, %v659_v45  ;;  %v664_v48 = vunpack.c.l.b16 %v660_v46 }
 0x10f   : > { %1528 = vmatpush3.bf16.msra.mxu0 %v1625_v33 }
 0x110   : > { %v665_v49 = vunpack.c.l.b16 %v661_v47  ;;  %1529 = vmatprep.subr.bf16.mxu0 %v1665_v3 }
 0x112   : > { %v667_v50 = vsel %vm666_vm3, %v665_v49, %v664_v48 }
 0x113   : > { %v668_v51 = vpack.c.b16 %v667_v50, %v667_v50  ;;  %1530 = vmatpush3.bf16.msra.mxu0 %v1626_v34 }
 0x114   : > { %1531 = vmatprep.subr.bf16.mxu0 %v1665_v3 }
 0x115   : > { %1498 = vmatmul.mubr.bf16.vlgmr.msra.gmra.mxu1 %v668_v51 }
 0x116   : > { %1517 = vmatprep.mubr.msk.bf16.mxu1 %vm1666_vm1, %v1665_v3  ;;  %1502 = vmatpush3.bf16.msra.mxu1 %v1614_v52 }
 0x117   : > { %1503 = vmatprep.subr.bf16.mxu1 %v1665_v3  ;;  %1532 = vmatpush3.bf16.msra.mxu0 %v1627_v35 }
 0x118   : > { %1533 = vmatprep.subr.bf16.mxu0 %v1665_v3 }
 0x11a   : > { %1504 = vmatpush3.bf16.msra.mxu1 %v1615_v53 }
 0x11b   : > { %1505 = vmatprep.subr.bf16.mxu1 %v1665_v3  ;;  %1534 = vmatpush3.bf16.msra.mxu0 %v1628_v36 }
 0x11c   : > { %1535 = vmatprep.subr.bf16.mxu0 %v1665_v3 }
 0x11e   : > { %1506 = vmatpush3.bf16.msra.mxu1 %v1616_v54 }
 0x11f   : > { %1507 = vmatprep.subr.bf16.mxu1 %v1665_v3  ;;  %1536 = vmatpush3.bf16.msra.mxu0 %v1629_v37 }
 0x120   : > { %1561 = vmatprep.subr.bf16.mxu0 %v1665_v3 }
 0x122   : > { %1508 = vmatpush3.bf16.msra.mxu1 %v1617_v55 }
 0x123   : > { %1509 = vmatprep.subr.bf16.mxu1 %v1665_v3 }
 0x126   : > { %1510 = vmatpush3.bf16.msra.mxu1 %v1618_v56 }
 0x127   : > { %1511 = vmatprep.subr.bf16.mxu1 %v1665_v3 }
 0x12a   : > { %1512 = vmatpush3.bf16.msra.mxu1 %v1619_v57 }
 0x12b   : > { %1513 = vmatprep.subr.bf16.mxu1 %v1665_v3 }
 0x12e   : > { %1514 = vmatpush3.bf16.msra.mxu1 %v1620_v58 }
 0x12f   : > { %1515 = vmatprep.subr.bf16.mxu1 %v1665_v3 }
 0x132   : > { %1516 = vmatpush3.bf16.msra.mxu1 %v1621_v59 }
 0x133   : > { %1541 = vmatprep.subr.bf16.mxu1 %v1665_v3 }
 0x1d5   : > { %v752_v60 = vpop.f32.mrf.mxu1 }
 0x1d6   : > { %v759_v61 = vsel %vm758_vm4, %v752_v60, 0.0  ;;  %v768_v62 = vmul.f32 %v752_v60, %v752_v60 }
 0x1d7   : > { %v760_v63 = vrot.slane %v759_v61, 4  ;;  %v1499_v0 = vpop.f32.mrf.mxu1 }
 0x1d8   : > { %v769_v1 = vsel %vm758_vm4, %v768_v62, 0.0  ;;  %v1405_v0 = vld [vmem:[%s1998_s6] ss:$0 sm:$0xff] }
 0x1d9   : > { %v761_v2 = vadd.f32 %v760_v63, %v759_v61  ;;  %v770_v4 = vrot.slane %v769_v1, 4  ;;  %v755_v5 = vpop.f32.mrf.mxu1 }
 0x1db   : > { %v762_v6 = vrot.slane %v761_v2, 2  ;;  %v771_v7 = vadd.f32 %v770_v4, %v769_v1  ;;  %v1500_v8 = vpop.f32.mrf.mxu1 }
 0x1dc   : > { %v1630_v8 = vld [vmem:[%s2001_s9 + $0x38] sm:$0xff]  }
 0x1dd   : > { %v763_v9 = vadd.f32 %v762_v6, %v761_v2  ;;  %v772_v10 = vrot.slane %v771_v7, 2  ;;  %v1406_v2 = vld [vmem:[%s1999_s7] ss:$0 sm:$0xff] }
 0x1df   : > { %v764_v11 = vrot.slane %v763_v9, 1  ;;  %v773_v12 = vadd.f32 %v772_v10, %v771_v7  ;;  %v1632_v10 = vld [vmem:[%s2001_s9 + $0x28] sm:$0xff]  }
 0x1e1   : > { %v765_v13 = vadd.f32 %v764_v11, %v763_v9  ;;  %v774_v14 = vrot.slane %v773_v12, 1  ;;  %v1631_v9 = vld [vmem:[%s2001_s9 + $0x30] sm:$0xff]   ;;  %v1633_v11 = vld [vmem:[%s2001_s9 + $0x20] sm:$0xff]  }
 0x1e3   : > { %v767_v15 = vmul.f32 0.5, %v765_v13  ;;  %v775_v16 = vadd.f32 %v774_v14, %v773_v12  ;;  %v1634_v12 = vld [vmem:[%s2001_s9 + $0x18] sm:$0xff]   ;;  %v1635_v13 = vld [vmem:[%s2001_s9 + $0x10] sm:$0xff]   ;;  %v1636_v14 = vld [vmem:[%s2001_s9 + $0x8] sm:$0xff]  }
 0x1e5   : > { %v776_v17 = vmul.f32 0.5, %v775_v16  ;;  %v777_v18 = vmul.f32 %v767_v15, %v767_v15  ;;  %v779_v21 = vsub.f32 %v752_v60, %v767_v15  ;;  %v1637_v15 = vld [vmem:[%s2001_s9] sm:$0xff]  }
 0x1e7   : > { %v778_v19 = vsub.f32 %v776_v17, %v777_v18 }
 0x1e9   : > { %v780_v20 = vadd.f32 1e-05, %v778_v19 }
 0x1eb   : > { %1646 = vrsqrt.f32 %v780_v20 }
 0x1f8   : > { %v1647_v22 = vpop.eup %1646 }
 0x1f9   : > { %v782_v24 = vmul.f32 %v1647_v22, %v779_v21 }
 0x1fb   : > { %v789_v26 = vmul.f32 %v1395_v23, %v782_v24 }
 0x1fd   : > { %v796_v27 = vadd.f32 %v1396_v25, %v789_v26 }
 0x1ff   : > { %v797_v28 = vmax.f32 %v796_v27, 0.0 }
 0x201   : > { %v798_v29 = vpack.c.bf16 %v797_v28, %v797_v28 }
 0x203   : > { %1518 = vmatmul.mubr.bf16.vlgmr.msra.gmra.mxu1 %v798_v29 }
 0x204   : > { %1557 = vmatprep.mubr.msk.bf16.mxu1 %vm1666_vm1, %v1665_v3  ;;  %1542 = vmatpush3.bf16.msra.mxu1 %v1630_v8 }
 0x205   : > { %1543 = vmatprep.subr.bf16.mxu1 %v1665_v3 }
 0x208   : > { %1544 = vmatpush3.bf16.msra.mxu1 %v1631_v9 }
 0x209   : > { %1545 = vmatprep.subr.bf16.mxu1 %v1665_v3 }
 0x20c   : > { %1546 = vmatpush3.bf16.msra.mxu1 %v1632_v10 }
 0x20d   : > { %1547 = vmatprep.subr.bf16.mxu1 %v1665_v3 }
 0x210   : > { %1548 = vmatpush3.bf16.msra.mxu1 %v1633_v11 }
 0x211   : > { %1549 = vmatprep.subr.bf16.mxu1 %v1665_v3 }
 0x214   : > { %1550 = vmatpush3.bf16.msra.mxu1 %v1634_v12 }
 0x215   : > { %1551 = vmatprep.subr.bf16.mxu1 %v1665_v3 }
 0x218   : > { %1552 = vmatpush3.bf16.msra.mxu1 %v1635_v13 }
 0x219   : > { %1553 = vmatprep.subr.bf16.mxu1 %v1665_v3 }
 0x21c   : > { %1554 = vmatpush3.bf16.msra.mxu1 %v1636_v14  ;;  %v1423_v14 = vld [vmem:[%s2002_s10] ss:$0 sm:$0xff] }
 0x21d   : > { %1555 = vmatprep.subr.bf16.mxu1 %v1665_v3 }
 0x220   : > { %1556 = vmatpush3.bf16.msra.mxu1 %v1637_v15 }
 0x2c3   : > { %v881_v38 = vpop.f32.mrf.mxu1 }
 0x2c4   : > { %v887_v39 = vsel %vm758_vm4, %v881_v38, 0.0  ;;  %v895_v40 = vmul.f32 %v881_v38, %v881_v38 }
 0x2c5   : > { %v888_v41 = vrot.slane %v887_v39, 4  ;;  %v1519_v42 = vpop.f32.mrf.mxu1 }
 0x2c6   : > { %v896_v43 = vsel %vm758_vm4, %v895_v40, 0.0 }
 0x2c7   : > { %v889_v44 = vadd.f32 %v888_v41, %v887_v39  ;;  %v897_v45 = vrot.slane %v896_v43, 4  ;;  %v884_v46 = vpop.f32.mrf.mxu1 }
 0x2c8   : > { %v1640_v46 = vld [vmem:[%s2004_s12 + $0x28] sm:$0xff]  }
 0x2c9   : > { %v890_v47 = vrot.slane %v889_v44, 2  ;;  %v898_v48 = vadd.f32 %v897_v45, %v896_v43  ;;  %v1520_v49 = vpop.f32.mrf.mxu1  ;;  %v1639_v45 = vld [vmem:[%s2004_s12 + $0x30] sm:$0xff]  }
 0x2ca   : > { %v1643_v49 = vld [vmem:[%s2004_s12 + $0x10] sm:$0xff]  }
 0x2cb   : > { %v891_v50 = vadd.f32 %v890_v47, %v889_v44  ;;  %v899_v51 = vrot.slane %v898_v48, 2  ;;  %v1638_v44 = vld [vmem:[%s2004_s12 + $0x38] sm:$0xff]   ;;  %v1641_v47 = vld [vmem:[%s2004_s12 + $0x20] sm:$0xff]  }
 0x2cd   : > { %v892_v52 = vrot.slane %v891_v50, 1  ;;  %v900_v53 = vadd.f32 %v899_v51, %v898_v48  ;;  %v1642_v48 = vld [vmem:[%s2004_s12 + $0x18] sm:$0xff]   ;;  %v1645_v51 = vld [vmem:[%s2004_s12] sm:$0xff]  }
 0x2cf   : > { %v893_v54 = vadd.f32 %v892_v52, %v891_v50  ;;  %v901_v55 = vrot.slane %v900_v53, 1  ;;  %v1644_v50 = vld [vmem:[%s2004_s12 + $0x8] sm:$0xff]  }
 0x2d1   : > { %v894_v56 = vmul.f32 0.5, %v893_v54  ;;  %v902_v57 = vadd.f32 %v901_v55, %v900_v53 }
 0x2d3   : > { %v903_v58 = vmul.f32 0.5, %v902_v57  ;;  %v904_v59 = vmul.f32 %v894_v56, %v894_v56  ;;  %v906_v62 = vsub.f32 %v881_v38, %v894_v56 }
 0x2d5   : > { %v905_v60 = vsub.f32 %v903_v58, %v904_v59 }
 0x2d7   : > { %v907_v61 = vadd.f32 1e-05, %v905_v60 }
 0x2d9   : > { %1648 = vrsqrt.f32 %v907_v61 }
 0x2e6   : > { %v1649_v63 = vpop.eup %1648 }
 0x2e7   : > { %v909_v1 = vmul.f32 %v1649_v63, %v906_v62 }
 0x2e9   : > { %v916_v4 = vmul.f32 %v1405_v0, %v909_v1 }
 0x2eb   : > { %v923_v5 = vadd.f32 %v1406_v2, %v916_v4 }
 0x2ed   : > { %v924_v6 = vmax.f32 %v923_v5, 0.0 }
 0x2ef   : > { %v925_v7 = vpack.c.bf16 %v924_v6, %v924_v6 }
 0x2f1   : > { %1538 = vmatmul.mubr.bf16.vlgmr.msra.gmra.mxu0 %v925_v7 }
 0x2f2   : > { %1577 = vmatprep.mubr.msk.bf16.mxu0 %vm1666_vm1, %v1665_v3  ;;  %1562 = vmatpush3.bf16.msra.mxu0 %v1638_v44 }
 0x2f3   : > { %1563 = vmatprep.subr.bf16.mxu0 %v1665_v3 }
 0x2f6   : > { %1564 = vmatpush3.bf16.msra.mxu0 %v1639_v45 }
 0x2f7   : > { %1565 = vmatprep.subr.bf16.mxu0 %v1665_v3 }
 0x2fa   : > { %1566 = vmatpush3.bf16.msra.mxu0 %v1640_v46 }
 0x2fb   : > { %1567 = vmatprep.subr.bf16.mxu0 %v1665_v3 }
 0x2fe   : > { %1568 = vmatpush3.bf16.msra.mxu0 %v1641_v47 }
 0x2ff   : > { %1569 = vmatprep.subr.bf16.mxu0 %v1665_v3 }
 0x302   : > { %1570 = vmatpush3.bf16.msra.mxu0 %v1642_v48 }
 0x303   : > { %1571 = vmatprep.subr.bf16.mxu0 %v1665_v3 }
 0x306   : > { %1572 = vmatpush3.bf16.msra.mxu0 %v1643_v49 }
 0x307   : > { %1573 = vmatprep.subr.bf16.mxu0 %v1665_v3 }
 0x30a   : > { %1574 = vmatpush3.bf16.msra.mxu0 %v1644_v50 }
 0x30b   : > { %1575 = vmatprep.subr.bf16.mxu0 %v1665_v3 }
 0x30e   : > { %1576 = vmatpush3.bf16.msra.mxu0 %v1645_v51 }
 0x3b1   : > { %v1008_v16 = vpop.f32.mrf.mxu0 }
 0x3b2   : > { %v1014_v17 = vsel %vm758_vm4, %v1008_v16, 0.0  ;;  %v1022_v18 = vmul.f32 %v1008_v16, %v1008_v16 }
 0x3b3   : > { %v1015_v19 = vrot.slane %v1014_v17, 4  ;;  %v1539_v20 = vpop.f32.mrf.mxu0 }
 0x3b4   : > { %v1023_v21 = vsel %vm758_vm4, %v1022_v18, 0.0 }
 0x3b5   : > { %v1016_v22 = vadd.f32 %v1015_v19, %v1014_v17  ;;  %v1024_v23 = vrot.slane %v1023_v21, 4  ;;  %v1011_v24 = vpop.f32.mrf.mxu0 }
 0x3b7   : > { %v1017_v25 = vrot.slane %v1016_v22, 2  ;;  %v1025_v26 = vadd.f32 %v1024_v23, %v1023_v21  ;;  %v1540_v27 = vpop.f32.mrf.mxu0 }
 0x3b9   : > { %v1018_v28 = vadd.f32 %v1017_v25, %v1016_v22  ;;  %v1026_v29 = vrot.slane %v1025_v26, 2 }
 0x3bb   : > { %v1019_v30 = vrot.slane %v1018_v28, 1  ;;  %v1027_v31 = vadd.f32 %v1026_v29, %v1025_v26 }
 0x3bd   : > { %v1020_v32 = vadd.f32 %v1019_v30, %v1018_v28  ;;  %v1028_v33 = vrot.slane %v1027_v31, 1 }
 0x3bf   : > { %v1021_v34 = vmul.f32 0.5, %v1020_v32  ;;  %v1029_v35 = vadd.f32 %v1028_v33, %v1027_v31 }
 0x3c1   : > { %v1030_v36 = vmul.f32 0.5, %v1029_v35  ;;  %v1031_v37 = vmul.f32 %v1021_v34, %v1021_v34  ;;  %v1033_v40 = vsub.f32 %v1008_v16, %v1021_v34  ;;  %v1424_v16 = vld [vmem:[%s2003_s11] ss:$0 sm:$0xff] }
 0x3c3   : > { %v1032_v38 = vsub.f32 %v1030_v36, %v1031_v37 }
 0x3c5   : > { %v1034_v39 = vadd.f32 1e-05, %v1032_v38 }
 0x3c7   : > { %1650 = vrsqrt.f32 %v1034_v39 }
 0x3d4   : > { %v1651_v41 = vpop.eup %1650 }
 0x3d5   : > { %v1036_v42 = vmul.f32 %v1651_v41, %v1033_v40 }
 0x3d7   : > { %v1037_v43 = vpack.c.bf16 %v1036_v42, %v1036_v42 }
 0x3d9   : > { %1558 = vmatmul.mubr.bf16.vlgmr.msra.gmra.mxu1 %v1037_v43 }
 0x499   : > { %v1136_v52 = vpop.f32.mrf.mxu1 }
 0x49a   : > { %v1144_v53 = vsel %vm758_vm4, %v1136_v52, 0.0  ;;  %v1152_v54 = vmul.f32 %v1136_v52, %v1136_v52 }
 0x49b   : > { %v1145_v55 = vrot.slane %v1144_v53, 4  ;;  %v1559_v56 = vpop.f32.mrf.mxu1 }
 0x49c   : > { %v1153_v57 = vsel %vm758_vm4, %v1152_v54, 0.0 }
 0x49d   : > { %v1146_v58 = vadd.f32 %v1145_v55, %v1144_v53  ;;  %v1154_v59 = vrot.slane %v1153_v57, 4  ;;  %v1139_v60 = vpop.f32.mrf.mxu1 }
 0x49f   : > { %v1147_v61 = vrot.slane %v1146_v58, 2  ;;  %v1155_v62 = vadd.f32 %v1154_v59, %v1153_v57  ;;  %v1560_v63 = vpop.f32.mrf.mxu1 }
 0x4a1   : > { %v1148_v0 = vadd.f32 %v1147_v61, %v1146_v58  ;;  %v1156_v1 = vrot.slane %v1155_v62, 2 }
 0x4a3   : > { %v1149_v2 = vrot.slane %v1148_v0, 1  ;;  %v1157_v4 = vadd.f32 %v1156_v1, %v1155_v62 }
 0x4a5   : > { %v1150_v3 = vadd.f32 %v1149_v2, %v1148_v0  ;;  %v1158_v5 = vrot.slane %v1157_v4, 1 }
 0x4a7   : > { %v1151_v6 = vmul.f32 0.5, %v1150_v3  ;;  %v1159_v7 = vadd.f32 %v1158_v5, %v1157_v4 }
 0x4a9   : > { %v1160_v8 = vmul.f32 0.5, %v1159_v7  ;;  %v1161_v9 = vmul.f32 %v1151_v6, %v1151_v6  ;;  %v1163_v12 = vsub.f32 %v1136_v52, %v1151_v6 }
 0x4ab   : > { %v1162_v10 = vsub.f32 %v1160_v8, %v1161_v9 }
 0x4ad   : > { %v1164_v11 = vadd.f32 1e-05, %v1162_v10 }
 0x4af   : > { %1652 = vrsqrt.f32 %v1164_v11 }
 0x4bc   : > { %v1653_v13 = vpop.eup %1652 }
 0x4bd   : > { %v1166_v15 = vmul.f32 %v1653_v13, %v1163_v12 }
 0x4bf   : > { %v1173_v17 = vmul.f32 %v1423_v14, %v1166_v15 }
 0x4c1   : > { %v1180_v18 = vadd.f32 %v1424_v16, %v1173_v17 }
 0x4c3   : > { %v1181_v19 = vmax.f32 %v1180_v18, 0.0 }
 0x4c5   : > { %v1182_v20 = vpack.c.bf16 %v1181_v19, %v1181_v19 }
 0x4c7   : > { %1578 = vmatmul.mubr.bf16.vlgmr.msra.gmra.mxu0 %v1182_v20 }
 0x587   : > { %v1281_v21 = vpop.f32.mrf.mxu0 }
 0x588   : > { %v1287_v22 = vsel %vm758_vm4, %v1281_v21, 0.0  ;;  %v1295_v23 = vmul.f32 %v1281_v21, %v1281_v21 }
 0x589   : > { %v1288_v24 = vrot.slane %v1287_v22, 4  ;;  %v1579_v25 = vpop.f32.mrf.mxu0 }
 0x58a   : > { %v1296_v26 = vsel %vm758_vm4, %v1295_v23, 0.0 }
 0x58b   : > { %v1289_v27 = vadd.f32 %v1288_v24, %v1287_v22  ;;  %v1297_v28 = vrot.slane %v1296_v26, 4  ;;  %v1284_v29 = vpop.f32.mrf.mxu0 }
 0x58d   : > { %v1290_v30 = vrot.slane %v1289_v27, 2  ;;  %v1298_v31 = vadd.f32 %v1297_v28, %v1296_v26  ;;  %v1580_v32 = vpop.f32.mrf.mxu0 }
 0x58f   : > { %v1291_v33 = vadd.f32 %v1290_v30, %v1289_v27  ;;  %v1299_v34 = vrot.slane %v1298_v31, 2 }
 0x591   : > { %v1292_v35 = vrot.slane %v1291_v33, 1  ;;  %v1300_v36 = vadd.f32 %v1299_v34, %v1298_v31 }
 0x593   : > { %v1293_v37 = vadd.f32 %v1292_v35, %v1291_v33  ;;  %v1301_v38 = vrot.slane %v1300_v36, 1 }
 0x595   : > { %v1294_v39 = vmul.f32 0.5, %v1293_v37  ;;  %v1302_v40 = vadd.f32 %v1301_v38, %v1300_v36 }
 0x597   : > { %v1303_v41 = vmul.f32 0.5, %v1302_v40  ;;  %v1304_v42 = vmul.f32 %v1294_v39, %v1294_v39  ;;  %v1306_v45 = vsub.f32 %v1281_v21, %v1294_v39 }
 0x599   : > { %v1305_v43 = vsub.f32 %v1303_v41, %v1304_v42 }
 0x59b   : > { %v1307_v44 = vadd.f32 1e-05, %v1305_v43 }
 0x59d   : > { %1654 = vrsqrt.f32 %v1307_v44 }
 0x5aa   : > { %v1655_v46 = vpop.eup %1654 }
 0x5ab   : > { %v1309_v47 = vmul.f32 %v1655_v46, %v1306_v45 }
 0x5ad   : > { %1310 = vst [vmem:[%s438_s30] sm:$0x3] %v1309_v47 }
 0x5ae PF: > { %s23_s25 = sadd.s32 1, %s1662_s25  }
 0x5af   : > { %p20_p4 = scmp.ge.s32.totalorder %s23_s25, 4  }
 0x5b1   :  { %22 = sbr.rel (!%p20_p4) target bundleno = 1 (0x1), region = 102 }

</bundles_post_ra>
